<compile_context>
chip_gen: v7x
topology: tpu7x:2x2x1
jax: 0.10.0
libtpu: 0.0.40
codegen_flags: <defaults>
</compile_context>

<pallas_src>
import functools

import numpy as np
import jax
import jax.numpy as jnp
from jax import lax
from jax.experimental import pallas as pl
from jax.experimental.pallas import tpu as pltpu

EPS = 1e-5
NEG_SLOPE = 0.2
IN_DIM = 256   # Discriminator1d(in_dim=256, inner_dim=64): 256 -> 64 -> 16 -> 4 -> 1


# ---------------------------------------------------------------------------
# Shared critic math (plain jnp; used both inside the Pallas kernel and by the
# plain-JAX twin that the gradient-penalty backward runs through).
# ---------------------------------------------------------------------------
def _leaky_relu(z):
    return jnp.maximum(z, NEG_SLOPE * z)


def _stem(x, w1):
    """Conv1d(1, 64, k=4, s=4, p=1) + LeakyReLU on (N, 256) -> (N*64, 64) bf16.

    Stride == kernel, so im2col is a pad + static reshape (pure layout); this
    runs in the XLA wrapper so the Pallas kernel gets a lane-dense activation.
    """
    N, D = x.shape
    xp = jnp.pad(x, ((0, 0), (1, 1)))[:, :D]          # [0, x[:, :D-1]]
    p = xp.reshape(N * (D // 4), 4)                   # (N*64, 4)
    z = jnp.dot(p, w1, preferred_element_type=jnp.float32)
    return _leaky_relu(z).astype(jnp.bfloat16)        # (N*64, 64)


def _conv_block(a, l_out, wf):
    """Conv1d(k=4, s=4, p=1) on row-major (rows, C_in) bf16 activations.

    Window element k of output row o is input row 4*o + k - 1 (zero for the
    left-pad element, i.e. when o is a per-sample first position).  The four
    shifted row-selections are tiny 0/1 matmuls with masks generated from
    iota; the weight matmul is a single fused (4*C_in, C_out) MXU push.
    """
    r_in, c_in = a.shape
    r_out = r_in // 4
    oi = lax.broadcasted_iota(jnp.int32, (r_out, r_in), 0)
    ii = lax.broadcasted_iota(jnp.int32, (r_out, r_in), 1)
    xs = []
    for k in range(4):
        m = ii == (4 * oi + (k - 1))
        if k == 0:
            # left zero-pad element of each sample's first window (l_out is a
            # power of two, so the per-sample position test is a bitwise and).
            m = jnp.logical_and(m, jnp.bitwise_and(oi, l_out - 1) != 0)
        sel = jnp.where(m, 1.0, 0.0).astype(jnp.bfloat16)
        xs.append(jnp.dot(sel, a, preferred_element_type=jnp.float32))
    xcat = jnp.concatenate(xs, axis=-1).astype(jnp.bfloat16)   # (r_out, 4*C_in)
    return jnp.dot(xcat, wf, preferred_element_type=jnp.float32)


def _batchnorm_groups(z, gamma, beta, n_groups):
    """Train-mode BatchNorm1d with per-group (per-batch) statistics.

    Groups are static, equal-size row halves of the merged row stack, so the
    semantics match running the critic separately per batch. Two-pass variance.
    """
    h = z.shape[0] // n_groups
    outs = []
    for g in range(n_groups):
        zg = z[g * h:(g + 1) * h]
        mu = jnp.mean(zg, axis=0, keepdims=True)
        d = zg - mu
        var = jnp.mean(d * d, axis=0, keepdims=True)
        outs.append(d * lax.rsqrt(var + EPS) * gamma + beta)
    if n_groups == 1:
        return outs[0]
    return jnp.concatenate(outs, axis=0)


def _critic_rows(a1, w2f, w3f, w4f, wl, bn, n_groups):
    """From stem activation (rows, 64) bf16 to pre-reduction logit rows (N, 512)."""
    # conv2 -> BN(128) -> LReLU
    z = _conv_block(a1, 16, w2f)                                   # (rows/4, 128)
    a = _leaky_relu(_batchnorm_groups(z, bn[0:1, :128], bn[1:2, :128], n_groups))
    # conv3 -> BN(256) -> LReLU
    z = _conv_block(a.astype(jnp.bfloat16), 4, w3f)                # (rows/16, 256)
    a = _leaky_relu(_batchnorm_groups(z, bn[2:3, :256], bn[3:4, :256], n_groups))
    # conv4 -> BN(512) -> LReLU
    z = _conv_block(a.astype(jnp.bfloat16), 1, w4f)                # (N, 512)
    a = _leaky_relu(_batchnorm_groups(z, bn[4:5, :], bn[5:6, :], n_groups))
    # TODO(synk): nn.Dropout(0.2) applied as identity (eval semantics).
    # Lane-dense pre-reduction output; the 512-lane sum happens in the wrapper.
    return a * wl                                                  # (N, 512)


# ---------------------------------------------------------------------------
# Pallas kernel: single grid step over the merged (source ++ target) rows.
# ---------------------------------------------------------------------------
def _critic_kernel(a1_ref, w2_ref, w3_ref, w4_ref, wl_ref, bn_ref, o_ref, *,
                   n_groups):
    o_ref[...] = _critic_rows(a1_ref[...], w2_ref[...], w3_ref[...],
                              w4_ref[...], wl_ref[...], bn_ref[...], n_groups)


def _cost_estimate(r1, weight_bytes, io_bytes):
    flops = 0
    for r_in, c_in, c_out in ((r1, 64, 128), (r1 // 4, 128, 256),
                              (r1 // 16, 256, 512)):
        r_out = r_in // 4
        flops += 2 * 4 * r_out * r_in * c_in        # iota-mask row gathers
        flops += 2 * r_out * 4 * c_in * c_out       # fused conv matmul
    return pl.CostEstimate(flops=int(flops), transcendentals=3 * 512,
                           bytes_accessed=int(weight_bytes + io_bytes))


def critic_forward_pallas(x, params, n_groups):
    """x: (N, 256) samples (n_groups equal batches stacked row-wise).

    Returns per-sample logits (N,).  BatchNorm statistics are per group.
    """
    N, D = x.shape
    assert D == IN_DIM and N % n_groups == 0
    a1 = _stem(x, params["w1"])                       # (N*64, 64) bf16, in XLA

    def full_spec(arr):
        shape = arr.shape
        return pl.BlockSpec(shape, lambda i, _n=len(shape): (0,) * _n)

    operands = (a1, params["w2f"], params["w3f"], params["w4f"],
                params["wl"], params["bn"])
    weight_bytes = sum(int(np.prod(o.shape)) * o.dtype.itemsize
                       for o in operands[1:])
    io_bytes = a1.size * a1.dtype.itemsize + N * 512 * 4

    prod = pl.pallas_call(
        functools.partial(_critic_kernel, n_groups=n_groups),
        out_shape=jax.ShapeDtypeStruct((N, 512), jnp.float32),
        grid=(1,),
        in_specs=[full_spec(o) for o in operands],
        out_specs=pl.BlockSpec((N, 512), lambda i: (0, 0)),
        compiler_params=pltpu.CompilerParams(
            dimension_semantics=("arbitrary",)),
        cost_estimate=_cost_estimate(a1.shape[0], weight_bytes, io_bytes),
    )(*operands)
    return jnp.sum(prod, axis=-1)                     # (N,) logits


# ---------------------------------------------------------------------------
# Plain-JAX twin (identical math / same bf16 params) — used only for the
# gradient-penalty backward pass.
# ---------------------------------------------------------------------------
def critic_forward_ref(x, params):
    a1 = _stem(x, params["w1"])
    prod = _critic_rows(a1, params["w2f"], params["w3f"], params["w4f"],
                        params["wl"], params["bn"], n_groups=1)
    return jnp.sum(prod, axis=-1)                     # (B,)


# ---------------------------------------------------------------------------
# WGAN-GP pieces
# ---------------------------------------------------------------------------
def gradient_penalty(params, h_s, h_t, key):
    B = h_s.shape[0]
    alpha = jax.random.uniform(key, (B, 1), dtype=jnp.float32)
    interpolates = h_s + alpha * (h_t - h_s)

    # TODO(synk): autodiff through pallas_call is not wired up (no custom_vjp);
    # the GP backward runs through the numerically-identical plain-JAX critic.
    def critic_sum(xi):
        return jnp.sum(critic_forward_ref(xi, params))

    grads = jax.grad(critic_sum)(interpolates)            # (B, D)
    gnorm = jnp.sqrt(jnp.sum(grads * grads, axis=1))      # .norm(2, dim=1)
    return jnp.mean((gnorm - 1.0) ** 2)


def wgan_gp_forward(params, target_feat, source_feat, key, *,
                    gamma=10.0, is_discriminator_batch=True):
    B = target_feat.shape[0]
    if is_discriminator_batch:
        gp = gradient_penalty(params, source_feat, target_feat, key)
        # ONE Pallas launch for BOTH critic evaluations; per-group BN inside
        # the kernel keeps the statistics of two separate torch forwards.
        x_stack = jnp.concatenate([source_feat, target_feat], axis=0)  # (2B, D)
        logits = critic_forward_pallas(x_stack, params, n_groups=2)    # (2B,)
        w_dist = jnp.mean(logits[:B]) - jnp.mean(logits[B:])
        loss = -w_dist + gamma * gp          # num_layers == 1 -> no division
        return {"loss": loss, "w_dist": w_dist, "gp": gp}
    logits = critic_forward_pallas(target_feat, params, n_groups=1)
    loss = -jnp.mean(logits)                 # wd_clf == 1
    return {"loss": loss, "w_dist": jnp.float32(0.0), "gp": jnp.float32(0.0)}


# ---------------------------------------------------------------------------
# Parameter init (kaiming_normal_, mode='fan_in'; BN weight=1, bias=0).
# Conv weights are stored pre-fused as (4*C_in, C_out) where row k*C_in + ci
# corresponds to torch weight[co, ci, k]; conv2/3/4 are bf16 (kernel dtype),
# the tiny stem / logit weights stay f32.  BN affine packed into one (6, 512).
# ---------------------------------------------------------------------------
def init_params(key):
    k1, k2, k3, k4, k5 = jax.random.split(key, 5)

    def kaiming(k, shape, fan_in, dtype=jnp.float32):
        w = ((2.0 / fan_in) ** 0.5) * jax.random.normal(k, shape, jnp.float32)
        return w.astype(dtype)

    params = {
        "w1":  kaiming(k1, (4, 64), 1 * 4),                        # Conv1d(1, 64)
        "w2f": kaiming(k2, (256, 128), 64 * 4, jnp.bfloat16),      # Conv1d(64, 128)
        "w3f": kaiming(k3, (512, 256), 128 * 4, jnp.bfloat16),     # Conv1d(128, 256)
        "w4f": kaiming(k4, (1024, 512), 256 * 4, jnp.bfloat16),    # Conv1d(256, 512)
        "wl":  kaiming(k5, (1, 512), 512),                         # Linear(512, 1)
    }
    bn = np.zeros((6, 512), np.float32)
    bn[0, :128] = 1.0   # BN(128) weight  (bias row 1 stays 0)
    bn[2, :256] = 1.0   # BN(256) weight
    bn[4, :512] = 1.0   # BN(512) weight
    params["bn"] = jnp.asarray(bn)
    return params


if __name__ == "__main__":
    # WGAN_GP(in_dim="256*1,", in_ndim="2*1,", num_layers=1, inner_dim=64,
    #         gamma=10, use_ada=False, use_bn=True)
    B = 2
    root = jax.random.PRNGKey(0)
    k_param, k_t, k_s, k_alpha = jax.random.split(root, 4)

    params = init_params(k_param)
    target_feat = jax.random.normal(k_t, (B, IN_DIM), jnp.float32)
    source_feat = jax.random.normal(k_s, (B, IN_DIM), jnp.float32)

    fwd = jax.jit(functools.partial(wgan_gp_forward, gamma=10.0,
                                    is_discriminator_batch=True))
    out = fwd(params, target_feat, source_feat, k_alpha)
    jax.block_until_ready(out["loss"])
    print("KERNEL_OK")
</pallas_src>

<mosaic_0001>
module attributes {stable_mosaic.version = 11 : i64} {
  func.func @_critic_kernel(%arg0: i32, %arg1: memref<256x64xbf16, #tpu.memory_space<vmem>>, %arg2: memref<256x128xbf16, #tpu.memory_space<vmem>>, %arg3: memref<512x256xbf16, #tpu.memory_space<vmem>>, %arg4: memref<1024x512xbf16, #tpu.memory_space<vmem>>, %arg5: memref<1x512xf32, #tpu.memory_space<vmem>>, %arg6: memref<6x512xf32, #tpu.memory_space<vmem>>, %arg7: memref<4x512xf32, #tpu.memory_space<vmem>>) attributes {dimension_semantics = [#tpu.dimension_semantics<arbitrary>], iteration_bounds = array<i64: 1>, scalar_prefetch = 0 : i64, scratch_operands = 0 : i64, tpu.core_type = #tpu.core_type<tc>, window_params = [{pipeline_mode = #tpu.pipeline_mode<synchronous>, transform_indices = @transform_0, window_bounds = array<i64: 256, 64>}, {pipeline_mode = #tpu.pipeline_mode<synchronous>, transform_indices = @transform_1, window_bounds = array<i64: 256, 128>}, {pipeline_mode = #tpu.pipeline_mode<synchronous>, transform_indices = @transform_2, window_bounds = array<i64: 512, 256>}, {pipeline_mode = #tpu.pipeline_mode<synchronous>, transform_indices = @transform_3, window_bounds = array<i64: 1024, 512>}, {pipeline_mode = #tpu.pipeline_mode<synchronous>, transform_indices = @transform_4, window_bounds = array<i64: 1, 512>}, {pipeline_mode = #tpu.pipeline_mode<synchronous>, transform_indices = @transform_5, window_bounds = array<i64: 6, 512>}, {pipeline_mode = #tpu.pipeline_mode<synchronous>, transform_indices = @transform_6, window_bounds = array<i64: 4, 512>}]} {
    %c0 = arith.constant 0 : index
    %c0_0 = arith.constant 0 : index
    %0 = vector.load %arg1[%c0, %c0_0] : memref<256x64xbf16, #tpu.memory_space<vmem>>, vector<256x64xbf16>
    %c0_1 = arith.constant 0 : index
    %c0_2 = arith.constant 0 : index
    %1 = vector.load %arg2[%c0_1, %c0_2] : memref<256x128xbf16, #tpu.memory_space<vmem>>, vector<256x128xbf16>
    %c0_3 = arith.constant 0 : index
    %c0_4 = arith.constant 0 : index
    %2 = vector.load %arg3[%c0_3, %c0_4] : memref<512x256xbf16, #tpu.memory_space<vmem>>, vector<512x256xbf16>
    %c0_5 = arith.constant 0 : index
    %c0_6 = arith.constant 0 : index
    %3 = vector.load %arg4[%c0_5, %c0_6] : memref<1024x512xbf16, #tpu.memory_space<vmem>>, vector<1024x512xbf16>
    %c0_7 = arith.constant 0 : index
    %c0_8 = arith.constant 0 : index
    %4 = vector.load %arg5[%c0_7, %c0_8] : memref<1x512xf32, #tpu.memory_space<vmem>>, vector<1x512xf32>
    %c0_9 = arith.constant 0 : index
    %c0_10 = arith.constant 0 : index
    %5 = vector.load %arg6[%c0_9, %c0_10] : memref<6x512xf32, #tpu.memory_space<vmem>>, vector<6x512xf32>
    %6 = tpu.iota {dimensions = array<i32: 0>} : vector<64x256xi32>
    %7 = tpu.iota {dimensions = array<i32: 1>} : vector<64x256xi32>
    %c4_i32 = arith.constant 4 : i32
    %8 = vector.broadcast %c4_i32 : i32 to vector<64x256xi32>
    %9 = arith.muli %8, %6 : vector<64x256xi32>
    %c-1_i32 = arith.constant -1 : i32
    %10 = vector.broadcast %c-1_i32 : i32 to vector<64x256xi32>
    %11 = arith.addi %9, %10 : vector<64x256xi32>
    %12 = arith.cmpi eq, %7, %11 : vector<64x256xi32>
    %c15_i32 = arith.constant 15 : i32
    %13 = vector.broadcast %c15_i32 : i32 to vector<64x256xi32>
    %14 = arith.andi %6, %13 : vector<64x256xi32>
    %c0_i32 = arith.constant 0 : i32
    %15 = vector.broadcast %c0_i32 : i32 to vector<64x256xi32>
    %16 = arith.cmpi ne, %14, %15 : vector<64x256xi32>
    %17 = arith.andi %12, %16 : vector<64x256xi1>
    %cst = arith.constant 1.000000e+00 : f32
    %cst_11 = arith.constant 0.000000e+00 : f32
    %18 = vector.broadcast %cst : f32 to vector<64x256xf32>
    %19 = vector.broadcast %cst_11 : f32 to vector<64x256xf32>
    %20 = arith.select %17, %18, %19 : vector<64x256xi1>, vector<64x256xf32>
    %21 = arith.truncf %20 : vector<64x256xf32> to vector<64x256xbf16>
    %cst_12 = arith.constant dense<0.000000e+00> : vector<64x64xf32>
    %22 = tpu.matmul %21, %0, %cst_12 {dimension_numbers = #tpu.dot_dimension_numbers<[1], [0], [0], [1], [0, 0, 1, 1], [], []>} : vector<64x256xbf16>, vector<256x64xbf16>, vector<64x64xf32> -> vector<64x64xf32>
    %c4_i32_13 = arith.constant 4 : i32
    %23 = vector.broadcast %c4_i32_13 : i32 to vector<64x256xi32>
    %24 = arith.muli %23, %6 : vector<64x256xi32>
    %c0_i32_14 = arith.constant 0 : i32
    %25 = vector.broadcast %c0_i32_14 : i32 to vector<64x256xi32>
    %26 = arith.addi %24, %25 : vector<64x256xi32>
    %27 = arith.cmpi eq, %7, %26 : vector<64x256xi32>
    %cst_15 = arith.constant 1.000000e+00 : f32
    %cst_16 = arith.constant 0.000000e+00 : f32
    %28 = vector.broadcast %cst_15 : f32 to vector<64x256xf32>
    %29 = vector.broadcast %cst_16 : f32 to vector<64x256xf32>
    %30 = arith.select %27, %28, %29 : vector<64x256xi1>, vector<64x256xf32>
    %31 = arith.truncf %30 : vector<64x256xf32> to vector<64x256xbf16>
    %cst_17 = arith.constant dense<0.000000e+00> : vector<64x64xf32>
    %32 = tpu.matmul %31, %0, %cst_17 {dimension_numbers = #tpu.dot_dimension_numbers<[1], [0], [0], [1], [0, 0, 1, 1], [], []>} : vector<64x256xbf16>, vector<256x64xbf16>, vector<64x64xf32> -> vector<64x64xf32>
    %c4_i32_18 = arith.constant 4 : i32
    %33 = vector.broadcast %c4_i32_18 : i32 to vector<64x256xi32>
    %34 = arith.muli %33, %6 : vector<64x256xi32>
    %c1_i32 = arith.constant 1 : i32
    %35 = vector.broadcast %c1_i32 : i32 to vector<64x256xi32>
    %36 = arith.addi %34, %35 : vector<64x256xi32>
    %37 = arith.cmpi eq, %7, %36 : vector<64x256xi32>
    %cst_19 = arith.constant 1.000000e+00 : f32
    %cst_20 = arith.constant 0.000000e+00 : f32
    %38 = vector.broadcast %cst_19 : f32 to vector<64x256xf32>
    %39 = vector.broadcast %cst_20 : f32 to vector<64x256xf32>
    %40 = arith.select %37, %38, %39 : vector<64x256xi1>, vector<64x256xf32>
    %41 = arith.truncf %40 : vector<64x256xf32> to vector<64x256xbf16>
    %cst_21 = arith.constant dense<0.000000e+00> : vector<64x64xf32>
    %42 = tpu.matmul %41, %0, %cst_21 {dimension_numbers = #tpu.dot_dimension_numbers<[1], [0], [0], [1], [0, 0, 1, 1], [], []>} : vector<64x256xbf16>, vector<256x64xbf16>, vector<64x64xf32> -> vector<64x64xf32>
    %c4_i32_22 = arith.constant 4 : i32
    %43 = vector.broadcast %c4_i32_22 : i32 to vector<64x256xi32>
    %44 = arith.muli %43, %6 : vector<64x256xi32>
    %c2_i32 = arith.constant 2 : i32
    %45 = vector.broadcast %c2_i32 : i32 to vector<64x256xi32>
    %46 = arith.addi %44, %45 : vector<64x256xi32>
    %47 = arith.cmpi eq, %7, %46 : vector<64x256xi32>
    %cst_23 = arith.constant 1.000000e+00 : f32
    %cst_24 = arith.constant 0.000000e+00 : f32
    %48 = vector.broadcast %cst_23 : f32 to vector<64x256xf32>
    %49 = vector.broadcast %cst_24 : f32 to vector<64x256xf32>
    %50 = arith.select %47, %48, %49 : vector<64x256xi1>, vector<64x256xf32>
    %51 = arith.truncf %50 : vector<64x256xf32> to vector<64x256xbf16>
    %cst_25 = arith.constant dense<0.000000e+00> : vector<64x64xf32>
    %52 = tpu.matmul %51, %0, %cst_25 {dimension_numbers = #tpu.dot_dimension_numbers<[1], [0], [0], [1], [0, 0, 1, 1], [], []>} : vector<64x256xbf16>, vector<256x64xbf16>, vector<64x64xf32> -> vector<64x64xf32>
    %53 = tpu.concatenate %22, %32, %42, %52 in 1 : vector<64x64xf32>, vector<64x64xf32>, vector<64x64xf32>, vector<64x64xf32> -> vector<64x256xf32>
    %54 = arith.truncf %53 : vector<64x256xf32> to vector<64x256xbf16>
    %cst_26 = arith.constant dense<0.000000e+00> : vector<64x128xf32>
    %55 = tpu.matmul %54, %1, %cst_26 {dimension_numbers = #tpu.dot_dimension_numbers<[1], [0], [0], [1], [0, 0, 1, 1], [], []>} : vector<64x256xbf16>, vector<256x128xbf16>, vector<64x128xf32> -> vector<64x128xf32>
    %56 = vector.extract_strided_slice %5 {offsets = [0, 0], sizes = [1, 128], strides = [1, 1]} : vector<6x512xf32> to vector<1x128xf32>
    %57 = vector.extract_strided_slice %5 {offsets = [1, 0], sizes = [1, 128], strides = [1, 1]} : vector<6x512xf32> to vector<1x128xf32>
    %58 = vector.extract_strided_slice %55 {offsets = [0, 0], sizes = [32, 128], strides = [1, 1]} : vector<64x128xf32> to vector<32x128xf32>
    %cst_27 = arith.constant dense<0.000000e+00> : vector<128xf32>
    %59 = vector.multi_reduction <add>, %58, %cst_27 [0] : vector<32x128xf32> to vector<128xf32>
    %60 = vector.shape_cast %59 : vector<128xf32> to vector<1x128xf32>
    %cst_28 = arith.constant 3.200000e+01 : f32
    %61 = vector.broadcast %cst_28 : f32 to vector<1x128xf32>
    %62 = arith.divf %60, %61 : vector<1x128xf32>
    %63 = vector.broadcast %62 : vector<1x128xf32> to vector<32x128xf32>
    %64 = arith.subf %58, %63 : vector<32x128xf32>
    %65 = arith.mulf %64, %64 : vector<32x128xf32>
    %cst_29 = arith.constant dense<0.000000e+00> : vector<128xf32>
    %66 = vector.multi_reduction <add>, %65, %cst_29 [0] : vector<32x128xf32> to vector<128xf32>
    %67 = vector.shape_cast %66 : vector<128xf32> to vector<1x128xf32>
    %cst_30 = arith.constant 3.200000e+01 : f32
    %68 = vector.broadcast %cst_30 : f32 to vector<1x128xf32>
    %69 = arith.divf %67, %68 : vector<1x128xf32>
    %cst_31 = arith.constant 9.99999974E-6 : f32
    %70 = vector.broadcast %cst_31 : f32 to vector<1x128xf32>
    %71 = arith.addf %69, %70 : vector<1x128xf32>
    %72 = math.rsqrt %71 : vector<1x128xf32>
    %73 = vector.broadcast %72 : vector<1x128xf32> to vector<32x128xf32>
    %74 = arith.mulf %64, %73 : vector<32x128xf32>
    %75 = vector.broadcast %56 : vector<1x128xf32> to vector<32x128xf32>
    %76 = arith.mulf %74, %75 : vector<32x128xf32>
    %77 = vector.broadcast %57 : vector<1x128xf32> to vector<32x128xf32>
    %78 = arith.addf %76, %77 : vector<32x128xf32>
    %79 = vector.extract_strided_slice %55 {offsets = [32, 0], sizes = [32, 128], strides = [1, 1]} : vector<64x128xf32> to vector<32x128xf32>
    %cst_32 = arith.constant dense<0.000000e+00> : vector<128xf32>
    %80 = vector.multi_reduction <add>, %79, %cst_32 [0] : vector<32x128xf32> to vector<128xf32>
    %81 = vector.shape_cast %80 : vector<128xf32> to vector<1x128xf32>
    %cst_33 = arith.constant 3.200000e+01 : f32
    %82 = vector.broadcast %cst_33 : f32 to vector<1x128xf32>
    %83 = arith.divf %81, %82 : vector<1x128xf32>
    %84 = vector.broadcast %83 : vector<1x128xf32> to vector<32x128xf32>
    %85 = arith.subf %79, %84 : vector<32x128xf32>
    %86 = arith.mulf %85, %85 : vector<32x128xf32>
    %cst_34 = arith.constant dense<0.000000e+00> : vector<128xf32>
    %87 = vector.multi_reduction <add>, %86, %cst_34 [0] : vector<32x128xf32> to vector<128xf32>
    %88 = vector.shape_cast %87 : vector<128xf32> to vector<1x128xf32>
    %cst_35 = arith.constant 3.200000e+01 : f32
    %89 = vector.broadcast %cst_35 : f32 to vector<1x128xf32>
    %90 = arith.divf %88, %89 : vector<1x128xf32>
    %cst_36 = arith.constant 9.99999974E-6 : f32
    %91 = vector.broadcast %cst_36 : f32 to vector<1x128xf32>
    %92 = arith.addf %90, %91 : vector<1x128xf32>
    %93 = math.rsqrt %92 : vector<1x128xf32>
    %94 = vector.broadcast %93 : vector<1x128xf32> to vector<32x128xf32>
    %95 = arith.mulf %85, %94 : vector<32x128xf32>
    %96 = vector.broadcast %56 : vector<1x128xf32> to vector<32x128xf32>
    %97 = arith.mulf %95, %96 : vector<32x128xf32>
    %98 = vector.broadcast %57 : vector<1x128xf32> to vector<32x128xf32>
    %99 = arith.addf %97, %98 : vector<32x128xf32>
    %100 = tpu.concatenate %78, %99 in 0 : vector<32x128xf32>, vector<32x128xf32> -> vector<64x128xf32>
    %cst_37 = arith.constant 2.000000e-01 : f32
    %101 = vector.broadcast %cst_37 : f32 to vector<64x128xf32>
    %102 = arith.mulf %101, %100 : vector<64x128xf32>
    %103 = arith.maximumf %100, %102 : vector<64x128xf32>
    %104 = arith.truncf %103 : vector<64x128xf32> to vector<64x128xbf16>
    %105 = tpu.iota {dimensions = array<i32: 0>} : vector<16x64xi32>
    %106 = tpu.iota {dimensions = array<i32: 1>} : vector<16x64xi32>
    %c4_i32_38 = arith.constant 4 : i32
    %107 = vector.broadcast %c4_i32_38 : i32 to vector<16x64xi32>
    %108 = arith.muli %107, %105 : vector<16x64xi32>
    %c-1_i32_39 = arith.constant -1 : i32
    %109 = vector.broadcast %c-1_i32_39 : i32 to vector<16x64xi32>
    %110 = arith.addi %108, %109 : vector<16x64xi32>
    %111 = arith.cmpi eq, %106, %110 : vector<16x64xi32>
    %c3_i32 = arith.constant 3 : i32
    %112 = vector.broadcast %c3_i32 : i32 to vector<16x64xi32>
    %113 = arith.andi %105, %112 : vector<16x64xi32>
    %c0_i32_40 = arith.constant 0 : i32
    %114 = vector.broadcast %c0_i32_40 : i32 to vector<16x64xi32>
    %115 = arith.cmpi ne, %113, %114 : vector<16x64xi32>
    %116 = arith.andi %111, %115 : vector<16x64xi1>
    %cst_41 = arith.constant 1.000000e+00 : f32
    %cst_42 = arith.constant 0.000000e+00 : f32
    %117 = vector.broadcast %cst_41 : f32 to vector<16x64xf32>
    %118 = vector.broadcast %cst_42 : f32 to vector<16x64xf32>
    %119 = arith.select %116, %117, %118 : vector<16x64xi1>, vector<16x64xf32>
    %120 = arith.truncf %119 : vector<16x64xf32> to vector<16x64xbf16>
    %cst_43 = arith.constant dense<0.000000e+00> : vector<16x128xf32>
    %121 = tpu.matmul %120, %104, %cst_43 {dimension_numbers = #tpu.dot_dimension_numbers<[1], [0], [0], [1], [0, 0, 1, 1], [], []>} : vector<16x64xbf16>, vector<64x128xbf16>, vector<16x128xf32> -> vector<16x128xf32>
    %c4_i32_44 = arith.constant 4 : i32
    %122 = vector.broadcast %c4_i32_44 : i32 to vector<16x64xi32>
    %123 = arith.muli %122, %105 : vector<16x64xi32>
    %c0_i32_45 = arith.constant 0 : i32
    %124 = vector.broadcast %c0_i32_45 : i32 to vector<16x64xi32>
    %125 = arith.addi %123, %124 : vector<16x64xi32>
    %126 = arith.cmpi eq, %106, %125 : vector<16x64xi32>
    %cst_46 = arith.constant 1.000000e+00 : f32
    %cst_47 = arith.constant 0.000000e+00 : f32
    %127 = vector.broadcast %cst_46 : f32 to vector<16x64xf32>
    %128 = vector.broadcast %cst_47 : f32 to vector<16x64xf32>
    %129 = arith.select %126, %127, %128 : vector<16x64xi1>, vector<16x64xf32>
    %130 = arith.truncf %129 : vector<16x64xf32> to vector<16x64xbf16>
    %cst_48 = arith.constant dense<0.000000e+00> : vector<16x128xf32>
    %131 = tpu.matmul %130, %104, %cst_48 {dimension_numbers = #tpu.dot_dimension_numbers<[1], [0], [0], [1], [0, 0, 1, 1], [], []>} : vector<16x64xbf16>, vector<64x128xbf16>, vector<16x128xf32> -> vector<16x128xf32>
    %c4_i32_49 = arith.constant 4 : i32
    %132 = vector.broadcast %c4_i32_49 : i32 to vector<16x64xi32>
    %133 = arith.muli %132, %105 : vector<16x64xi32>
    %c1_i32_50 = arith.constant 1 : i32
    %134 = vector.broadcast %c1_i32_50 : i32 to vector<16x64xi32>
    %135 = arith.addi %133, %134 : vector<16x64xi32>
    %136 = arith.cmpi eq, %106, %135 : vector<16x64xi32>
    %cst_51 = arith.constant 1.000000e+00 : f32
    %cst_52 = arith.constant 0.000000e+00 : f32
    %137 = vector.broadcast %cst_51 : f32 to vector<16x64xf32>
    %138 = vector.broadcast %cst_52 : f32 to vector<16x64xf32>
    %139 = arith.select %136, %137, %138 : vector<16x64xi1>, vector<16x64xf32>
    %140 = arith.truncf %139 : vector<16x64xf32> to vector<16x64xbf16>
    %cst_53 = arith.constant dense<0.000000e+00> : vector<16x128xf32>
    %141 = tpu.matmul %140, %104, %cst_53 {dimension_numbers = #tpu.dot_dimension_numbers<[1], [0], [0], [1], [0, 0, 1, 1], [], []>} : vector<16x64xbf16>, vector<64x128xbf16>, vector<16x128xf32> -> vector<16x128xf32>
    %c4_i32_54 = arith.constant 4 : i32
    %142 = vector.broadcast %c4_i32_54 : i32 to vector<16x64xi32>
    %143 = arith.muli %142, %105 : vector<16x64xi32>
    %c2_i32_55 = arith.constant 2 : i32
    %144 = vector.broadcast %c2_i32_55 : i32 to vector<16x64xi32>
    %145 = arith.addi %143, %144 : vector<16x64xi32>
    %146 = arith.cmpi eq, %106, %145 : vector<16x64xi32>
    %cst_56 = arith.constant 1.000000e+00 : f32
    %cst_57 = arith.constant 0.000000e+00 : f32
    %147 = vector.broadcast %cst_56 : f32 to vector<16x64xf32>
    %148 = vector.broadcast %cst_57 : f32 to vector<16x64xf32>
    %149 = arith.select %146, %147, %148 : vector<16x64xi1>, vector<16x64xf32>
    %150 = arith.truncf %149 : vector<16x64xf32> to vector<16x64xbf16>
    %cst_58 = arith.constant dense<0.000000e+00> : vector<16x128xf32>
    %151 = tpu.matmul %150, %104, %cst_58 {dimension_numbers = #tpu.dot_dimension_numbers<[1], [0], [0], [1], [0, 0, 1, 1], [], []>} : vector<16x64xbf16>, vector<64x128xbf16>, vector<16x128xf32> -> vector<16x128xf32>
    %152 = tpu.concatenate %121, %131, %141, %151 in 1 : vector<16x128xf32>, vector<16x128xf32>, vector<16x128xf32>, vector<16x128xf32> -> vector<16x512xf32>
    %153 = arith.truncf %152 : vector<16x512xf32> to vector<16x512xbf16>
    %cst_59 = arith.constant dense<0.000000e+00> : vector<16x256xf32>
    %154 = tpu.matmul %153, %2, %cst_59 {dimension_numbers = #tpu.dot_dimension_numbers<[1], [0], [0], [1], [0, 0, 1, 1], [], []>} : vector<16x512xbf16>, vector<512x256xbf16>, vector<16x256xf32> -> vector<16x256xf32>
    %155 = vector.extract_strided_slice %5 {offsets = [2, 0], sizes = [1, 256], strides = [1, 1]} : vector<6x512xf32> to vector<1x256xf32>
    %156 = vector.extract_strided_slice %5 {offsets = [3, 0], sizes = [1, 256], strides = [1, 1]} : vector<6x512xf32> to vector<1x256xf32>
    %157 = vector.extract_strided_slice %154 {offsets = [0, 0], sizes = [8, 256], strides = [1, 1]} : vector<16x256xf32> to vector<8x256xf32>
    %cst_60 = arith.constant dense<0.000000e+00> : vector<256xf32>
    %158 = vector.multi_reduction <add>, %157, %cst_60 [0] : vector<8x256xf32> to vector<256xf32>
    %159 = vector.shape_cast %158 : vector<256xf32> to vector<1x256xf32>
    %cst_61 = arith.constant 8.000000e+00 : f32
    %160 = vector.broadcast %cst_61 : f32 to vector<1x256xf32>
    %161 = arith.divf %159, %160 : vector<1x256xf32>
    %162 = vector.broadcast %161 : vector<1x256xf32> to vector<8x256xf32>
    %163 = arith.subf %157, %162 : vector<8x256xf32>
    %164 = arith.mulf %163, %163 : vector<8x256xf32>
    %cst_62 = arith.constant dense<0.000000e+00> : vector<256xf32>
    %165 = vector.multi_reduction <add>, %164, %cst_62 [0] : vector<8x256xf32> to vector<256xf32>
    %166 = vector.shape_cast %165 : vector<256xf32> to vector<1x256xf32>
    %cst_63 = arith.constant 8.000000e+00 : f32
    %167 = vector.broadcast %cst_63 : f32 to vector<1x256xf32>
    %168 = arith.divf %166, %167 : vector<1x256xf32>
    %cst_64 = arith.constant 9.99999974E-6 : f32
    %169 = vector.broadcast %cst_64 : f32 to vector<1x256xf32>
    %170 = arith.addf %168, %169 : vector<1x256xf32>
    %171 = math.rsqrt %170 : vector<1x256xf32>
    %172 = vector.broadcast %171 : vector<1x256xf32> to vector<8x256xf32>
    %173 = arith.mulf %163, %172 : vector<8x256xf32>
    %174 = vector.broadcast %155 : vector<1x256xf32> to vector<8x256xf32>
    %175 = arith.mulf %173, %174 : vector<8x256xf32>
    %176 = vector.broadcast %156 : vector<1x256xf32> to vector<8x256xf32>
    %177 = arith.addf %175, %176 : vector<8x256xf32>
    %178 = vector.extract_strided_slice %154 {offsets = [8, 0], sizes = [8, 256], strides = [1, 1]} : vector<16x256xf32> to vector<8x256xf32>
    %cst_65 = arith.constant dense<0.000000e+00> : vector<256xf32>
    %179 = vector.multi_reduction <add>, %178, %cst_65 [0] : vector<8x256xf32> to vector<256xf32>
    %180 = vector.shape_cast %179 : vector<256xf32> to vector<1x256xf32>
    %cst_66 = arith.constant 8.000000e+00 : f32
    %181 = vector.broadcast %cst_66 : f32 to vector<1x256xf32>
    %182 = arith.divf %180, %181 : vector<1x256xf32>
    %183 = vector.broadcast %182 : vector<1x256xf32> to vector<8x256xf32>
    %184 = arith.subf %178, %183 : vector<8x256xf32>
    %185 = arith.mulf %184, %184 : vector<8x256xf32>
    %cst_67 = arith.constant dense<0.000000e+00> : vector<256xf32>
    %186 = vector.multi_reduction <add>, %185, %cst_67 [0] : vector<8x256xf32> to vector<256xf32>
    %187 = vector.shape_cast %186 : vector<256xf32> to vector<1x256xf32>
    %cst_68 = arith.constant 8.000000e+00 : f32
    %188 = vector.broadcast %cst_68 : f32 to vector<1x256xf32>
    %189 = arith.divf %187, %188 : vector<1x256xf32>
    %cst_69 = arith.constant 9.99999974E-6 : f32
    %190 = vector.broadcast %cst_69 : f32 to vector<1x256xf32>
    %191 = arith.addf %189, %190 : vector<1x256xf32>
    %192 = math.rsqrt %191 : vector<1x256xf32>
    %193 = vector.broadcast %192 : vector<1x256xf32> to vector<8x256xf32>
    %194 = arith.mulf %184, %193 : vector<8x256xf32>
    %195 = vector.broadcast %155 : vector<1x256xf32> to vector<8x256xf32>
    %196 = arith.mulf %194, %195 : vector<8x256xf32>
    %197 = vector.broadcast %156 : vector<1x256xf32> to vector<8x256xf32>
    %198 = arith.addf %196, %197 : vector<8x256xf32>
    %199 = tpu.concatenate %177, %198 in 0 : vector<8x256xf32>, vector<8x256xf32> -> vector<16x256xf32>
    %cst_70 = arith.constant 2.000000e-01 : f32
    %200 = vector.broadcast %cst_70 : f32 to vector<16x256xf32>
    %201 = arith.mulf %200, %199 : vector<16x256xf32>
    %202 = arith.maximumf %199, %201 : vector<16x256xf32>
    %203 = arith.truncf %202 : vector<16x256xf32> to vector<16x256xbf16>
    %204 = tpu.iota {dimensions = array<i32: 0>} : vector<4x16xi32>
    %205 = tpu.iota {dimensions = array<i32: 1>} : vector<4x16xi32>
    %c4_i32_71 = arith.constant 4 : i32
    %206 = vector.broadcast %c4_i32_71 : i32 to vector<4x16xi32>
    %207 = arith.muli %206, %204 : vector<4x16xi32>
    %c-1_i32_72 = arith.constant -1 : i32
    %208 = vector.broadcast %c-1_i32_72 : i32 to vector<4x16xi32>
    %209 = arith.addi %207, %208 : vector<4x16xi32>
    %210 = arith.cmpi eq, %205, %209 : vector<4x16xi32>
    %c0_i32_73 = arith.constant 0 : i32
    %211 = vector.broadcast %c0_i32_73 : i32 to vector<4x16xi32>
    %212 = arith.andi %204, %211 : vector<4x16xi32>
    %c0_i32_74 = arith.constant 0 : i32
    %213 = vector.broadcast %c0_i32_74 : i32 to vector<4x16xi32>
    %214 = arith.cmpi ne, %212, %213 : vector<4x16xi32>
    %215 = arith.andi %210, %214 : vector<4x16xi1>
    %cst_75 = arith.constant 1.000000e+00 : f32
    %cst_76 = arith.constant 0.000000e+00 : f32
    %216 = vector.broadcast %cst_75 : f32 to vector<4x16xf32>
    %217 = vector.broadcast %cst_76 : f32 to vector<4x16xf32>
    %218 = arith.select %215, %216, %217 : vector<4x16xi1>, vector<4x16xf32>
    %219 = arith.truncf %218 : vector<4x16xf32> to vector<4x16xbf16>
    %cst_77 = arith.constant dense<0.000000e+00> : vector<4x256xf32>
    %220 = tpu.matmul %219, %203, %cst_77 {dimension_numbers = #tpu.dot_dimension_numbers<[1], [0], [0], [1], [0, 0, 1, 1], [], []>} : vector<4x16xbf16>, vector<16x256xbf16>, vector<4x256xf32> -> vector<4x256xf32>
    %c4_i32_78 = arith.constant 4 : i32
    %221 = vector.broadcast %c4_i32_78 : i32 to vector<4x16xi32>
    %222 = arith.muli %221, %204 : vector<4x16xi32>
    %c0_i32_79 = arith.constant 0 : i32
    %223 = vector.broadcast %c0_i32_79 : i32 to vector<4x16xi32>
    %224 = arith.addi %222, %223 : vector<4x16xi32>
    %225 = arith.cmpi eq, %205, %224 : vector<4x16xi32>
    %cst_80 = arith.constant 1.000000e+00 : f32
    %cst_81 = arith.constant 0.000000e+00 : f32
    %226 = vector.broadcast %cst_80 : f32 to vector<4x16xf32>
    %227 = vector.broadcast %cst_81 : f32 to vector<4x16xf32>
    %228 = arith.select %225, %226, %227 : vector<4x16xi1>, vector<4x16xf32>
    %229 = arith.truncf %228 : vector<4x16xf32> to vector<4x16xbf16>
    %cst_82 = arith.constant dense<0.000000e+00> : vector<4x256xf32>
    %230 = tpu.matmul %229, %203, %cst_82 {dimension_numbers = #tpu.dot_dimension_numbers<[1], [0], [0], [1], [0, 0, 1, 1], [], []>} : vector<4x16xbf16>, vector<16x256xbf16>, vector<4x256xf32> -> vector<4x256xf32>
    %c4_i32_83 = arith.constant 4 : i32
    %231 = vector.broadcast %c4_i32_83 : i32 to vector<4x16xi32>
    %232 = arith.muli %231, %204 : vector<4x16xi32>
    %c1_i32_84 = arith.constant 1 : i32
    %233 = vector.broadcast %c1_i32_84 : i32 to vector<4x16xi32>
    %234 = arith.addi %232, %233 : vector<4x16xi32>
    %235 = arith.cmpi eq, %205, %234 : vector<4x16xi32>
    %cst_85 = arith.constant 1.000000e+00 : f32
    %cst_86 = arith.constant 0.000000e+00 : f32
    %236 = vector.broadcast %cst_85 : f32 to vector<4x16xf32>
    %237 = vector.broadcast %cst_86 : f32 to vector<4x16xf32>
    %238 = arith.select %235, %236, %237 : vector<4x16xi1>, vector<4x16xf32>
    %239 = arith.truncf %238 : vector<4x16xf32> to vector<4x16xbf16>
    %cst_87 = arith.constant dense<0.000000e+00> : vector<4x256xf32>
    %240 = tpu.matmul %239, %203, %cst_87 {dimension_numbers = #tpu.dot_dimension_numbers<[1], [0], [0], [1], [0, 0, 1, 1], [], []>} : vector<4x16xbf16>, vector<16x256xbf16>, vector<4x256xf32> -> vector<4x256xf32>
    %c4_i32_88 = arith.constant 4 : i32
    %241 = vector.broadcast %c4_i32_88 : i32 to vector<4x16xi32>
    %242 = arith.muli %241, %204 : vector<4x16xi32>
    %c2_i32_89 = arith.constant 2 : i32
    %243 = vector.broadcast %c2_i32_89 : i32 to vector<4x16xi32>
    %244 = arith.addi %242, %243 : vector<4x16xi32>
    %245 = arith.cmpi eq, %205, %244 : vector<4x16xi32>
    %cst_90 = arith.constant 1.000000e+00 : f32
    %cst_91 = arith.constant 0.000000e+00 : f32
    %246 = vector.broadcast %cst_90 : f32 to vector<4x16xf32>
    %247 = vector.broadcast %cst_91 : f32 to vector<4x16xf32>
    %248 = arith.select %245, %246, %247 : vector<4x16xi1>, vector<4x16xf32>
    %249 = arith.truncf %248 : vector<4x16xf32> to vector<4x16xbf16>
    %cst_92 = arith.constant dense<0.000000e+00> : vector<4x256xf32>
    %250 = tpu.matmul %249, %203, %cst_92 {dimension_numbers = #tpu.dot_dimension_numbers<[1], [0], [0], [1], [0, 0, 1, 1], [], []>} : vector<4x16xbf16>, vector<16x256xbf16>, vector<4x256xf32> -> vector<4x256xf32>
    %251 = tpu.concatenate %220, %230, %240, %250 in 1 : vector<4x256xf32>, vector<4x256xf32>, vector<4x256xf32>, vector<4x256xf32> -> vector<4x1024xf32>
    %252 = arith.truncf %251 : vector<4x1024xf32> to vector<4x1024xbf16>
    %cst_93 = arith.constant dense<0.000000e+00> : vector<4x512xf32>
    %253 = tpu.matmul %252, %3, %cst_93 {dimension_numbers = #tpu.dot_dimension_numbers<[1], [0], [0], [1], [0, 0, 1, 1], [], []>} : vector<4x1024xbf16>, vector<1024x512xbf16>, vector<4x512xf32> -> vector<4x512xf32>
    %254 = vector.extract_strided_slice %5 {offsets = [4, 0], sizes = [1, 512], strides = [1, 1]} : vector<6x512xf32> to vector<1x512xf32>
    %255 = vector.extract_strided_slice %5 {offsets = [5, 0], sizes = [1, 512], strides = [1, 1]} : vector<6x512xf32> to vector<1x512xf32>
    %256 = vector.extract_strided_slice %253 {offsets = [0, 0], sizes = [2, 512], strides = [1, 1]} : vector<4x512xf32> to vector<2x512xf32>
    %cst_94 = arith.constant dense<0.000000e+00> : vector<512xf32>
    %257 = vector.multi_reduction <add>, %256, %cst_94 [0] : vector<2x512xf32> to vector<512xf32>
    %258 = vector.shape_cast %257 : vector<512xf32> to vector<1x512xf32>
    %cst_95 = arith.constant 2.000000e+00 : f32
    %259 = vector.broadcast %cst_95 : f32 to vector<1x512xf32>
    %260 = arith.divf %258, %259 : vector<1x512xf32>
    %261 = vector.broadcast %260 : vector<1x512xf32> to vector<2x512xf32>
    %262 = arith.subf %256, %261 : vector<2x512xf32>
    %263 = arith.mulf %262, %262 : vector<2x512xf32>
    %cst_96 = arith.constant dense<0.000000e+00> : vector<512xf32>
    %264 = vector.multi_reduction <add>, %263, %cst_96 [0] : vector<2x512xf32> to vector<512xf32>
    %265 = vector.shape_cast %264 : vector<512xf32> to vector<1x512xf32>
    %cst_97 = arith.constant 2.000000e+00 : f32
    %266 = vector.broadcast %cst_97 : f32 to vector<1x512xf32>
    %267 = arith.divf %265, %266 : vector<1x512xf32>
    %cst_98 = arith.constant 9.99999974E-6 : f32
    %268 = vector.broadcast %cst_98 : f32 to vector<1x512xf32>
    %269 = arith.addf %267, %268 : vector<1x512xf32>
    %270 = math.rsqrt %269 : vector<1x512xf32>
    %271 = vector.broadcast %270 : vector<1x512xf32> to vector<2x512xf32>
    %272 = arith.mulf %262, %271 : vector<2x512xf32>
    %273 = vector.broadcast %254 : vector<1x512xf32> to vector<2x512xf32>
    %274 = arith.mulf %272, %273 : vector<2x512xf32>
    %275 = vector.broadcast %255 : vector<1x512xf32> to vector<2x512xf32>
    %276 = arith.addf %274, %275 : vector<2x512xf32>
    %277 = vector.extract_strided_slice %253 {offsets = [2, 0], sizes = [2, 512], strides = [1, 1]} : vector<4x512xf32> to vector<2x512xf32>
    %cst_99 = arith.constant dense<0.000000e+00> : vector<512xf32>
    %278 = vector.multi_reduction <add>, %277, %cst_99 [0] : vector<2x512xf32> to vector<512xf32>
    %279 = vector.shape_cast %278 : vector<512xf32> to vector<1x512xf32>
    %cst_100 = arith.constant 2.000000e+00 : f32
    %280 = vector.broadcast %cst_100 : f32 to vector<1x512xf32>
    %281 = arith.divf %279, %280 : vector<1x512xf32>
    %282 = vector.broadcast %281 : vector<1x512xf32> to vector<2x512xf32>
    %283 = arith.subf %277, %282 : vector<2x512xf32>
    %284 = arith.mulf %283, %283 : vector<2x512xf32>
    %cst_101 = arith.constant dense<0.000000e+00> : vector<512xf32>
    %285 = vector.multi_reduction <add>, %284, %cst_101 [0] : vector<2x512xf32> to vector<512xf32>
    %286 = vector.shape_cast %285 : vector<512xf32> to vector<1x512xf32>
    %cst_102 = arith.constant 2.000000e+00 : f32
    %287 = vector.broadcast %cst_102 : f32 to vector<1x512xf32>
    %288 = arith.divf %286, %287 : vector<1x512xf32>
    %cst_103 = arith.constant 9.99999974E-6 : f32
    %289 = vector.broadcast %cst_103 : f32 to vector<1x512xf32>
    %290 = arith.addf %288, %289 : vector<1x512xf32>
    %291 = math.rsqrt %290 : vector<1x512xf32>
    %292 = vector.broadcast %291 : vector<1x512xf32> to vector<2x512xf32>
    %293 = arith.mulf %283, %292 : vector<2x512xf32>
    %294 = vector.broadcast %254 : vector<1x512xf32> to vector<2x512xf32>
    %295 = arith.mulf %293, %294 : vector<2x512xf32>
    %296 = vector.broadcast %255 : vector<1x512xf32> to vector<2x512xf32>
    %297 = arith.addf %295, %296 : vector<2x512xf32>
    %298 = tpu.concatenate %276, %297 in 0 : vector<2x512xf32>, vector<2x512xf32> -> vector<4x512xf32>
    %cst_104 = arith.constant 2.000000e-01 : f32
    %299 = vector.broadcast %cst_104 : f32 to vector<4x512xf32>
    %300 = arith.mulf %299, %298 : vector<4x512xf32>
    %301 = arith.maximumf %298, %300 : vector<4x512xf32>
    %302 = vector.broadcast %4 : vector<1x512xf32> to vector<4x512xf32>
    %303 = arith.mulf %301, %302 : vector<4x512xf32>
    %c0_105 = arith.constant 0 : index
    %c0_106 = arith.constant 0 : index
    %304 = vector.load %arg7[%c0_105, %c0_106] : memref<4x512xf32, #tpu.memory_space<vmem>>, vector<4x512xf32>
    tpu.vector_store %arg7[%c0_105, %c0_106], %303 {strides = array<i32>} : memref<4x512xf32, #tpu.memory_space<vmem>>, vector<4x512xf32>,
    return
  }
  func.func @transform_0(%arg0: i32) -> (i32, i32) {
    %c0_i32 = arith.constant 0 : i32
    %c0_i32_0 = arith.constant 0 : i32
    %c0_i32_1 = arith.constant 0 : i32
    return %c0_i32, %c0_i32_0 : i32, i32
  }
  func.func @transform_1(%arg0: i32) -> (i32, i32) {
    %c0_i32 = arith.constant 0 : i32
    %c0_i32_0 = arith.constant 0 : i32
    %c0_i32_1 = arith.constant 0 : i32
    return %c0_i32, %c0_i32_0 : i32, i32
  }
  func.func @transform_2(%arg0: i32) -> (i32, i32) {
    %c0_i32 = arith.constant 0 : i32
    %c0_i32_0 = arith.constant 0 : i32
    %c0_i32_1 = arith.constant 0 : i32
    return %c0_i32, %c0_i32_0 : i32, i32
  }
  func.func @transform_3(%arg0: i32) -> (i32, i32) {
    %c0_i32 = arith.constant 0 : i32
    %c0_i32_0 = arith.constant 0 : i32
    %c0_i32_1 = arith.constant 0 : i32
    return %c0_i32, %c0_i32_0 : i32, i32
  }
  func.func @transform_4(%arg0: i32) -> (i32, i32) {
    %c0_i32 = arith.constant 0 : i32
    %c0_i32_0 = arith.constant 0 : i32
    %c0_i32_1 = arith.constant 0 : i32
    return %c0_i32, %c0_i32_0 : i32, i32
  }
  func.func @transform_5(%arg0: i32) -> (i32, i32) {
    %c0_i32 = arith.constant 0 : i32
    %c0_i32_0 = arith.constant 0 : i32
    %c0_i32_1 = arith.constant 0 : i32
    return %c0_i32, %c0_i32_0 : i32, i32
  }
  func.func @transform_6(%arg0: i32) -> (i32, i32) {
    %c0_i32 = arith.constant 0 : i32
    %c0_i32_0 = arith.constant 0 : i32
    %c0_i32_1 = arith.constant 0 : i32
    return %c0_i32, %c0_i32_0 : i32, i32
  }
}

</mosaic_0001>

<bundles_post_ra>
// kernel: wgan_gp_forward.1
= control target key start
LH: loop header
LB: loop body
LE: loop exit
PB: predicated region body
PF: predicated region fallthrough
CT: control target
= control target key end

     0   :  { %v413_v0 = vlaneseq  ;;  %v5486_v31 = vmov 1.0|1.0   ;;  %v5487_v34 = vmov 0.0   ;;  %v7567_v61 = vmov 0  ;;  %s7512_s0 = inlined_call_operand.vmem [shape: bf16[256,64], index: 0, kind: input, shape index: {}]   ;;  %s7513_s1 = inlined_call_operand.vmem [shape: bf16[256,128], index: 1, kind: input, shape index: {}]   ;;  %s7514_s2 = inlined_call_operand.vmem [shape: bf16[512,256], index: 2, kind: input, shape index: {}]   ;;  %s7515_s5 = inlined_call_operand.vmem [shape: f32[6,512], index: 5, kind: input, shape index: {}]   ;;  %s7516_s3 = inlined_call_operand.vmem [shape: bf16[1024,512], index: 3, kind: input, shape index: {}]   ;;  %s7517_s4 = inlined_call_operand.vmem [shape: f32[1,512], index: 4, kind: input, shape index: {}]   ;;  %s7518_s6 = inlined_call_operand.vmem [shape: f32[4,512], index: 6, kind: output, shape index: {}]  }
   0x1   :  { %v5529_v1 = vld [vmem:[%s7512_s0 + $0x40] sm:$0xff]   ;;  %v5542_v4 = vld [vmem:[%s7512_s0 + $0x48] sm:$0xff]   ;;  %v5557_v7 = vld [vmem:[%s7512_s0 + $0x50] sm:$0xff]  }
   0x2   :  { %v5534_v2 = vld [vmem:[%s7512_s0] sm:$0xff]   ;;  %v5536_v3 = vshrl.u32 %v413_v0, 7  ;;  %4586 = vmatprep.subr.bf16.mxu1 %v5529_v1  ;;  %4666 = vmatprep.subr.bf16.mxu0 %v5529_v1  ;;  %v5549_v5 = vld [vmem:[%s7512_s0 + $0x8] sm:$0xff]   ;;  %v5560_v8 = vand.u32 127, %v413_v0  ;;  %v5569_v10 = vld [vmem:[%s7512_s0 + $0x10] sm:$0xff]  }
   0x3   :  { %4587 = vmatpush3.bf16.msra.mxu1 %v5534_v2  ;;  %4667 = vmatpush3.bf16.msra.mxu0 %v5534_v2  ;;  %v5578_v12 = vld [vmem:[%s7512_s0 + $0x58] sm:$0xff]   ;;  %v5602_v18 = vld [vmem:[%s7512_s0 + $0x60] sm:$0xff]   ;;  %v5626_v24 = vld [vmem:[%s7512_s0 + $0x68] sm:$0xff]  }
   0x4   :  { %v415_v6 = vadd.s32 8, %v5536_v3  ;;  %4588 = vmatprep.subr.bf16.mxu1 %v5542_v4  ;;  %4668 = vmatprep.subr.bf16.mxu0 %v5542_v4  ;;  %v5563_v9 = vmul.u32 4, %v5536_v3  ;;  %v457_v13 = vand.u32 15, %v5536_v3  ;;  %v5583_v14 = vadd.s32 128, %v5560_v8  ;;  %v5592_v16 = vld [vmem:[%s7512_s0 + $0x18] sm:$0xff]   ;;  %v5617_v23 = vld [vmem:[%s7512_s0 + $0x20] sm:$0xff]  }
   0x5   :  { %v1368_v19 = vand.u32 3, %v5536_v3  ;;  %v416_v22 = vadd.s32 16, %v5536_v3  ;;  %v417_v25 = vadd.s32 24, %v5536_v3  ;;  %v418_v26 = vadd.s32 32, %v5536_v3  ;;  %v5648_v30 = vld [vmem:[%s7512_s0 + $0x28] sm:$0xff]   ;;  %v5661_v33 = vld [vmem:[%s7512_s0 + $0x70] sm:$0xff]  }
   0x6   :  { %v5571_v11 = vmul.u32 4, %v415_v6  ;;  %v5586_v15 = vadd.s32 4294967295, %v5563_v9  ;;  %vm5606_vm0 = vcmp.ne.s32.totalorder %v457_v13, 0  ;;  %v1369_v21 = vand.u32 3, %v415_v6  ;;  %v5691_v43 = vld [vmem:[%s7512_s0 + $0x30] sm:$0xff]   ;;  %v5707_v48 = vld [vmem:[%s7512_s0 + $0x78] sm:$0xff]  }
   0x7   :  { %4589 = vmatpush3.bf16.msra.mxu1 %v5549_v5  ;;  %4669 = vmatpush3.bf16.msra.mxu0 %v5549_v5  ;;  %vm1370_vm3 = vcmp.ne.s32.totalorder %v1368_v19, 0  ;;  %v5633_v27 = vmul.u32 4, %v416_v22  ;;  %v5636_v28 = vadd.s32 48, %v5536_v3  ;;  %v419_v32 = vadd.s32 40, %v5536_v3  ;;  %v5739_v56 = vld [vmem:[%s7512_s0 + $0x38] sm:$0xff]  }
   0x8   :  { %4590 = vmatprep.subr.bf16.mxu1 %v5557_v7  ;;  %4670 = vmatprep.subr.bf16.mxu0 %v5557_v7  ;;  %v5595_v17 = vadd.s32 4294967295, %v5571_v11  ;;  %vm442_vm1 = vcmp.eq.s32.totalorder %v5583_v14, %v5586_v15  ;;  %vm441_vm5 = vcmp.eq.s32.totalorder %v5560_v8, %v5586_v15  ;;  %vm5640_vm7 = vcmp.ne.s32.totalorder %v1369_v21, 0 }
   0x9   :  { %vm474_vm4 = vmand %vm442_vm1, %vm5606_vm0  ;;  %v5666_v36 = vmul.u32 4, %v417_v25  ;;  %v459_v37 = vand.u32 15, %v416_v22  ;;  %v5668_v38 = vmul.u32 4, %v418_v26  ;;  %v435_v39 = vadd.s32 4294967295, %v5633_v27 }
   0xa   :  { %vm444_vm2 = vcmp.eq.s32.totalorder %v5583_v14, %v5595_v17  ;;  %vm1372_vm8 = vmand %vm441_vm5, %vm1370_vm3  ;;  %vm443_vm9 = vcmp.eq.s32.totalorder %v5560_v8, %v5595_v17  ;;  %v421_v40 = vadd.s32 56, %v5536_v3  ;;  %v5679_v41 = vmul.u32 4, %v5636_v28 }
   0xb   :  { %4591 = vmatpush3.bf16.msra.mxu1 %v5569_v10  ;;  %4671 = vmatpush3.bf16.msra.mxu0 %v5569_v10  ;;  %vm4179_vm6 = vmpackc.low %vm444_vm2, %vm474_vm4  ;;  %v5664_v35 = vsel %vm1372_vm8, 1.0, %v5487_v34  ;;  %vm7520_vm11 = vcmp.eq.s32.totalorder %v5560_v8, %v5563_v9  ;;  %v5695_v45 = vmul.u32 4, %v419_v32  ;;  %v461_v46 = vand.u32 15, %v418_v26 }
   0xc   :  { %4592 = vmatprep.subr.bf16.mxu1 %v5578_v12  ;;  %4672 = vmatprep.subr.bf16.mxu0 %v5578_v12  ;;  %vm1373_vm10 = vmand %vm443_vm9, %vm5640_vm7  ;;  %v5701_v47 = vsel %vm7520_vm11, 1.0, %v5487_v34  ;;  %v436_v49 = vadd.s32 4294967295, %v5666_v36  ;;  %vm5710_vm12 = vcmp.ne.s32.totalorder %v459_v37, 0  ;;  %v5715_v51 = vadd.s32 4294967295, %v5668_v38 }
   0xd   :  { %4180 = vmatprep.mubr.msk.bf16.mxu1 %vm4179_vm6, %v5486_v31  ;;  %v5683_v42 = vsel %vm1373_vm10, 1.0, %v5487_v34  ;;  %vm7519_vm13 = vcmp.eq.s32.totalorder %v5560_v8, %v5571_v11  ;;  %vm446_vm14 = vcmp.eq.s32.totalorder %v5583_v14, %v435_v39  ;;  %v5721_v52 = vmul.u32 4, %v421_v40  ;;  %vm5746_vm15 = vmand %vm441_vm5, %vm5606_vm0 }
   0xe   :  { %v1376_v44 = vpack.c.bf16 %v5683_v42, %v5664_v35  ;;  %v5724_v53 = vadd.s32 4294967295, %v5679_v41  ;;  %v5730_v54 = vsel %vm7519_vm13, 1.0, %v5487_v34  ;;  %vm445_vm1 = vcmp.eq.s32.totalorder %v5560_v8, %v435_v39  ;;  %vm5765_vm0 = vmand %vm446_vm14, %vm5710_vm12  ;;  %v4983_v35 = vld [vmem:[%s7514_s2 + $0x24] ss:$8 sps:$4 sm:$0xff]   ;;  %v4981_v42 = vld [vmem:[%s7514_s2 + $0x20] ss:$8 sps:$4 sm:$0xff]  }
   0xf   :  { %4593 = vmatpush3.bf16.msra.mxu1 %v5592_v16  ;;  %4673 = vmatpush3.bf16.msra.mxu0 %v5592_v16  ;;  %v706_v55 = vpack.c.bf16 %v5730_v54, %v5701_v47  ;;  %v5752_v58 = vadd.s32 4294967295, %v5695_v45  ;;  %vm5754_vm2 = vcmp.ne.s32.totalorder %v461_v46, 0  ;;  %v463_v60 = vand.u32 15, %v5636_v28  ;;  %vm5791_vm8 = vmpackc.low %vm443_vm9, %vm5746_vm15  ;;  %v4993_v54 = vld [vmem:[%s7514_s2 + $0x60] ss:$8 sps:$4 sm:$0xff]  }
  0x10   :  { %4594 = vmatprep.subr.bf16.mxu1 %v5602_v18  ;;  %4674 = vmatprep.subr.bf16.mxu0 %v5602_v18  ;;  %vm448_vm3 = vcmp.eq.s32.totalorder %v5583_v14, %v436_v49  ;;  %vm447_vm4 = vcmp.eq.s32.totalorder %v5560_v8, %v436_v49  ;;  %vm450_vm5 = vcmp.eq.s32.totalorder %v5583_v14, %v5715_v51  ;;  %v5775_v62 = vadd.s32 4294967295, %v5721_v52 }
  0x11   :  { %vm449_vm6 = vcmp.eq.s32.totalorder %v5560_v8, %v5715_v51  ;;  %vm454_vm7 = vcmp.eq.s32.totalorder %v5583_v14, %v5724_v53  ;;  %v5780_v63 = vadd.s32 2, %v5563_v9  ;;  %v5783_v0 = vadd.s32 2, %v5571_v11  ;;  %vm5813_vm9 = vmpackc.low %vm448_vm3, %vm5765_vm0 }
  0x12   :  { %v5796_v13 = vadd.s32 2, %v5633_v27  ;;  %v5799_v15 = vadd.s32 2, %v5666_v36  ;;  %v5802_v19 = vadd.s32 2, %v5668_v38  ;;  %v5805_v20 = vadd.s32 2, %v5695_v45  ;;  %vm5830_vm3 = vmand %vm445_vm1, %vm5710_vm12 }
  0x13   :  { %4595 = vmatpush3.bf16.msra.mxu1 %v5617_v23  ;;  %4675 = vmatpush3.bf16.msra.mxu0 %v5617_v23  ;;  %vm7522_vm10 = vcmp.eq.s32.totalorder %v5560_v8, %v5780_v63  ;;  %vm7521_vm15 = vcmp.eq.s32.totalorder %v5560_v8, %v5783_v0  ;;  %vm5850_vm1 = vcmp.ne.s32.totalorder %v463_v60, 0  ;;  %v898_v32 = vadd.s32 2, %v5679_v41  ;;  %vm481_vm11 = vmand %vm449_vm6, %vm5754_vm2 }
  0x14   :  { %4596 = vmatprep.subr.bf16.mxu1 %v5626_v24  ;;  %4676 = vmatprep.subr.bf16.mxu0 %v5626_v24  ;;  %v5838_v22 = vsel %vm7522_vm10, 1.0, %v5487_v34  ;;  %v5844_v25 = vsel %vm7521_vm15, 1.0, %v5487_v34  ;;  %v899_v37 = vadd.s32 2, %v5721_v52  ;;  %v779_v39 = vadd.s32 1, %v5563_v9  ;;  %vm486_vm13 = vmand %vm454_vm7, %vm5850_vm1 }
  0x15   :  { %v932_v28 = vpack.c.bf16 %v5844_v25, %v5838_v22  ;;  %v780_v40 = vadd.s32 1, %v5571_v11  ;;  %vm913_vm10 = vcmp.eq.s32.totalorder %v5583_v14, %v898_v32  ;;  %v7571_v6 = vmov 0  ;;  %v5010_v25 = vld [vmem:[%s7514_s2 + $0xb4] ss:$8 sps:$4 sm:$0xff]  }
  0x16   :  { %vm7524_vm14 = vcmp.eq.s32.totalorder %v5560_v8, %v779_v39  ;;  %vm788_vm12 = vcmp.eq.s32.totalorder %v5583_v14, %v779_v39  ;;  %v784_v17 = vadd.s32 1, %v5695_v45  ;;  %v786_v21 = vadd.s32 1, %v5721_v52 }
  0x17   :  { %4597 = vmatpush3.bf16.msra.mxu1 %v5648_v30  ;;  %4677 = vmatpush3.bf16.msra.mxu0 %v5648_v30  ;;  %v5920_v46 = vsel %vm7524_vm14, 1.0, %v5487_v34  ;;  %vm790_vm0 = vcmp.eq.s32.totalorder %v5583_v14, %v780_v40 }
  0x18   :  { %4598 = vmatprep.subr.bf16.mxu1 %v5661_v33  ;;  %4678 = vmatprep.subr.bf16.mxu0 %v5661_v33 }
  0x1b   :  { %4599 = vmatpush3.bf16.msra.mxu1 %v5691_v43  ;;  %4679 = vmatpush3.bf16.msra.mxu0 %v5691_v43 }
  0x1c   :  { %4600 = vmatprep.subr.bf16.mxu1 %v5707_v48  ;;  %4680 = vmatprep.subr.bf16.mxu0 %v5707_v48 }
  0x1f   :  { %4601 = vmatpush3.bf16.msra.mxu1 %v5739_v56  ;;  %4681 = vmatpush3.bf16.msra.mxu0 %v5739_v56 }
  0x20   :  { %4626 = vmatprep.subr.bf16.mxu1 %v5529_v1 }
  0x22   :  { %4182 = vmatmul.mubr.msk.bf16.vlgmr.msra.gmra.mrb[0].mxu1 %vm5791_vm8, %v5486_v31  ;;  %vm5880_vm8 = vmpackc.low %vm447_vm4, %vm5830_vm3  ;;  %vm451_vm3 = vcmp.eq.s32.totalorder %v5560_v8, %v5752_v58 }
  0x23   :  { %4627 = vmatpush3.bf16.msra.mxu1 %v5534_v2  ;;  %4184 = vmatprep.mubr.msk.bf16.mxu1 %vm5813_vm9, %v5486_v31  ;;  %vm452_vm9 = vcmp.eq.s32.totalorder %v5583_v14, %v5752_v58  ;;  %vm482_vm4 = vmand %vm450_vm5, %vm5754_vm2  ;;  %vm456_vm5 = vcmp.eq.s32.totalorder %v5583_v14, %v5775_v62  ;;  %vm7523_vm2 = vcmp.eq.s32.totalorder %v5560_v8, %v780_v40 }
  0x24   :  { %4628 = vmatprep.subr.bf16.mxu1 %v5542_v4  ;;  %vm4187_vm6 = vmpackc.low %vm452_vm9, %vm482_vm4  ;;  %v5925_v49 = vsel %vm7523_vm2, 1.0, %v5487_v34  ;;  %vm453_vm4 = vcmp.eq.s32.totalorder %v5560_v8, %v5724_v53 }
  0x25   :  { %vm5931_vm7 = vmpackc.low %vm451_vm3, %vm481_vm11  ;;  %v819_v51 = vpack.c.bf16 %v5925_v49, %v5920_v46  ;;  %vm7551_vm11 = vcmp.eq.s32.totalorder %v5583_v14, %v5780_v63  ;;  %vm7552_vm3 = vcmp.eq.s32.totalorder %v5583_v14, %v5783_v0  ;;  %v4984_v49 = vld [vmem:[%s7514_s2 + $0x30] ss:$8 sps:$4 sm:$0xff]  }
  0x26   :  { %vm5937_vm9 = vmpackc.low %vm456_vm5, %vm486_vm13  ;;  %vm7555_vm13 = vcmp.eq.s32.totalorder %v5560_v8, %v5780_v63  ;;  %v781_v63 = vadd.s32 1, %v5633_v27 }
  0x27   :  { %4629 = vmatpush3.bf16.msra.mxu1 %v5549_v5  ;;  %vm5952_vm2 = vmpackc.low %vm7552_vm3, %vm7551_vm11  ;;  %vm7562_vm3 = vcmp.eq.s32.totalorder %v5583_v14, %v5799_v15 }
  0x28   :  { %4630 = vmatprep.subr.bf16.mxu1 %v5557_v7  ;;  %vm5971_vm11 = vmand %vm453_vm4, %vm5850_vm1  ;;  %vm7569_vm4 = vcmp.eq.s32.totalorder %v5583_v14, %v5802_v19 }
  0x2a   :  { %4186 = vmatmul.mubr.msk.bf16.gmra.mrb[4].mxu1 %vm5880_vm8, %v5486_v31  ;;  %vm7556_vm8 = vcmp.eq.s32.totalorder %v5560_v8, %v5783_v0  ;;  %v782_v0 = vadd.s32 1, %v5666_v36 }
  0x2b   :  { %4631 = vmatpush3.bf16.msra.mxu1 %v5569_v10  ;;  %4188 = vmatprep.mubr.msk.bf16.mxu1 %vm4187_vm6, %v5486_v31  ;;  %vm5964_vm5 = vmpackc.low %vm7556_vm8, %vm7555_vm13  ;;  %vm7561_vm6 = vcmp.eq.s32.totalorder %v5583_v14, %v5796_v13  ;;  %vm7565_vm13 = vcmp.eq.s32.totalorder %v5560_v8, %v5796_v13  ;;  %vm7566_vm8 = vcmp.eq.s32.totalorder %v5560_v8, %v5799_v15  ;;  %v7575_v13 = vmov 0 }
  0x2c   :  { %4632 = vmatprep.subr.bf16.mxu1 %v5578_v12  ;;  %vm5981_vm14 = vmpackc.low %vm7562_vm3, %vm7561_vm6  ;;  %vm7570_vm6 = vcmp.eq.s32.totalorder %v5583_v14, %v5805_v20 }
  0x2d   :  { %vm5991_vm1 = vmpackc.low %vm7566_vm8, %vm7565_vm13  ;;  %vm7573_vm13 = vcmp.eq.s32.totalorder %v5560_v8, %v5802_v19  ;;  %vm7574_vm8 = vcmp.eq.s32.totalorder %v5560_v8, %v5805_v20  ;;  %v7582_v19 = vmov 0  ;;  %v783_v20 = vadd.s32 1, %v5668_v38 }
  0x2e   :  { %v7568_v61 = vsel %vm5991_vm1, 4294967295, %v7567_v61  ;;  %vm6003_vm3 = vmpackc.low %vm7570_vm6, %vm7569_vm4  ;;  %vm7577_vm4 = vcmp.eq.s32.totalorder %v5583_v14, %v899_v37  ;;  %vm794_vm1 = vcmp.eq.s32.totalorder %v5583_v14, %v782_v0 }
  0x2f   :  { %v7572_v6 = vsel %vm6003_vm3, 4294967295, %v7571_v6  ;;  %4633 = vmatpush3.bf16.msra.mxu1 %v5592_v16  ;;  %vm6014_vm15 = vmpackc.low %vm7574_vm8, %vm7573_vm13  ;;  %vm7580_vm3 = vcmp.eq.s32.totalorder %v5560_v8, %v898_v32  ;;  %vm7581_vm13 = vcmp.eq.s32.totalorder %v5560_v8, %v899_v37 }
  0x30   :  { %v7576_v13 = vsel %vm6014_vm15, 4294967295, %v7575_v13  ;;  %4634 = vmatprep.subr.bf16.mxu1 %v5602_v18  ;;  %vm6025_vm6 = vmpackc.low %vm7577_vm4, %vm913_vm10  ;;  %vm792_vm15 = vcmp.eq.s32.totalorder %v5583_v14, %v781_v63  ;;  %vm7585_vm4 = vcmp.eq.s32.totalorder %v5560_v8, %v780_v40 }
  0x31   :  { %vm6033_vm8 = vmpackc.low %vm7581_vm13, %vm7580_vm3  ;;  %vm7584_vm3 = vcmp.eq.s32.totalorder %v5560_v8, %v779_v39 }
  0x32   :  { %v7583_v19 = vsel %vm6033_vm8, 4294967295, %v7582_v19  ;;  %4190 = vmatmul.mubr.msk.bf16.gmra.mrb[8].mxu1 %vm5931_vm7, %v5486_v31  ;;  %vm4211_vm10 = vmpackc.low %vm790_vm0, %vm788_vm12  ;;  %vm455_vm8 = vcmp.eq.s32.totalorder %v5560_v8, %v5775_v62  ;;  %vm675_vm0 = vcmp.eq.s32.totalorder %v5583_v14, %v5563_v9  ;;  %vm677_vm12 = vcmp.eq.s32.totalorder %v5583_v14, %v5571_v11 }
  0x33   :  { %4635 = vmatpush3.bf16.msra.mxu1 %v5617_v23  ;;  %4192 = vmatprep.mubr.msk.bf16.mxu1 %vm5937_vm9, %v5486_v31  ;;  %vm4213_vm13 = vmpackc.low %vm7585_vm4, %vm7584_vm3  ;;  %vm796_vm3 = vcmp.eq.s32.totalorder %v5583_v14, %v783_v20  ;;  %vm798_vm4 = vcmp.eq.s32.totalorder %v5583_v14, %v784_v17  ;;  %v785_v62 = vadd.s32 1, %v5679_v41 }
  0x34   :  { %4636 = vmatprep.subr.bf16.mxu1 %v5626_v24  ;;  %4212 = vmatprep.mubr.msk.bf16.mxu0 %vm4211_vm10, %v5486_v31  ;;  %vm4215_vm7 = vmpackc.low %vm794_vm1, %vm792_vm15  ;;  %vm791_vm15 = vcmp.eq.s32.totalorder %v5560_v8, %v781_v63  ;;  %vm793_vm1 = vcmp.eq.s32.totalorder %v5560_v8, %v782_v0 }
  0x35   :  { %4214 = vmatmul.mubr.msk.bf16.vlgmr.msra.gmra.mrb[0].mxu0 %vm4213_vm13, %v5486_v31  ;;  %vm4193_vm9 = vmpackc.low %vm455_vm8, %vm5971_vm11  ;;  %vm679_vm11 = vcmp.eq.s32.totalorder %v5583_v14, %v5633_v27  ;;  %vm681_vm8 = vcmp.eq.s32.totalorder %v5583_v14, %v5666_v36 }
  0x36   :  { %4216 = vmatprep.mubr.msk.bf16.mxu0 %vm4215_vm7, %v5486_v31  ;;  %vm4195_vm10 = vmpackc.low %vm677_vm12, %vm675_vm0  ;;  %vm7586_vm0 = vcmp.eq.s32.totalorder %v5560_v8, %v5563_v9  ;;  %vm7587_vm12 = vcmp.eq.s32.totalorder %v5560_v8, %v5571_v11  ;;  %v4965_v9 = vld [vmem:[%s7513_s1 + $0x58] sm:$0xff]   ;;  %v4967_v11 = vld [vmem:[%s7513_s1 + $0x60] sm:$0xff]  }
  0x37   :  { %4637 = vmatpush3.bf16.msra.mxu1 %v5648_v30  ;;  %vm4217_vm13 = vmpackc.low %vm793_vm1, %vm791_vm15  ;;  %vm795_vm15 = vcmp.eq.s32.totalorder %v5560_v8, %v783_v20  ;;  %vm797_vm1 = vcmp.eq.s32.totalorder %v5560_v8, %v784_v17 }
  0x38   :  { %4638 = vmatprep.subr.bf16.mxu1 %v5661_v33  ;;  %vm4219_vm7 = vmpackc.low %vm798_vm4, %vm796_vm3  ;;  %vm800_vm3 = vcmp.eq.s32.totalorder %v5583_v14, %v785_v62  ;;  %vm802_vm4 = vcmp.eq.s32.totalorder %v5583_v14, %v786_v21 }
  0x3a   :  { %4194 = vmatmul.mubr.msk.bf16.gmra.mrb[12].mxu1 %vm4193_vm9, %v5486_v31  ;;  %vm4197_vm9 = vmpackc.low %vm7587_vm12, %vm7586_vm0  ;;  %vm678_vm0 = vcmp.eq.s32.totalorder %v5560_v8, %v5633_v27  ;;  %vm685_vm12 = vcmp.eq.s32.totalorder %v5583_v14, %v5695_v45 }
  0x3b   :  { %4639 = vmatpush3.bf16.msra.mxu1 %v5691_v43  ;;  %4196 = vmatprep.mubr.msk.bf16.mxu1 %vm4195_vm10, %v5486_v31  ;;  %vm4199_vm10 = vmpackc.low %vm681_vm8, %vm679_vm11  ;;  %vm680_vm11 = vcmp.eq.s32.totalorder %v5560_v8, %v5666_v36  ;;  %vm683_vm8 = vcmp.eq.s32.totalorder %v5583_v14, %v5668_v38 }
  0x3c   :  { %4640 = vmatprep.subr.bf16.mxu1 %v5707_v48 }
  0x3d   :  { %4218 = vmatmul.mubr.msk.bf16.gmra.mrb[4].mxu0 %vm4217_vm13, %v5486_v31  ;;  %vm4221_vm13 = vmpackc.low %vm797_vm1, %vm795_vm15  ;;  %vm799_vm15 = vcmp.eq.s32.totalorder %v5560_v8, %v785_v62  ;;  %vm801_vm1 = vcmp.eq.s32.totalorder %v5560_v8, %v786_v21 }
  0x3e   :  { %4220 = vmatprep.mubr.msk.bf16.mxu0 %vm4219_vm7, %v5486_v31  ;;  %vm4223_vm7 = vmpackc.low %vm802_vm4, %vm800_vm3  ;;  %vm682_vm4 = vcmp.eq.s32.totalorder %v5560_v8, %v5668_v38 }
  0x3f   :  { %4641 = vmatpush3.bf16.msra.mxu1 %v5739_v56  ;;  %vm4225_vm3 = vmpackc.low %vm801_vm1, %vm799_vm15  ;;  %vm7588_vm1 = vnez %v7568_v61 }
  0x40   :  { %4706 = vmatprep.subr.bf16.mxu1 %v5529_v1  ;;  %v4959_v1 = vld [vmem:[%s7513_s1 + $0x40] sm:$0xff]  }
  0x41   :  { %4746 = vmatprep.subr.bf16.mxu0 %v4959_v1 }
  0x42   :  { %4198 = vmatmul.mubr.msk.bf16.vlgmr.msra.gmra.mrb[16].mxu1 %vm4197_vm9, %v5486_v31  ;;  %vm4201_vm9 = vmpackc.low %vm680_vm11, %vm678_vm0  ;;  %vm689_vm0 = vcmp.eq.s32.totalorder %v5583_v14, %v5721_v52 }
  0x43   :  { %4707 = vmatpush3.bf16.msra.mxu1 %v5534_v2  ;;  %4200 = vmatprep.mubr.msk.bf16.mxu1 %vm4199_vm10, %v5486_v31  ;;  %vm4203_vm10 = vmpackc.low %vm685_vm12, %vm683_vm8  ;;  %vm686_vm12 = vcmp.eq.s32.totalorder %v5560_v8, %v5679_v41  ;;  %v4960_v2 = vld [vmem:[%s7513_s1] sm:$0xff]  }
  0x44   :  { %4708 = vmatprep.subr.bf16.mxu1 %v5542_v4  ;;  %v4961_v4 = vld [vmem:[%s7513_s1 + $0x48] sm:$0xff]   ;;  %4747 = vmatpush3.bf16.msra.mxu0 %v4960_v2 }
  0x45   :  { %4222 = vmatmul.mubr.msk.bf16.gmra.mrb[8].mxu0 %vm4221_vm13, %v5486_v31  ;;  %vm684_vm13 = vcmp.eq.s32.totalorder %v5560_v8, %v5695_v45  ;;  %4748 = vmatprep.subr.bf16.mxu0 %v4961_v4 }
  0x46   :  { %4224 = vmatprep.mubr.msk.bf16.mxu0 %vm4223_vm7, %v5486_v31  ;;  %vm687_vm7 = vcmp.eq.s32.totalorder %v5583_v14, %v5679_v41  ;;  %vm4205_vm11 = vmpackc.low %vm684_vm13, %vm682_vm4  ;;  %v4969_v14 = vld [vmem:[%s7513_s1 + $0x68] sm:$0xff]   ;;  %vm3870_vm4 = vcmask 1041408  }
  0x47   :  { %4709 = vmatpush3.bf16.msra.mxu1 %v5549_v5  ;;  %vm4207_vm8 = vmpackc.low %vm689_vm0, %vm687_vm7  ;;  %v4962_v5 = vld [vmem:[%s7513_s1 + $0x8] sm:$0xff]  }
  0x48   :  { %4710 = vmatprep.subr.bf16.mxu1 %v5557_v7  ;;  %v4963_v7 = vld [vmem:[%s7513_s1 + $0x50] sm:$0xff]   ;;  %4749 = vmatpush3.bf16.msra.mxu0 %v4962_v5 }
  0x49   :  { %4750 = vmatprep.subr.bf16.mxu0 %v4963_v7 }
  0x4a   :  { %4202 = vmatmul.mubr.msk.bf16.gmra.mrb[20].mxu1 %vm4201_vm9, %v5486_v31  ;;  %vm688_vm9 = vcmp.eq.s32.totalorder %v5560_v8, %v5721_v52  ;;  %v4964_v8 = vld [vmem:[%s7513_s1 + $0x10] sm:$0xff]  }
  0x4b   :  { %4711 = vmatpush3.bf16.msra.mxu1 %v5569_v10  ;;  %4204 = vmatprep.mubr.msk.bf16.mxu1 %vm4203_vm10, %v5486_v31  ;;  %vm4209_vm15 = vmpackc.low %vm688_vm9, %vm686_vm12  ;;  %vm7589_vm10 = vnez %v7572_v6  ;;  %v4966_v10 = vld [vmem:[%s7513_s1 + $0x18] sm:$0xff]  }
  0x4c   :  { %4712 = vmatprep.subr.bf16.mxu1 %v5578_v12  ;;  %4751 = vmatpush3.bf16.msra.mxu0 %v4964_v8  ;;  %v4968_v12 = vld [vmem:[%s7513_s1 + $0x20] sm:$0xff]  }
  0x4d   :  { %4226 = vmatmul.mubr.msk.bf16.gmra.mrb[12].mxu0 %vm4225_vm3, %v5486_v31  ;;  %4752 = vmatprep.subr.bf16.mxu0 %v4965_v9  ;;  %vm2074_vm3 = vcmask 130048  }
  0x4f   :  { %4713 = vmatpush3.bf16.msra.mxu1 %v5592_v16  ;;  %v4970_v16 = vld [vmem:[%s7513_s1 + $0x28] sm:$0xff]  }
  0x50   :  { %4714 = vmatprep.subr.bf16.mxu1 %v5602_v18  ;;  %4753 = vmatpush3.bf16.msra.mxu0 %v4966_v10 }
  0x51   :  { %4754 = vmatprep.subr.bf16.mxu0 %v4967_v11 }
  0x52   :  { %4206 = vmatmul.mubr.msk.bf16.gmra.mrb[24].mxu1 %vm4205_vm11, %v5486_v31 }
  0x53   :  { %4715 = vmatpush3.bf16.msra.mxu1 %v5617_v23  ;;  %4208 = vmatprep.mubr.msk.bf16.mxu1 %vm4207_vm8, %v5486_v31 }
  0x54   :  { %4716 = vmatprep.subr.bf16.mxu1 %v5626_v24  ;;  %4755 = vmatpush3.bf16.msra.mxu0 %v4968_v12 }
  0x55   :  { %4756 = vmatprep.subr.bf16.mxu0 %v4969_v14 }
  0x57   :  { %4717 = vmatpush3.bf16.msra.mxu1 %v5648_v30 }
  0x58   :  { %4718 = vmatprep.subr.bf16.mxu1 %v5661_v33  ;;  %4757 = vmatpush3.bf16.msra.mxu0 %v4970_v16 }
  0x5a   :  { %4210 = vmatmul.mubr.msk.bf16.gmra.mrb[28].mxu1 %vm4209_vm15, %v5486_v31 }
  0x5b   :  { %4719 = vmatpush3.bf16.msra.mxu1 %v5691_v43  ;;  %4228 = vmatprep.mubr.msk.bf16.mxu1 %vm5952_vm2, %v5486_v31  ;;  %vm7590_vm2 = vnez %v7576_v13 }
  0x5c   :  { %4720 = vmatprep.subr.bf16.mxu1 %v5707_v48 }
  0x5f   :  { %4721 = vmatpush3.bf16.msra.mxu1 %v5739_v56 }
  0x60   :  { %4854 = vmatprep.subr.bf16.mxu1 %v4959_v1 }
  0x62   :  { %4230 = vmatmul.mubr.msk.bf16.vlgmr.msra.gmra.mrb[32].mxu1 %vm5964_vm5, %v5486_v31  ;;  %vm7591_vm5 = vnez %v7583_v19 }
  0x63   :  { %4232 = vmatprep.mubr.msk.bf16.mxu1 %vm5981_vm14, %v5486_v31  ;;  %4862 = vmatpush3.bf16.msra.mxu1 %v4960_v2  ;;  %vm1069_vm14 = vcmask 523264  }
  0x64   :  { %4855 = vmatprep.subr.bf16.mxu1 %v4961_v4 }
  0x67   :  { %4863 = vmatpush3.bf16.msra.mxu1 %v4962_v5 }
  0x68   :  { %4856 = vmatprep.subr.bf16.mxu1 %v4963_v7 }
  0x6a   :  { %4234 = vmatmul.mubr.msk.bf16.gmra.mrb[36].mxu1 %vm7588_vm1, %v5486_v31 }
  0x6b   :  { %4236 = vmatprep.mubr.msk.bf16.mxu1 %vm7589_vm10, %v5486_v31  ;;  %4864 = vmatpush3.bf16.msra.mxu1 %v4964_v8 }
  0x6c   :  { %4857 = vmatprep.subr.bf16.mxu1 %v4965_v9 }
  0x6f   :  { %4865 = vmatpush3.bf16.msra.mxu1 %v4966_v10 }
  0x70   :  { %4858 = vmatprep.subr.bf16.mxu1 %v4967_v11 }
  0x72   :  { %4238 = vmatmul.mubr.msk.bf16.gmra.mrb[40].mxu1 %vm7590_vm2, %v5486_v31 }
  0x73   :  { %4240 = vmatprep.mubr.msk.bf16.mxu1 %vm6025_vm6, %v5486_v31  ;;  %4866 = vmatpush3.bf16.msra.mxu1 %v4968_v12  ;;  %vm5489_vm6 = vmmov 0  }
  0x74   :  { %4859 = vmatprep.subr.bf16.mxu1 %v4969_v14 }
  0x77   :  { %4867 = vmatpush3.bf16.msra.mxu1 %v4970_v16 }
  0x7a   :  { %4242 = vmatmul.mubr.msk.bf16.gmra.mrb[44].mxu1 %vm7591_vm5, %v5486_v31 }
  0xf5   :  { %v4602_v18 = vpop.f32.mrb[0].mxu1 }
  0xf6   :  { %v4603_v23 = vpop.f32.mrb[1].mxu1 }
  0xf7   :  { %v6201_v24 = vadd.f32 %v4603_v23, %v4602_v18  ;;  %v4605_v27 = vpop.f32.mrb[2].mxu1 }
  0xf8   :  { %v4606_v30 = vpop.f32.mrb[3].mxu1 }
  0xf9   :  { %v6203_v31 = vadd.f32 %v4606_v30, %v4605_v27 }
  0xfd   :  { %v4608_v33 = vpop.f32.mrb[4].mxu1 }
  0xfe   :  { %v4609_v36 = vpop.f32.mrb[5].mxu1 }
  0xff   :  { %v6205_v38 = vadd.f32 %v4609_v36, %v4608_v33  ;;  %v4611_v41 = vpop.f32.mrb[6].mxu1  ;;  %v4971_v36 = vld [vmem:[%s7513_s1 + $0x70] sm:$0xff]  }
 0x100   :  { %v4612_v43 = vpop.f32.mrb[7].mxu1  ;;  %4758 = vmatprep.subr.bf16.mxu0 %v4971_v36  ;;  %4860 = vmatprep.subr.bf16.mxu1 %v4971_v36 }
 0x101   :  { %v6207_v45 = vadd.f32 %v4612_v43, %v4611_v41  ;;  %v4972_v43 = vld [vmem:[%s7513_s1 + $0x30] sm:$0xff]  }
 0x102   :  { %4759 = vmatpush3.bf16.msra.mxu0 %v4972_v43  ;;  %4868 = vmatpush3.bf16.msra.mxu1 %v4972_v43 }
 0x105   :  { %v4614_v48 = vpop.f32.mrb[8].mxu1 }
 0x106   :  { %v4615_v52 = vpop.f32.mrb[9].mxu1 }
 0x107   :  { %v6209_v56 = vadd.f32 %v4615_v52, %v4614_v48  ;;  %v4617_v26 = vpop.f32.mrb[10].mxu1 }
 0x108   :  { %v4618_v29 = vpop.f32.mrb[11].mxu1  ;;  %v4682_v32 = vpop.f32.mrb[0].mxu0 }
 0x109   :  { %v6211_v37 = vadd.f32 %v4618_v29, %v4617_v26  ;;  %v4683_v39 = vpop.f32.mrb[1].mxu0  ;;  %v4973_v26 = vld [vmem:[%s7513_s1 + $0x78] sm:$0xff]  }
 0x10a   :  { %v6213_v40 = vadd.f32 %v4683_v39, %v4682_v32  ;;  %v4685_v50 = vpop.f32.mrb[2].mxu0  ;;  %v4974_v32 = vld [vmem:[%s7513_s1 + $0x38] sm:$0xff]   ;;  %4760 = vmatprep.subr.bf16.mxu0 %v4973_v26  ;;  %4861 = vmatprep.subr.bf16.mxu1 %v4973_v26  ;;  %s5488_s1 = smov 64  }
 0x10b   :  { %v4686_v57 = vpop.f32.mrb[3].mxu0  ;;  %4761 = vmatpush3.bf16.msra.mxu0 %v4974_v32  ;;  %4869 = vmatpush3.bf16.msra.mxu1 %v4974_v32 }
 0x10c   :  { %v6215_v58 = vadd.f32 %v4686_v57, %v4685_v50  ;;  %4806 = vmatprep.subr.bf16.mxu1 %v5487_v34  ;;  %4830 = vmatprep.subr.bf16.mxu0 %v5487_v34 }
 0x10d   :  { %v4620_v53 = vpop.f32.mrb[12].mxu1 }
 0x10e   :  { %v4621_v59 = vpop.f32.mrb[13].mxu1 }
 0x10f   :  { %v6217_v60 = vadd.f32 %v4621_v59, %v4620_v53  ;;  %v4623_v61 = vpop.f32.mrb[14].mxu1 }
 0x110   :  { %v4624_v63 = vpop.f32.mrb[15].mxu1  ;;  %v4688_v29 = vpop.f32.mrb[4].mxu0 }
 0x111   :  { %v6219_v0 = vadd.f32 %v4624_v63, %v4623_v61  ;;  %v4689_v50 = vpop.f32.mrb[5].mxu0 }
 0x112   :  { %v4691_v53 = vpop.f32.mrb[6].mxu0  ;;  %v6254_v63 = vadd.f32 %v4689_v50, %v4688_v29 }
 0x115   :  { %v4642_v6 = vpop.f32.mrb[16].mxu1 }
 0x116   :  { %v4643_v13 = vpop.f32.mrb[17].mxu1 }
 0x117   :  { %v6221_v15 = vadd.f32 %v4643_v13, %v4642_v6  ;;  %v4645_v19 = vpop.f32.mrb[18].mxu1  ;;  %v4692_v6 = vpop.f32.mrb[7].mxu0 }
 0x118   :  { %v4646_v20 = vpop.f32.mrb[19].mxu1 }
 0x119   :  { %v6223_v17 = vadd.f32 %v4646_v20, %v4645_v19  ;;  %v6258_v19 = vadd.f32 %v4692_v6, %v4691_v53 }
 0x11b   :  { %v4908_v62 = vpack.i.bf16 %v6223_v17, %v6221_v15 }
 0x11d   :  { %v4648_v21 = vpop.f32.mrb[20].mxu1 }
 0x11e   :  { %v4649_v1 = vpop.f32.mrb[21].mxu1 }
 0x11f   :  { %v6227_v2 = vadd.f32 %v4649_v1, %v4648_v21  ;;  %v4651_v4 = vpop.f32.mrb[22].mxu1  ;;  %v4694_v21 = vpop.f32.mrb[8].mxu0 }
 0x120   :  { %v4652_v5 = vpop.f32.mrb[23].mxu1  ;;  %v4695_v1 = vpop.f32.mrb[9].mxu0 }
 0x121   :  { %v4653_v7 = vadd.f32 %v4652_v5, %v4651_v4  ;;  %v6260_v4 = vadd.f32 %v4695_v1, %v4694_v21 }
 0x123   :  { %v4913_v8 = vpack.i.bf16 %v4653_v7, %v6227_v2  ;;  %v4697_v7 = vpop.f32.mrb[10].mxu0 }
 0x125   :  { %v4654_v9 = vpop.f32.mrb[24].mxu1 }
 0x126   :  { %v4655_v10 = vpop.f32.mrb[25].mxu1 }
 0x127   :  { %v6230_v11 = vadd.f32 %v4655_v10, %v4654_v9  ;;  %v4657_v12 = vpop.f32.mrb[26].mxu1  ;;  %v4698_v10 = vpop.f32.mrb[11].mxu0 }
 0x128   :  { %v4658_v14 = vpop.f32.mrb[27].mxu1  ;;  %v4700_v36 = vpop.f32.mrb[12].mxu0 }
 0x129   :  { %v6232_v16 = vadd.f32 %v4658_v14, %v4657_v12  ;;  %v4701_v43 = vpop.f32.mrb[13].mxu0 }
 0x12a   :  { %v4703_v26 = vpop.f32.mrb[14].mxu0 }
 0x12b   :  { %v4928_v18 = vpack.i.bf16 %v6232_v16, %v6230_v11  ;;  %v4704_v50 = vpop.f32.mrb[15].mxu0 }
 0x12c   :  { %v6273_v53 = vadd.f32 %v4704_v50, %v4703_v26 }
 0x12d   :  { %v4660_v23 = vpop.f32.mrb[28].mxu1 }
 0x12e   :  { %v4661_v27 = vpop.f32.mrb[29].mxu1 }
 0x12f   :  { %v6236_v30 = vadd.f32 %v4661_v27, %v4660_v23  ;;  %v4663_v33 = vpop.f32.mrb[30].mxu1  ;;  %v6263_v23 = vadd.f32 %v4698_v10, %v4697_v7 }
 0x130   :  { %v4664_v41 = vpop.f32.mrb[31].mxu1 }
 0x131   :  { %v6244_v48 = vadd.f32 %v4664_v41, %v4663_v33 }
 0x133   :  { %v4938_v52 = vpack.i.bf16 %v6244_v48, %v6236_v30 }
 0x135   :  { %v4722_v39 = vpop.f32.mrb[32].mxu1 }
 0x136   :  { %v4723_v57 = vpop.f32.mrb[33].mxu1 }
 0x137   :  { %v4724_v59 = vadd.f32 %v4723_v57, %v4722_v39  ;;  %v4725_v61 = vpop.f32.mrb[34].mxu1  ;;  %v6271_v39 = vadd.f32 %v4701_v43, %v4700_v36 }
 0x138   :  { %v4726_v13 = vpop.f32.mrb[35].mxu1 }
 0x139   :  { %v4727_v20 = vadd.f32 %v4726_v13, %v4725_v61 }
 0x13b   :  { %v4903_v2 = vpack.i.bf16 %v4727_v20, %v4724_v59 }
 0x13d   :  { %v4728_v5 = vpop.f32.mrb[36].mxu1  ;;  %4904 = vrot.lane.b32.xlu0 %v4903_v2, %s5488_s1 }
 0x13e   :  { %v4729_v9 = vpop.f32.mrb[37].mxu1 }
 0x13f   :  { %v4730_v12 = vadd.f32 %v4729_v9, %v4728_v5  ;;  %v4731_v14 = vpop.f32.mrb[38].mxu1 }
 0x140   :  { %v4732_v27 = vpop.f32.mrb[39].mxu1 }
 0x141   :  { %v4733_v30 = vadd.f32 %v4732_v27, %v4731_v14  ;;  %4909 = vrot.lane.b32.xlu0 %v4908_v62, %s5488_s1 }
 0x143   :  { %v4918_v33 = vpack.i.bf16 %v4733_v30, %v4730_v12 }
 0x145   :  { %v4734_v41 = vpop.f32.mrb[40].mxu1  ;;  %4919 = vrot.lane.b32.xlu1 %v4918_v33, %s5488_s1  ;;  %4914 = vrot.lane.b32.xlu0 %v4913_v8, %s5488_s1 }
 0x146   :  { %v4735_v48 = vpop.f32.mrb[41].mxu1 }
 0x147   :  { %v4736_v29 = vadd.f32 %v4735_v48, %v4734_v41  ;;  %v4737_v32 = vpop.f32.mrb[42].mxu1 }
 0x148   :  { %v4738_v57 = vpop.f32.mrb[43].mxu1 }
 0x149   :  { %v4739_v15 = vadd.f32 %v4738_v57, %v4737_v32 }
 0x14b   :  { %v4923_v17 = vpack.i.bf16 %v4739_v15, %v4736_v29 }
 0x14d   :  { %v4740_v62 = vpop.f32.mrb[44].mxu1  ;;  %4924 = vrot.lane.b32.xlu1 %v4923_v17, %s5488_s1 }
 0x14e   :  { %v4741_v59 = vpop.f32.mrb[45].mxu1 }
 0x14f   :  { %v4742_v61 = vadd.f32 %v4741_v59, %v4740_v62  ;;  %v4743_v6 = vpop.f32.mrb[46].mxu1 }
 0x150   :  { %v4744_v8 = vpop.f32.mrb[47].mxu1 }
 0x151   :  { %v4745_v13 = vadd.f32 %v4744_v8, %v4743_v6  ;;  %4929 = vrot.lane.b32.xlu1 %v4928_v18, %s5488_s1 }
 0x153   :  { %v4933_v20 = vpack.i.bf16 %v4745_v13, %v4742_v61 }
 0x155   :  { %4939 = vrot.lane.b32.xlu1 %v4938_v52, %s5488_s1  ;;  %4934 = vrot.lane.b32.xlu0 %v4933_v20, %s5488_s1 }
 0x1af   :  { %v4905_v21 = vpop.permute.xlu0 %4904 }
 0x1b0   :  { %v4907_v1 = vunpack.i.h.bf16 %v4905_v21  ;;  %v4906_v2 = vunpack.i.l.bf16 %v4905_v21 }
 0x1b2   :  { %v1078_v5 = vsel %vm1069_vm14, %v6213_v40, %v4906_v2  ;;  %v1079_v7 = vsel %vm1069_vm14, %v6215_v58, %v4907_v1 }
 0x1b3   :  { %v4910_v9 = vpop.permute.xlu0 %4909  ;;  %v1087_v10 = vpack.c.bf16 %v1079_v7, %v1078_v5 }
 0x1b4   :  { %v4912_v12 = vunpack.i.h.bf16 %v4910_v9  ;;  %v4911_v11 = vunpack.i.l.bf16 %v4910_v9 }
 0x1b5   :  { %1222 = vmatprep.mubr.bf16.mxu0 %v1087_v10 }
 0x1b6   :  { %v1070_v16 = vsel %vm1069_vm14, %v6201_v24, %v4911_v11  ;;  %v1071_v18 = vsel %vm1069_vm14, %v6203_v31, %v4912_v12 }
 0x1b7   :  { %v1086_v52 = vpack.c.bf16 %v1071_v18, %v1070_v16  ;;  %v4920_v14 = vpop.permute.xlu1 %4919  ;;  %v4915_v27 = vpop.permute.xlu0 %4914 }
 0x1b8   :  { %v4922_v30 = vunpack.i.h.bf16 %v4920_v14  ;;  %v4921_v33 = vunpack.i.l.bf16 %v4920_v14  ;;  %v4917_v40 = vunpack.i.h.bf16 %v4915_v27  ;;  %v4916_v36 = vunpack.i.l.bf16 %v4915_v27 }
 0x1b9   :  { %1223 = vmatmul.mubr.bf16.vlgmr.msra.gmra.mrb[16].mxu0 %v1086_v52 }
 0x1ba   :  { %v1080_v58 = vsel %vm1069_vm14, %v6254_v63, %v4921_v33  ;;  %v1081_v41 = vsel %vm1069_vm14, %v6258_v19, %v4922_v30  ;;  %v1072_v24 = vsel %vm1069_vm14, %v6205_v38, %v4916_v36  ;;  %v1073_v31 = vsel %vm1069_vm14, %v6207_v45, %v4917_v40 }
 0x1bb   :  { %v1089_v43 = vpack.c.bf16 %v1081_v41, %v1080_v58  ;;  %v1088_v48 = vpack.c.bf16 %v1073_v31, %v1072_v24 }
 0x1bd   :  { %1230 = vmatprep.mubr.bf16.mxu0 %v1089_v43 }
 0x1bf   :  { %v4925_v26 = vpop.permute.xlu1 %4924 }
 0x1c0   :  { %v4927_v29 = vunpack.i.h.bf16 %v4925_v26  ;;  %v4926_v32 = vunpack.i.l.bf16 %v4925_v26 }
 0x1c1   :  { %1231 = vmatmul.mubr.bf16.gmra.mrb[20].mxu0 %v1088_v48 }
 0x1c2   :  { %v1082_v50 = vsel %vm1069_vm14, %v6260_v4, %v4926_v32  ;;  %v1083_v63 = vsel %vm1069_vm14, %v6263_v23, %v4927_v29  ;;  %4838 = vmatprep.mubr.msk.bf16.mxu0 %vm5489_vm6, %v5487_v34 }
 0x1c3   :  { %v4930_v19 = vpop.permute.xlu1 %4929  ;;  %v1091_v57 = vpack.c.bf16 %v1083_v63, %v1082_v50 }
 0x1c4   :  { %v4932_v15 = vunpack.i.h.bf16 %v4930_v19  ;;  %v4931_v38 = vunpack.i.l.bf16 %v4930_v19 }
 0x1c5   :  { %1238 = vmatprep.mubr.bf16.mxu1 %v1091_v57 }
 0x1c6   :  { %v1074_v45 = vsel %vm1069_vm14, %v6209_v56, %v4931_v38  ;;  %v1075_v17 = vsel %vm1069_vm14, %v6211_v37, %v4932_v15 }
 0x1c7   :  { %v1090_v62 = vpack.c.bf16 %v1075_v17, %v1074_v45  ;;  %v4940_v59 = vpop.permute.xlu1 %4939  ;;  %v4935_v61 = vpop.permute.xlu0 %4934 }
 0x1c8   :  { %v4942_v6 = vunpack.i.h.bf16 %v4940_v59  ;;  %v4941_v8 = vunpack.i.l.bf16 %v4940_v59  ;;  %v4937_v4 = vunpack.i.h.bf16 %v4935_v61  ;;  %v4936_v13 = vunpack.i.l.bf16 %v4935_v61 }
 0x1c9   :  { %1239 = vmatmul.mubr.bf16.vlgmr.msra.gmra.mrb[48].mxu1 %v1090_v62 }
 0x1ca   :  { %v1084_v23 = vsel %vm1069_vm14, %v6271_v39, %v4936_v13  ;;  %v1085_v20 = vsel %vm1069_vm14, %v6273_v53, %v4937_v4  ;;  %v1076_v56 = vsel %vm1069_vm14, %v6217_v60, %v4941_v8  ;;  %v1077_v37 = vsel %vm1069_vm14, %v6219_v0, %v4942_v6 }
 0x1cb   :  { %v1093_v21 = vpack.c.bf16 %v1085_v20, %v1084_v23  ;;  %v1092_v1 = vpack.c.bf16 %v1077_v37, %v1076_v56 }
 0x1cd   :  { %1246 = vmatprep.mubr.bf16.mxu1 %v1093_v21 }
 0x1d1   :  { %1247 = vmatmul.mubr.bf16.gmra.mrb[52].mxu1 %v1092_v1 }
 0x1d2   :  { %4814 = vmatprep.mubr.msk.bf16.mxu1 %vm5489_vm6, %v5487_v34 }
 0x28c   :  { %v4762_v39 = vpop.f32.mrb[16].mxu0 }
 0x28d   :  { %v4763_v2 = vpop.f32.mrb[17].mxu0 }
 0x28e   :  { %v4764_v53 = vadd.f32 %v4763_v2, %v4762_v39  ;;  %v4765_v5 = vpop.f32.mrb[18].mxu0 }
 0x28f   :  { %v4766_v7 = vpop.f32.mrb[19].mxu0 }
 0x290   :  { %v4767_v60 = vadd.f32 %v4766_v7, %v4765_v5 }
 0x292   :  { %v1255_v9 = vadd.f32 %v4767_v60, %v4764_v53 }
 0x294   :  { %v4768_v10 = vpop.f32.mrb[20].mxu0 }
 0x295   :  { %v4769_v0 = vpop.f32.mrb[21].mxu0 }
 0x296   :  { %v4770_v12 = vadd.f32 %v4769_v0, %v4768_v10  ;;  %v4771_v11 = vpop.f32.mrb[22].mxu0 }
 0x297   :  { %v4772_v16 = vpop.f32.mrb[23].mxu0 }
 0x298   :  { %v1256_v18 = vadd.f32 %v4770_v12, %v1255_v9  ;;  %v4773_v52 = vadd.f32 %v4772_v16, %v4771_v11 }
 0x29a   :  { %v1257_v14 = vadd.f32 %v4773_v52, %v1256_v18 }
 0x29c   :  { %v1258_v27 = vrot.slane %v1257_v14, 4  ;;  %v4774_v30 = vpop.f32.mrb[48].mxu1 }
 0x29d   :  { %v4775_v33 = vpop.f32.mrb[49].mxu1 }
 0x29e   :  { %v1259_v40 = vadd.f32 %v1258_v27, %v1257_v14  ;;  %v4776_v36 = vadd.f32 %v4775_v33, %v4774_v30  ;;  %v4777_v58 = vpop.f32.mrb[50].mxu1 }
 0x29f   :  { %v4778_v41 = vpop.f32.mrb[51].mxu1 }
 0x2a0   :  { %v1260_v24 = vrot.slane %v1259_v40, 2  ;;  %v4779_v31 = vadd.f32 %v4778_v41, %v4777_v58 }
 0x2a2   :  { %v1261_v43 = vadd.f32 %v1260_v24, %v1259_v40  ;;  %v1306_v48 = vadd.f32 %v4779_v31, %v4776_v36 }
 0x2a4   :  { %v1262_v26 = vrot.slane %v1261_v43, 1  ;;  %v4780_v29 = vpop.f32.mrb[52].mxu1 }
 0x2a5   :  { %v4781_v32 = vpop.f32.mrb[53].mxu1 }
 0x2a6   :  { %v1263_v50 = vadd.f32 %v1262_v26, %v1261_v43  ;;  %v4782_v63 = vadd.f32 %v4781_v32, %v4780_v29  ;;  %v4783_v19 = vpop.f32.mrb[54].mxu1  ;;  %v1292_v26 = vsub.s32 0, %v5536_v3  ;;  %v409_v32 = vld [vmem:[%s7515_s5] sm:$0x3f] }
 0x2a7   :  { %v4784_v57 = vpop.f32.mrb[55].mxu1 }
 0x2a8   :  { %v1265_v15 = vmul.f32 0.03125, %v1263_v50  ;;  %v1307_v38 = vadd.f32 %v4782_v63, %v1306_v48  ;;  %v4785_v45 = vadd.f32 %v4784_v57, %v4783_v19  ;;  %v1300_v50 = vsub.s32 1, %v5536_v3 }
 0x2a9   :  { %v1293_v19 = vrot.slane %v409_v32, %v1292_v26 }
 0x2aa   :  { %v1266_v17 = vsub.f32 %v4764_v53, %v1265_v15  ;;  %v1267_v62 = vsub.f32 %v4767_v60, %v1265_v15  ;;  %v1268_v59 = vsub.f32 %v4770_v12, %v1265_v15  ;;  %v1269_v61 = vsub.f32 %v4773_v52, %v1265_v15 }
 0x2ab   :  { %v1308_v6 = vadd.f32 %v4785_v45, %v1307_v38  ;;  %v1301_v38 = vrot.slane %v409_v32, %v1300_v50 }
 0x2ac   :  { %v1270_v8 = vmul.f32 %v1266_v17, %v1266_v17  ;;  %v1271_v4 = vmul.f32 %v1267_v62, %v1267_v62  ;;  %v1272_v23 = vmul.f32 %v1268_v59, %v1268_v59  ;;  %v1273_v37 = vmul.f32 %v1269_v61, %v1269_v61 }
 0x2ad   :  { %v1309_v13 = vrot.slane %v1308_v6, 4 }
 0x2ae   :  { %v1274_v20 = vadd.f32 %v1271_v4, %v1270_v8 }
 0x2af   :  { %v1310_v56 = vadd.f32 %v1309_v13, %v1308_v6 }
 0x2b0   :  { %v1275_v21 = vadd.f32 %v1274_v20, %v1272_v23 }
 0x2b1   :  { %v1311_v1 = vrot.slane %v1310_v56, 2 }
 0x2b2   :  { %v1276_v39 = vadd.f32 %v1275_v21, %v1273_v37 }
 0x2b3   :  { %v1312_v2 = vadd.f32 %v1311_v1, %v1310_v56 }
 0x2b4   :  { %v1277_v5 = vrot.slane %v1276_v39, 4 }
 0x2b5   :  { %v1313_v7 = vrot.slane %v1312_v2, 1 }
 0x2b6   :  { %v1278_v9 = vadd.f32 %v1277_v5, %v1276_v39 }
 0x2b7   :  { %v1314_v10 = vadd.f32 %v1313_v7, %v1312_v2 }
 0x2b8   :  { %v1279_v53 = vrot.slane %v1278_v9, 2 }
 0x2b9   :  { %v1315_v60 = vmul.f32 0.03125, %v1314_v10 }
 0x2ba   :  { %v1280_v0 = vadd.f32 %v1279_v53, %v1278_v9 }
 0x2bb   :  { %v6318_v12 = vsub.f32 %v4776_v36, %v1315_v60  ;;  %v6320_v11 = vsub.f32 %v4779_v31, %v1315_v60  ;;  %v1318_v16 = vsub.f32 %v4782_v63, %v1315_v60  ;;  %v1319_v18 = vsub.f32 %v4785_v45, %v1315_v60 }
 0x2bc   :  { %v1281_v52 = vrot.slane %v1280_v0, 1 }
 0x2bd   :  { %v1320_v14 = vmul.f32 %v6318_v12, %v6318_v12  ;;  %v1321_v27 = vmul.f32 %v6320_v11, %v6320_v11  ;;  %v1322_v33 = vmul.f32 %v1318_v16, %v1318_v16  ;;  %v1323_v41 = vmul.f32 %v1319_v18, %v1319_v18 }
 0x2be   :  { %v1282_v30 = vadd.f32 %v1281_v52, %v1280_v0 }
 0x2bf   :  { %v1324_v40 = vadd.f32 %v1321_v27, %v1320_v14 }
 0x2c0   :  { %v1283_v58 = vmul.f32 0.03125, %v1282_v30 }
 0x2c1   :  { %v1325_v24 = vadd.f32 %v1324_v40, %v1322_v33 }
 0x2c2   :  { %v1284_v43 = vadd.f32 1e-05, %v1283_v58 }
 0x2c3   :  { %v1326_v36 = vadd.f32 %v1325_v24, %v1323_v41 }
 0x2c4   :  { %5455 = vrsqrt.f32 %v1284_v43 }
 0x2c5   :  { %v1327_v31 = vrot.slane %v1326_v36, 4 }
 0x2c7   :  { %v1328_v48 = vadd.f32 %v1327_v31, %v1326_v36 }
 0x2c9   :  { %v1329_v29 = vrot.slane %v1328_v48, 2 }
 0x2cb   :  { %v1330_v63 = vadd.f32 %v1329_v29, %v1328_v48 }
 0x2cd   :  { %v1331_v57 = vrot.slane %v1330_v63, 1 }
 0x2ce   :  { %v5456_v15 = vpop.eup %5455 }
 0x2cf   :  { %v1288_v45 = vmul.f32 %v5456_v15, %v1268_v59  ;;  %v1289_v6 = vmul.f32 %v5456_v15, %v1269_v61  ;;  %v1332_v8 = vadd.f32 %v1331_v57, %v1330_v63  ;;  %v1286_v4 = vmul.f32 %v5456_v15, %v1266_v17 }
 0x2d0   :  { %v1287_v13 = vmul.f32 %v5456_v15, %v1267_v62 }
 0x2d1   :  { %v1297_v23 = vmul.f32 %v1293_v19, %v1289_v6  ;;  %v1333_v20 = vmul.f32 0.03125, %v1332_v8  ;;  %v1294_v56 = vmul.f32 %v1293_v19, %v1286_v4  ;;  %v1296_v37 = vmul.f32 %v1293_v19, %v1288_v45  ;;  %v4978_v4 = vld [vmem:[%s7514_s2 + $0x10] ss:$8 sps:$4 sm:$0xff]  }
 0x2d2   :  { %v1295_v21 = vmul.f32 %v1293_v19, %v1287_v13  ;;  %v4987_v13 = vld [vmem:[%s7514_s2 + $0x40] ss:$8 sps:$4 sm:$0xff]  }
 0x2d3   :  { %v1305_v1 = vadd.f32 %v1301_v38, %v1297_v23  ;;  %v1334_v39 = vadd.f32 1e-05, %v1333_v20  ;;  %v1302_v2 = vadd.f32 %v1301_v38, %v1294_v56  ;;  %v1304_v5 = vadd.f32 %v1301_v38, %v1296_v37  ;;  %v4992_v23 = vld [vmem:[%s7514_s2 + $0x54] ss:$8 sps:$4 sm:$0xff]   ;;  %v4990_v20 = vld [vmem:[%s7514_s2 + $0x50] ss:$8 sps:$4 sm:$0xff]  }
 0x2d4   :  { %v1303_v7 = vadd.f32 %v1301_v38, %v1295_v21  ;;  %v4995_v56 = vld [vmem:[%s7514_s2 + $0x64] ss:$8 sps:$4 sm:$0xff]   ;;  %v4996_v37 = vld [vmem:[%s7514_s2 + $0x70] ss:$8 sps:$4 sm:$0xff]  }
 0x2d5   :  { %v1351_v9 = vmul.f32 0.2, %v1305_v1  ;;  %5457 = vrsqrt.f32 %v1334_v39  ;;  %v1348_v10 = vmul.f32 0.2, %v1302_v2  ;;  %v1350_v53 = vmul.f32 0.2, %v1304_v5 }
 0x2d6   :  { %v1349_v60 = vmul.f32 0.2, %v1303_v7  ;;  %v5001_v21 = vld [vmem:[%s7514_s2 + $0x84] ss:$8 sps:$4 sm:$0xff]   ;;  %v5002_v39 = vld [vmem:[%s7514_s2 + $0x90] ss:$8 sps:$4 sm:$0xff]  }
 0x2d7   :  { %v1356_v59 = vmax.f32 %v1302_v2, %v1348_v10  ;;  %v1358_v61 = vmax.f32 %v1304_v5, %v1350_v53  ;;  %v1359_v0 = vmax.f32 %v1305_v1, %v1351_v9  ;;  %v4999_v1 = vld [vmem:[%s7514_s2 + $0x80] ss:$8 sps:$4 sm:$0xff]   ;;  %v5007_v2 = vld [vmem:[%s7514_s2 + $0xa4] ss:$8 sps:$4 sm:$0xff]   ;;  %v5016_v10 = vld [vmem:[%s7514_s2 + $0xd4] ss:$8 sps:$4 sm:$0xff]  }
 0x2d8   :  { %v1357_v17 = vmax.f32 %v1303_v7, %v1349_v60  ;;  %v5005_v5 = vld [vmem:[%s7514_s2 + $0xa0] ss:$8 sps:$4 sm:$0xff]   ;;  %v5013_v9 = vld [vmem:[%s7514_s2 + $0xc4] ss:$8 sps:$4 sm:$0xff]   ;;  %v5014_v53 = vld [vmem:[%s7514_s2 + $0xd0] ss:$8 sps:$4 sm:$0xff]  }
 0x2d9   :  { %v6335_v62 = vpack.c.bf16 %v1359_v0, %v1358_v61  ;;  %v5011_v7 = vld [vmem:[%s7514_s2 + $0xc0] ss:$8 sps:$4 sm:$0xff]   ;;  %v5019_v60 = vld [vmem:[%s7514_s2 + $0xe4] ss:$8 sps:$4 sm:$0xff]   ;;  %v5022_v61 = vld [vmem:[%s7514_s2 + $0xf4] ss:$8 sps:$4 sm:$0xff]  }
 0x2da   :  { %v6337_v52 = vpack.c.bf16 %v1357_v17, %v1356_v59  ;;  %v5017_v59 = vld [vmem:[%s7514_s2 + $0xe0] ss:$8 sps:$4 sm:$0xff]   ;;  %v5020_v0 = vld [vmem:[%s7514_s2 + $0xf0] ss:$8 sps:$4 sm:$0xff]   ;;  %v5025_v17 = vld [vmem:[%s7514_s2 + $0x104] ss:$8 sps:$4 sm:$0xff]  }
 0x2dc   :  { %4807 = vmatpush3.bf16.msra.mxu1 %v6337_v52  ;;  %4831 = vmatpush3.bf16.msra.mxu0 %v6337_v52 }
 0x2dd   :  { %4808 = vmatprep.subr.bf16.mxu1 %v5487_v34  ;;  %4832 = vmatprep.subr.bf16.mxu0 %v5487_v34 }
 0x2df   :  { %v5458_v14 = vpop.eup %5457 }
 0x2e0   :  { %v1338_v27 = vmul.f32 %v5458_v14, %v1318_v16  ;;  %v1339_v30 = vmul.f32 %v5458_v14, %v1319_v18  ;;  %4809 = vmatpush3.bf16.msra.mxu1 %v6335_v62  ;;  %4833 = vmatpush3.bf16.msra.mxu0 %v6335_v62  ;;  %v1336_v33 = vmul.f32 %v5458_v14, %v6318_v12 }
 0x2e1   :  { %4810 = vmatprep.subr.bf16.mxu1 %v5487_v34  ;;  %4834 = vmatprep.subr.bf16.mxu0 %v5487_v34  ;;  %v1337_v40 = vmul.f32 %v5458_v14, %v6320_v11  ;;  %v4977_v11 = vld [vmem:[%s7514_s2 + $0x4] ss:$8 sps:$4 sm:$0xff]  }
 0x2e2   :  { %v1343_v58 = vmul.f32 %v1339_v30, %v1293_v19  ;;  %v1340_v41 = vmul.f32 %v1336_v33, %v1293_v19  ;;  %v1342_v24 = vmul.f32 %v1338_v27, %v1293_v19 }
 0x2e3   :  { %v1341_v43 = vmul.f32 %v1337_v40, %v1293_v19  ;;  %v4975_v19 = vld [vmem:[%s7514_s2] ss:$8 sps:$4 sm:$0xff]  }
 0x2e4   :  { %v1347_v36 = vadd.f32 %v1343_v58, %v1301_v38  ;;  %v1344_v31 = vadd.f32 %v1340_v41, %v1301_v38  ;;  %v1346_v16 = vadd.f32 %v1342_v24, %v1301_v38 }
 0x2e5   :  { %v1345_v18 = vadd.f32 %v1341_v43, %v1301_v38  ;;  %v4980_v38 = vld [vmem:[%s7514_s2 + $0x14] ss:$8 sps:$4 sm:$0xff]  }
 0x2e6   :  { %v1355_v48 = vmul.f32 0.2, %v1347_v36  ;;  %v1352_v29 = vmul.f32 0.2, %v1344_v31  ;;  %v1354_v32 = vmul.f32 0.2, %v1346_v16 }
 0x2e7   :  { %v1353_v63 = vmul.f32 0.2, %v1345_v18 }
 0x2e8   :  { %v1360_v57 = vmax.f32 %v1344_v31, %v1352_v29  ;;  %v1362_v12 = vmax.f32 %v1346_v16, %v1354_v32  ;;  %v1363_v15 = vmax.f32 %v1347_v36, %v1355_v48  ;;  %v5023_v48 = vld [vmem:[%s7514_s2 + $0x100] ss:$8 sps:$4 sm:$0xff]   ;;  %v5028_v29 = vld [vmem:[%s7514_s2 + $0x114] ss:$8 sps:$4 sm:$0xff]   ;;  %v5026_v32 = vld [vmem:[%s7514_s2 + $0x110] ss:$8 sps:$4 sm:$0xff]  }
 0x2e9   :  { %v1361_v45 = vmax.f32 %v1345_v18, %v1353_v63  ;;  %v5031_v63 = vld [vmem:[%s7514_s2 + $0x124] ss:$8 sps:$4 sm:$0xff]  }
 0x2ea   :  { %v1367_v6 = vpack.c.bf16 %v1363_v15, %v1362_v12  ;;  %v5034_v12 = vld [vmem:[%s7514_s2 + $0x134] ss:$8 sps:$4 sm:$0xff]   ;;  %v5032_v15 = vld [vmem:[%s7514_s2 + $0x130] ss:$8 sps:$4 sm:$0xff]  }
 0x2eb   :  { %v1366_v8 = vpack.c.bf16 %v1361_v45, %v1360_v57  ;;  %v5029_v57 = vld [vmem:[%s7514_s2 + $0x120] ss:$8 sps:$4 sm:$0xff]   ;;  %v5037_v45 = vld [vmem:[%s7514_s2 + $0x144] ss:$8 sps:$4 sm:$0xff]  }
 0x2ed   :  { %4811 = vmatpush3.bf16.msra.mxu1 %v1366_v8  ;;  %4835 = vmatpush3.bf16.msra.mxu0 %v1366_v8 }
 0x2ee   :  { %4812 = vmatprep.subr.bf16.mxu1 %v5487_v34  ;;  %4836 = vmatprep.subr.bf16.mxu0 %v5487_v34 }
 0x2f1   :  { %4813 = vmatpush3.bf16.msra.mxu1 %v1367_v6  ;;  %4837 = vmatpush3.bf16.msra.mxu0 %v1367_v6 }
 0x2f2   :  { %4818 = vmatprep.subr.bf16.mxu1 %v5487_v34  ;;  %1877 = vmatprep.subr.bf16.mxu0 %v4977_v11 }
 0x2f4   :  { %4815 = vmatmul.mubr.msk.bf16.vlgmr.msra.gmra.mrb[56].mxu1 %vm1069_vm14, %v1376_v44  ;;  %4839 = vmatmul.mubr.msk.bf16.vlgmr.msra.gmra.mrb[24].mxu0 %vm1069_vm14, %v819_v51  ;;  %v4986_v44 = vld [vmem:[%s7514_s2 + $0x34] ss:$8 sps:$4 sm:$0xff]   ;;  %v4989_v51 = vld [vmem:[%s7514_s2 + $0x44] ss:$8 sps:$4 sm:$0xff]  }
 0x2f5   :  { %4819 = vmatpush3.bf16.msra.mxu1 %v6337_v52  ;;  %4826 = vmatprep.mubr.msk.bf16.mxu1 %vm5489_vm6, %v5487_v34 }
 0x2f6   :  { %4820 = vmatprep.subr.bf16.mxu1 %v5487_v34  ;;  %1878 = vmatpush1.bf16.msra.mxu0 %v4975_v19  ;;  %v5035_v19 = vld [vmem:[%s7514_s2 + $0x140] ss:$8 sps:$4 sm:$0xff]  }
 0x2f7   :  { %1879 = vmatprep.subr.bf16.mxu0 %v4980_v38 }
 0x2f9   :  { %4821 = vmatpush3.bf16.msra.mxu1 %v6335_v62 }
 0x2fa   :  { %4822 = vmatprep.subr.bf16.mxu1 %v5487_v34  ;;  %1880 = vmatpush1.bf16.msra.mxu0 %v4978_v4 }
 0x2fb   :  { %1881 = vmatprep.subr.bf16.mxu0 %v4983_v35  ;;  %v5040_v35 = vld [vmem:[%s7514_s2 + $0x154] ss:$8 sps:$4 sm:$0xff]  }
 0x2fd   :  { %4823 = vmatpush3.bf16.msra.mxu1 %v1366_v8 }
 0x2fe   :  { %4824 = vmatprep.subr.bf16.mxu1 %v5487_v34  ;;  %1882 = vmatpush1.bf16.msra.mxu0 %v4981_v42  ;;  %v5038_v42 = vld [vmem:[%s7514_s2 + $0x150] ss:$8 sps:$4 sm:$0xff]  }
 0x2ff   :  { %1883 = vmatprep.subr.bf16.mxu0 %v4986_v44  ;;  %v5043_v44 = vld [vmem:[%s7514_s2 + $0x164] ss:$8 sps:$4 sm:$0xff]  }
 0x301   :  { %4825 = vmatpush3.bf16.msra.mxu1 %v1367_v6 }
 0x302   :  { %4842 = vmatprep.subr.bf16.mxu1 %v5487_v34  ;;  %1884 = vmatpush1.bf16.msra.mxu0 %v4984_v49  ;;  %v5041_v49 = vld [vmem:[%s7514_s2 + $0x160] ss:$8 sps:$4 sm:$0xff]  }
 0x303   :  { %1885 = vmatprep.subr.bf16.mxu0 %v4989_v51  ;;  %v5046_v51 = vld [vmem:[%s7514_s2 + $0x174] ss:$8 sps:$4 sm:$0xff]  }
 0x304   :  { %4827 = vmatmul.mubr.msk.bf16.vlgmr.msra.gmra.mrb[60].mxu1 %vm1069_vm14, %v706_v55  ;;  %v4998_v55 = vld [vmem:[%s7514_s2 + $0x74] ss:$8 sps:$4 sm:$0xff]  }
 0x305   :  { %4843 = vmatpush3.bf16.msra.mxu1 %v6337_v52  ;;  %4850 = vmatprep.mubr.msk.bf16.mxu1 %vm5489_vm6, %v5487_v34 }
 0x306   :  { %4844 = vmatprep.subr.bf16.mxu1 %v5487_v34  ;;  %1886 = vmatpush1.bf16.msra.mxu0 %v4987_v13  ;;  %v5044_v13 = vld [vmem:[%s7514_s2 + $0x170] ss:$8 sps:$4 sm:$0xff]  }
 0x307   :  { %1887 = vmatprep.subr.bf16.mxu0 %v4992_v23  ;;  %v5049_v23 = vld [vmem:[%s7514_s2 + $0x184] ss:$8 sps:$4 sm:$0xff]  }
 0x309   :  { %4845 = vmatpush3.bf16.msra.mxu1 %v6335_v62 }
 0x30a   :  { %4846 = vmatprep.subr.bf16.mxu1 %v5487_v34  ;;  %1888 = vmatpush1.bf16.msra.mxu0 %v4990_v20  ;;  %v5047_v20 = vld [vmem:[%s7514_s2 + $0x180] ss:$8 sps:$4 sm:$0xff]  }
 0x30b   :  { %1889 = vmatprep.subr.bf16.mxu0 %v4995_v56  ;;  %v5052_v56 = vld [vmem:[%s7514_s2 + $0x194] ss:$8 sps:$4 sm:$0xff]  }
 0x30d   :  { %4847 = vmatpush3.bf16.msra.mxu1 %v1366_v8 }
 0x30e   :  { %4848 = vmatprep.subr.bf16.mxu1 %v5487_v34  ;;  %1890 = vmatpush1.bf16.msra.mxu0 %v4993_v54  ;;  %v5004_v34 = vld [vmem:[%s7514_s2 + $0x94] ss:$8 sps:$4 sm:$0xff]   ;;  %v5050_v54 = vld [vmem:[%s7514_s2 + $0x190] ss:$8 sps:$4 sm:$0xff]  }
 0x30f   :  { %1891 = vmatprep.subr.bf16.mxu0 %v4998_v55  ;;  %v5055_v55 = vld [vmem:[%s7514_s2 + $0x1a4] ss:$8 sps:$4 sm:$0xff]  }
 0x311   :  { %4849 = vmatpush3.bf16.msra.mxu1 %v1367_v6 }
 0x312   :  { %1892 = vmatpush1.bf16.msra.mxu0 %v4996_v37  ;;  %v5053_v37 = vld [vmem:[%s7514_s2 + $0x1a0] ss:$8 sps:$4 sm:$0xff]  }
 0x313   :  { %1893 = vmatprep.subr.bf16.mxu0 %v5001_v21  ;;  %v5058_v21 = vld [vmem:[%s7514_s2 + $0x1b4] ss:$8 sps:$4 sm:$0xff]  }
 0x314   :  { %4851 = vmatmul.mubr.msk.bf16.vlgmr.msra.gmra.mrb[64].mxu1 %vm1069_vm14, %v932_v28  ;;  %v5008_v28 = vld [vmem:[%s7514_s2 + $0xb0] ss:$8 sps:$4 sm:$0xff]  }
 0x316   :  { %1894 = vmatpush1.bf16.msra.mxu0 %v4999_v1  ;;  %v5056_v1 = vld [vmem:[%s7514_s2 + $0x1b0] ss:$8 sps:$4 sm:$0xff]  }
 0x317   :  { %1895 = vmatprep.subr.bf16.mxu0 %v5004_v34  ;;  %v5061_v34 = vld [vmem:[%s7514_s2 + $0x1c4] ss:$8 sps:$4 sm:$0xff]  }
 0x31a   :  { %1896 = vmatpush1.bf16.msra.mxu0 %v5002_v39  ;;  %v5059_v39 = vld [vmem:[%s7514_s2 + $0x1c0] ss:$8 sps:$4 sm:$0xff]  }
 0x31b   :  { %1897 = vmatprep.subr.bf16.mxu0 %v5007_v2  ;;  %v5064_v2 = vld [vmem:[%s7514_s2 + $0x1d4] ss:$8 sps:$4 sm:$0xff]  }
 0x31e   :  { %1898 = vmatpush1.bf16.msra.mxu0 %v5005_v5  ;;  %v5062_v5 = vld [vmem:[%s7514_s2 + $0x1d0] ss:$8 sps:$4 sm:$0xff]  }
 0x31f   :  { %1899 = vmatprep.subr.bf16.mxu0 %v5010_v25  ;;  %v5067_v25 = vld [vmem:[%s7514_s2 + $0x1e4] ss:$8 sps:$4 sm:$0xff]  }
 0x322   :  { %1900 = vmatpush1.bf16.msra.mxu0 %v5008_v28  ;;  %v5065_v28 = vld [vmem:[%s7514_s2 + $0x1e0] ss:$8 sps:$4 sm:$0xff]  }
 0x323   :  { %1901 = vmatprep.subr.bf16.mxu0 %v5013_v9  ;;  %v5068_v9 = vld [vmem:[%s7514_s2 + $0x1f0] ss:$8 sps:$4 sm:$0xff]  }
 0x326   :  { %1902 = vmatpush1.bf16.msra.mxu0 %v5011_v7  ;;  %v5070_v7 = vld [vmem:[%s7514_s2 + $0x1f4] ss:$8 sps:$4 sm:$0xff]  }
 0x327   :  { %1903 = vmatprep.subr.bf16.mxu0 %v5016_v10  ;;  %v5490_v10 = vmov 0  }
 0x328   :  { %2110 = vmatprep.mubr.bf16.mxu1 %v5490_v10 }
 0x32a   :  { %1904 = vmatpush1.bf16.msra.mxu0 %v5014_v53  ;;  %v5074_v53 = vld [vmem:[%s7516_s3 + $0x8] ss:$16 sps:$4 sm:$0xff]  }
 0x32b   :  { %1905 = vmatprep.subr.bf16.mxu0 %v5019_v60  ;;  %v5076_v60 = vld [vmem:[%s7516_s3 + $0xc] ss:$16 sps:$4 sm:$0xff]  }
 0x32e   :  { %1906 = vmatpush1.bf16.msra.mxu0 %v5017_v59  ;;  %v5080_v59 = vld [vmem:[%s7516_s3 + $0x28] ss:$16 sps:$4 sm:$0xff]  }
 0x32f   :  { %1907 = vmatprep.subr.bf16.mxu0 %v5022_v61  ;;  %v5082_v61 = vld [vmem:[%s7516_s3 + $0x2c] ss:$16 sps:$4 sm:$0xff]  }
 0x332   :  { %1908 = vmatpush1.bf16.msra.mxu0 %v5020_v0  ;;  %v5086_v0 = vld [vmem:[%s7516_s3 + $0x48] ss:$16 sps:$4 sm:$0xff]  }
 0x333   :  { %1920 = vmatprep.subr.bf16.mxu0 %v5025_v17  ;;  %v5088_v17 = vld [vmem:[%s7516_s3 + $0x4c] ss:$16 sps:$4 sm:$0xff]  }
 0x3c7   :  { %v1414_v62 = vpop.f32.mrb[56].mxu1  ;;  %v6482_v52 = vpop.f32.mrb[24].mxu0 }
 0x3c8   :  { %v4816_v14 = vpop.f32.mrb[57].mxu1  ;;  %v4840_v27 = vpop.f32.mrb[25].mxu0 }
 0x3c9   :  { %v1417_v30 = vpop.f32.mrb[58].mxu1  ;;  %v6484_v33 = vpop.f32.mrb[26].mxu0  ;;  %v5098_v14 = vld [vmem:[%s7516_s3 + $0x88] ss:$16 sps:$4 sm:$0xff]   ;;  %v5100_v27 = vld [vmem:[%s7516_s3 + $0x8c] ss:$16 sps:$4 sm:$0xff]  }
 0x3ca   :  { %v1553_v40 = vpack.c.bf16 %v1417_v30, %v1414_v62  ;;  %v4817_v58 = vpop.f32.mrb[59].mxu1  ;;  %v1555_v41 = vpack.c.bf16 %v6484_v33, %v6482_v52  ;;  %v4841_v24 = vpop.f32.mrb[27].mxu0  ;;  %v5092_v62 = vld [vmem:[%s7516_s3 + $0x68] ss:$16 sps:$4 sm:$0xff]   ;;  %v5094_v52 = vld [vmem:[%s7516_s3 + $0x6c] ss:$16 sps:$4 sm:$0xff]  }
 0x3cb   :  { %v5104_v30 = vld [vmem:[%s7516_s3 + $0xa8] ss:$16 sps:$4 sm:$0xff]   ;;  %v5106_v33 = vld [vmem:[%s7516_s3 + $0xac] ss:$16 sps:$4 sm:$0xff]  }
 0x3cc   :  { %v5112_v58 = vld [vmem:[%s7516_s3 + $0xcc] ss:$16 sps:$4 sm:$0xff]  }
 0x3cd   :  { %v5118_v24 = vld [vmem:[%s7516_s3 + $0xec] ss:$16 sps:$4 sm:$0xff]  }
 0x3d7   :  { %v1458_v43 = vpop.f32.mrb[60].mxu1 }
 0x3d8   :  { %v4828_v36 = vpop.f32.mrb[61].mxu1 }
 0x3d9   :  { %v1461_v31 = vpop.f32.mrb[62].mxu1  ;;  %v5124_v36 = vld [vmem:[%s7516_s3 + $0x10c] ss:$16 sps:$4 sm:$0xff]  }
 0x3da   :  { %v1554_v16 = vpack.c.bf16 %v1461_v31, %v1458_v43  ;;  %v4829_v18 = vpop.f32.mrb[63].mxu1  ;;  %v5122_v43 = vld [vmem:[%s7516_s3 + $0x108] ss:$16 sps:$4 sm:$0xff]  }
 0x3db   :  { %v5128_v31 = vld [vmem:[%s7516_s3 + $0x128] ss:$16 sps:$4 sm:$0xff]  }
 0x3dc   :  { %1909 = vmatprep.mubr.bf16.mxu0 %v1554_v16  ;;  %v5130_v16 = vld [vmem:[%s7516_s3 + $0x12c] ss:$16 sps:$4 sm:$0xff]   ;;  %v5134_v18 = vld [vmem:[%s7516_s3 + $0x148] ss:$16 sps:$4 sm:$0xff]  }
 0x3dd   :  { %1910 = vmatmul.mubr.bf16.vlgmr.msra.gmra.mrb[28].mxu0 %v1553_v40  ;;  %v5110_v40 = vld [vmem:[%s7516_s3 + $0xc8] ss:$16 sps:$4 sm:$0xff]  }
 0x3de   :  { %1921 = vmatpush1.bf16.msra.mxu0 %v5023_v48  ;;  %v5136_v48 = vld [vmem:[%s7516_s3 + $0x14c] ss:$16 sps:$4 sm:$0xff]  }
 0x3df   :  { %1922 = vmatprep.subr.bf16.mxu0 %v5028_v29 }
 0x3e2   :  { %1923 = vmatpush1.bf16.msra.mxu0 %v5026_v32 }
 0x3e3   :  { %1924 = vmatprep.subr.bf16.mxu0 %v5031_v63 }
 0x3e6   :  { %1925 = vmatpush1.bf16.msra.mxu0 %v5029_v57 }
 0x3e7   :  { %1926 = vmatprep.subr.bf16.mxu0 %v5034_v12  ;;  %v1546_v6 = vpop.f32.mrb[64].mxu1 }
 0x3e8   :  { %v4852_v8 = vpop.f32.mrb[65].mxu1 }
 0x3e9   :  { %v1549_v11 = vpop.f32.mrb[66].mxu1  ;;  %v5140_v8 = vld [vmem:[%s7516_s3 + $0x168] ss:$16 sps:$4 sm:$0xff]  }
 0x3ea   :  { %1927 = vmatpush1.bf16.msra.mxu0 %v5032_v15  ;;  %v1556_v38 = vpack.c.bf16 %v1549_v11, %v1546_v6  ;;  %v4853_v4 = vpop.f32.mrb[67].mxu1  ;;  %v5142_v11 = vld [vmem:[%s7516_s3 + $0x16c] ss:$16 sps:$4 sm:$0xff]  }
 0x3eb   :  { %1928 = vmatprep.subr.bf16.mxu0 %v5037_v45 }
 0x3ec   :  { %1952 = vmatprep.mubr.bf16.mxu0 %v1556_v38 }
 0x3ee   :  { %1929 = vmatpush1.bf16.msra.mxu0 %v5035_v19 }
 0x3ef   :  { %1930 = vmatprep.subr.bf16.mxu0 %v5040_v35 }
 0x3f2   :  { %1931 = vmatpush1.bf16.msra.mxu0 %v5038_v42 }
 0x3f3   :  { %1932 = vmatprep.subr.bf16.mxu0 %v5043_v44 }
 0x3f6   :  { %1933 = vmatpush1.bf16.msra.mxu0 %v5041_v49 }
 0x3f7   :  { %1934 = vmatprep.subr.bf16.mxu0 %v5046_v51 }
 0x3fa   :  { %1935 = vmatpush1.bf16.msra.mxu0 %v5044_v13  ;;  %v5146_v13 = vld [vmem:[%s7516_s3 + $0x188] ss:$16 sps:$4 sm:$0xff]  }
 0x3fb   :  { %1936 = vmatprep.subr.bf16.mxu0 %v5049_v23  ;;  %v5148_v23 = vld [vmem:[%s7516_s3 + $0x18c] ss:$16 sps:$4 sm:$0xff]  }
 0x3fe   :  { %1937 = vmatpush1.bf16.msra.mxu0 %v5047_v20 }
 0x3ff   :  { %1938 = vmatprep.subr.bf16.mxu0 %v5052_v56 }
 0x402   :  { %1939 = vmatpush1.bf16.msra.mxu0 %v5050_v54 }
 0x403   :  { %1940 = vmatprep.subr.bf16.mxu0 %v5055_v55 }
 0x406   :  { %1941 = vmatpush1.bf16.msra.mxu0 %v5053_v37 }
 0x407   :  { %1942 = vmatprep.subr.bf16.mxu0 %v5058_v21 }
 0x40a   :  { %1943 = vmatpush1.bf16.msra.mxu0 %v5056_v1 }
 0x40b   :  { %1944 = vmatprep.subr.bf16.mxu0 %v5061_v34 }
 0x40e   :  { %1945 = vmatpush1.bf16.msra.mxu0 %v5059_v39  ;;  %v5152_v39 = vld [vmem:[%s7516_s3 + $0x1a8] ss:$16 sps:$4 sm:$0xff]  }
 0x40f   :  { %1946 = vmatprep.subr.bf16.mxu0 %v5064_v2  ;;  %v5154_v2 = vld [vmem:[%s7516_s3 + $0x1ac] ss:$16 sps:$4 sm:$0xff]  }
 0x412   :  { %1947 = vmatpush1.bf16.msra.mxu0 %v5062_v5 }
 0x413   :  { %1948 = vmatprep.subr.bf16.mxu0 %v5067_v25 }
 0x416   :  { %1949 = vmatpush1.bf16.msra.mxu0 %v5065_v28 }
 0x417   :  { %1950 = vmatprep.subr.bf16.mxu0 %v5070_v7 }
 0x41a   :  { %1951 = vmatpush1.bf16.msra.mxu0 %v5068_v9 }
 0x41b   :  { %3706 = vmatprep.subr.bf16.mxu0 %v5076_v60 }
 0x41d   :  { %1953 = vmatmul.mubr.bf16.vlgmr.msra.gmra.mrb[28].mxu0 %v1555_v41  ;;  %v5116_v41 = vld [vmem:[%s7516_s3 + $0xe8] ss:$16 sps:$4 sm:$0xff]  }
 0x41e   :  { %3707 = vmatpush1.bf16.msra.mxu0 %v5074_v53 }
 0x41f   :  { %3708 = vmatprep.subr.bf16.mxu0 %v5082_v61  ;;  %v5158_v61 = vld [vmem:[%s7516_s3 + $0x1c8] ss:$16 sps:$4 sm:$0xff]  }
 0x422   :  { %3709 = vmatpush1.bf16.msra.mxu0 %v5080_v59 }
 0x423   :  { %3710 = vmatprep.subr.bf16.mxu0 %v5088_v17 }
 0x426   :  { %3711 = vmatpush1.bf16.msra.mxu0 %v5086_v0  ;;  %v5160_v0 = vld [vmem:[%s7516_s3 + $0x1cc] ss:$16 sps:$4 sm:$0xff]  }
 0x427   :  { %3712 = vmatprep.subr.bf16.mxu0 %v5094_v52 }
 0x42a   :  { %3713 = vmatpush1.bf16.msra.mxu0 %v5092_v62 }
 0x42b   :  { %3714 = vmatprep.subr.bf16.mxu0 %v5100_v27 }
 0x42e   :  { %3715 = vmatpush1.bf16.msra.mxu0 %v5098_v14 }
 0x42f   :  { %3716 = vmatprep.subr.bf16.mxu0 %v5106_v33 }
 0x432   :  { %3717 = vmatpush1.bf16.msra.mxu0 %v5104_v30 }
 0x433   :  { %3718 = vmatprep.subr.bf16.mxu0 %v5112_v58 }
 0x436   :  { %3719 = vmatpush1.bf16.msra.mxu0 %v5110_v40 }
 0x437   :  { %3720 = vmatprep.subr.bf16.mxu0 %v5118_v24 }
 0x43a   :  { %3721 = vmatpush1.bf16.msra.mxu0 %v5116_v41 }
 0x43b   :  { %3722 = vmatprep.subr.bf16.mxu0 %v5124_v36 }
 0x43e   :  { %3723 = vmatpush1.bf16.msra.mxu0 %v5122_v43 }
 0x43f   :  { %3724 = vmatprep.subr.bf16.mxu0 %v5130_v16 }
 0x442   :  { %3725 = vmatpush1.bf16.msra.mxu0 %v5128_v31 }
 0x443   :  { %3726 = vmatprep.subr.bf16.mxu0 %v5136_v48 }
 0x446   :  { %3727 = vmatpush1.bf16.msra.mxu0 %v5134_v18 }
 0x447   :  { %3728 = vmatprep.subr.bf16.mxu0 %v5142_v11 }
 0x44a   :  { %3729 = vmatpush1.bf16.msra.mxu0 %v5140_v8 }
 0x44b   :  { %3730 = vmatprep.subr.bf16.mxu0 %v5148_v23 }
 0x44e   :  { %3731 = vmatpush1.bf16.msra.mxu0 %v5146_v13 }
 0x44f   :  { %3732 = vmatprep.subr.bf16.mxu0 %v5154_v2 }
 0x452   :  { %3733 = vmatpush1.bf16.msra.mxu0 %v5152_v39 }
 0x453   :  { %3734 = vmatprep.subr.bf16.mxu0 %v5160_v0 }
 0x456   :  { %3735 = vmatpush1.bf16.msra.mxu0 %v5158_v61 }
 0x4f0   :  { %v1954_v29 = vpop.f32.mrb[28].mxu0 }
 0x4f1   :  { %v1963_v32 = vrot.slane %v1954_v29, 4  ;;  %v1956_v63 = vpop.f32.mrb[29].mxu0 }
 0x4f2   :  { %v1969_v57 = vrot.slane %v1956_v63, 4  ;;  %v1958_v12 = vpop.f32.mrb[30].mxu0 }
 0x4f3   :  { %v1964_v15 = vadd.f32 %v1963_v32, %v1954_v29  ;;  %v2022_v45 = vrot.slane %v1958_v12, 4  ;;  %v1960_v6 = vpop.f32.mrb[31].mxu0 }
 0x4f4   :  { %v1970_v19 = vadd.f32 %v1969_v57, %v1956_v63  ;;  %v2028_v38 = vrot.slane %v1960_v6, 4 }
 0x4f5   :  { %v1965_v4 = vrot.slane %v1964_v15, 2  ;;  %v2023_v35 = vadd.f32 %v2022_v45, %v1958_v12 }
 0x4f6   :  { %v1971_v42 = vrot.slane %v1970_v19, 2  ;;  %v2029_v44 = vadd.f32 %v2028_v38, %v1960_v6 }
 0x4f7   :  { %v1966_v49 = vadd.f32 %v1965_v4, %v1964_v15  ;;  %v2024_v51 = vrot.slane %v2023_v35, 2 }
 0x4f8   :  { %v1972_v20 = vadd.f32 %v1971_v42, %v1970_v19  ;;  %v2030_v56 = vrot.slane %v2029_v44, 2 }
 0x4f9   :  { %v1967_v54 = vrot.slane %v1966_v49, 1  ;;  %v2025_v55 = vadd.f32 %v2024_v51, %v2023_v35 }
 0x4fa   :  { %v1973_v37 = vrot.slane %v1972_v20, 1  ;;  %v2031_v21 = vadd.f32 %v2030_v56, %v2029_v44 }
 0x4fb   :  { %v1968_v1 = vadd.f32 %v1967_v54, %v1966_v49  ;;  %v2026_v34 = vrot.slane %v2025_v55, 1 }
 0x4fc   :  { %v1974_v5 = vadd.f32 %v1973_v37, %v1972_v20  ;;  %v2032_v25 = vrot.slane %v2031_v21, 1  ;;  %v410_v37 = vld [vmem:[%s7515_s5 + $0x8] sm:$0x3f] }
 0x4fd   :  { %v1976_v28 = vmul.f32 0.125, %v1968_v1  ;;  %v2027_v7 = vadd.f32 %v2026_v34, %v2025_v55  ;;  %v6676_v55 = vsub.s32 2, %v5536_v3  ;;  %v5483_v1 = vld [vmem:[%s7515_s5] sm:$0x3f] }
 0x4fe   :  { %v1977_v9 = vmul.f32 0.125, %v1974_v5  ;;  %v2033_v53 = vadd.f32 %v2032_v25, %v2031_v21  ;;  %v6682_v21 = vsub.s32 3, %v5536_v3 }
 0x4ff   :  { %v1978_v60 = vsub.f32 %v1954_v29, %v1976_v28  ;;  %v2034_v59 = vmul.f32 0.125, %v2027_v7  ;;  %v2005_v34 = vrot.slane %v5483_v1, %v6676_v55  ;;  %v2009_v2 = vrot.slane %v410_v37, %v6676_v55 }
 0x500   :  { %v1979_v17 = vsub.f32 %v1956_v63, %v1977_v9  ;;  %v2035_v62 = vmul.f32 0.125, %v2033_v53  ;;  %v2015_v28 = vrot.slane %v5483_v1, %v6682_v21  ;;  %v2019_v53 = vrot.slane %v410_v37, %v6682_v21  ;;  %v5145_v37 = vld [vmem:[%s7516_s3 + $0x184] ss:$16 sps:$4 sm:$0xff]   ;;  %v5143_v1 = vld [vmem:[%s7516_s3 + $0x180] ss:$16 sps:$4 sm:$0xff]  }
 0x501   :  { %v1980_v52 = vmul.f32 %v1978_v60, %v1978_v60  ;;  %v2036_v14 = vsub.f32 %v1958_v12, %v2034_v59 }
 0x502   :  { %v1981_v27 = vmul.f32 %v1979_v17, %v1979_v17  ;;  %v2037_v30 = vsub.f32 %v1960_v6, %v2035_v62 }
 0x503   :  { %v1982_v33 = vrot.slane %v1980_v52, 4  ;;  %v2038_v40 = vmul.f32 %v2036_v14, %v2036_v14 }
 0x504   :  { %v1988_v58 = vrot.slane %v1981_v27, 4  ;;  %v2039_v41 = vmul.f32 %v2037_v30, %v2037_v30 }
 0x505   :  { %v1983_v24 = vadd.f32 %v1982_v33, %v1980_v52  ;;  %v2040_v43 = vrot.slane %v2038_v40, 4 }
 0x506   :  { %v1989_v36 = vadd.f32 %v1988_v58, %v1981_v27  ;;  %v2046_v31 = vrot.slane %v2039_v41, 4 }
 0x507   :  { %v1984_v16 = vrot.slane %v1983_v24, 2  ;;  %v2041_v18 = vadd.f32 %v2040_v43, %v2038_v40 }
 0x508   :  { %v1990_v48 = vrot.slane %v1989_v36, 2  ;;  %v2047_v29 = vadd.f32 %v2046_v31, %v2039_v41 }
 0x509   :  { %v1985_v32 = vadd.f32 %v1984_v16, %v1983_v24  ;;  %v2042_v63 = vrot.slane %v2041_v18, 2 }
 0x50a   :  { %v1991_v57 = vadd.f32 %v1990_v48, %v1989_v36  ;;  %v2048_v12 = vrot.slane %v2047_v29, 2 }
 0x50b   :  { %v1986_v15 = vrot.slane %v1985_v32, 1  ;;  %v2043_v45 = vadd.f32 %v2042_v63, %v2041_v18  ;;  %v5073_v63 = vld [vmem:[%s7516_s3 + $0x4] ss:$16 sps:$4 sm:$0xff]  }
 0x50c   :  { %v1992_v6 = vrot.slane %v1991_v57, 1  ;;  %v2049_v8 = vadd.f32 %v2048_v12, %v2047_v29  ;;  %v5077_v12 = vld [vmem:[%s7516_s3 + $0x20] ss:$16 sps:$4 sm:$0xff]  }
 0x50d   :  { %v1987_v11 = vadd.f32 %v1986_v15, %v1985_v32  ;;  %v2044_v19 = vrot.slane %v2043_v45, 1  ;;  %v5091_v15 = vld [vmem:[%s7516_s3 + $0x64] ss:$16 sps:$4 sm:$0xff]  }
 0x50e   :  { %v1993_v38 = vadd.f32 %v1992_v6, %v1991_v57  ;;  %v2050_v4 = vrot.slane %v2049_v8, 1  ;;  %v5071_v57 = vld [vmem:[%s7516_s3] ss:$16 sps:$4 sm:$0xff]   ;;  %v5097_v6 = vld [vmem:[%s7516_s3 + $0x84] ss:$16 sps:$4 sm:$0xff]  }
 0x50f   :  { %v1994_v35 = vmul.f32 0.125, %v1987_v11  ;;  %v2045_v42 = vadd.f32 %v2044_v19, %v2043_v45  ;;  %v5089_v45 = vld [vmem:[%s7516_s3 + $0x60] ss:$16 sps:$4 sm:$0xff]   ;;  %v5103_v11 = vld [vmem:[%s7516_s3 + $0xa4] ss:$16 sps:$4 sm:$0xff]  }
 0x510   :  { %v1995_v44 = vmul.f32 0.125, %v1993_v38  ;;  %v2051_v49 = vadd.f32 %v2050_v4, %v2049_v8  ;;  %v5095_v8 = vld [vmem:[%s7516_s3 + $0x80] ss:$16 sps:$4 sm:$0xff]   ;;  %v5109_v38 = vld [vmem:[%s7516_s3 + $0xc4] ss:$16 sps:$4 sm:$0xff]  }
 0x511   :  { %v1996_v51 = vadd.f32 1e-05, %v1994_v35  ;;  %v2052_v13 = vmul.f32 0.125, %v2045_v42  ;;  %v5101_v19 = vld [vmem:[%s7516_s3 + $0xa0] ss:$16 sps:$4 sm:$0xff]  }
 0x512   :  { %v1997_v23 = vadd.f32 1e-05, %v1995_v44  ;;  %v2053_v20 = vmul.f32 0.125, %v2051_v49  ;;  %v5107_v4 = vld [vmem:[%s7516_s3 + $0xc0] ss:$16 sps:$4 sm:$0xff]  }
 0x513   :  { %5459 = vrsqrt.f32 %v1996_v51  ;;  %v2054_v56 = vadd.f32 1e-05, %v2052_v13  ;;  %v5115_v35 = vld [vmem:[%s7516_s3 + $0xe4] ss:$16 sps:$4 sm:$0xff]   ;;  %v5113_v42 = vld [vmem:[%s7516_s3 + $0xe0] ss:$16 sps:$4 sm:$0xff]  }
 0x514   :  { %5461 = vrsqrt.f32 %v1997_v23  ;;  %v2055_v54 = vadd.f32 1e-05, %v2053_v20  ;;  %v5121_v44 = vld [vmem:[%s7516_s3 + $0x104] ss:$16 sps:$4 sm:$0xff]   ;;  %v5119_v49 = vld [vmem:[%s7516_s3 + $0x100] ss:$16 sps:$4 sm:$0xff]  }
 0x515   :  { %5463 = vrsqrt.f32 %v2054_v56  ;;  %v5127_v51 = vld [vmem:[%s7516_s3 + $0x124] ss:$16 sps:$4 sm:$0xff]   ;;  %v5125_v13 = vld [vmem:[%s7516_s3 + $0x120] ss:$16 sps:$4 sm:$0xff]  }
 0x516   :  { %5465 = vrsqrt.f32 %v2055_v54  ;;  %v5133_v23 = vld [vmem:[%s7516_s3 + $0x144] ss:$16 sps:$4 sm:$0xff]   ;;  %v5131_v20 = vld [vmem:[%s7516_s3 + $0x140] ss:$16 sps:$4 sm:$0xff]  }
 0x517   :  { %v5139_v56 = vld [vmem:[%s7516_s3 + $0x164] ss:$16 sps:$4 sm:$0xff]   ;;  %v5137_v54 = vld [vmem:[%s7516_s3 + $0x160] ss:$16 sps:$4 sm:$0xff]  }
 0x51d   :  { %v5460_v39 = vpop.eup %5459 }
 0x51e   :  { %v5462_v5 = vpop.eup %5461  ;;  %v2000_v25 = vmul.f32 %v5460_v39, %v1978_v60  ;;  %v5149_v39 = vld [vmem:[%s7516_s3 + $0x1a0] ss:$16 sps:$4 sm:$0xff]  }
 0x51f   :  { %v5464_v7 = vpop.eup %5463  ;;  %v2001_v9 = vmul.f32 %v5462_v5, %v1979_v17  ;;  %v5155_v5 = vld [vmem:[%s7516_s3 + $0x1c0] ss:$16 sps:$4 sm:$0xff]  }
 0x520   :  { %v5466_v59 = vpop.eup %5465  ;;  %v2010_v61 = vmul.f32 %v2005_v34, %v2000_v25  ;;  %v2058_v0 = vmul.f32 %v5464_v7, %v2036_v14  ;;  %v2119_v14 = vpack.c.bf16 %v5701_v47, %v5701_v47  ;;  %v2209_v47 = vpack.c.bf16 %v5838_v22, %v5838_v22  ;;  %v5083_v22 = vld [vmem:[%s7516_s3 + $0x40] ss:$16 sps:$4 sm:$0xff]   ;;  %v5163_v25 = vld [vmem:[%s7516_s3 + $0x1e4] ss:$16 sps:$4 sm:$0xff]  }
 0x521   :  { %v2011_v62 = vmul.f32 %v2009_v2, %v2001_v9  ;;  %v2059_v52 = vmul.f32 %v5466_v59, %v2037_v30  ;;  %v2164_v30 = vpack.c.bf16 %v5920_v46, %v5920_v46  ;;  %v5079_v46 = vld [vmem:[%s7516_s3 + $0x24] ss:$16 sps:$4 sm:$0xff]   ;;  %v5161_v7 = vld [vmem:[%s7516_s3 + $0x1e0] ss:$16 sps:$4 sm:$0xff]   ;;  %v5164_v9 = vld [vmem:[%s7516_s3 + $0x1e8] ss:$16 sps:$4 sm:$0xff]  }
 0x522   :  { %v2020_v27 = vadd.f32 %v2015_v28, %v2010_v61  ;;  %v2060_v33 = vmul.f32 %v2058_v0, %v2005_v34  ;;  %v5151_v34 = vld [vmem:[%s7516_s3 + $0x1a4] ss:$16 sps:$4 sm:$0xff]   ;;  %v5172_v59 = vld [vmem:[%s7516_s3 + $0x20c] ss:$16 sps:$4 sm:$0xff]  }
 0x523   :  { %v2021_v40 = vadd.f32 %v2019_v53, %v2011_v62  ;;  %v2061_v58 = vmul.f32 %v2059_v52, %v2009_v2  ;;  %v5157_v2 = vld [vmem:[%s7516_s3 + $0x1c4] ss:$16 sps:$4 sm:$0xff]  }
 0x524   :  { %v2062_v41 = vadd.f32 %v2060_v33, %v2015_v28  ;;  %v2064_v24 = vmul.f32 0.2, %v2020_v27  ;;  %v5166_v28 = vld [vmem:[%s7516_s3 + $0x1ec] ss:$16 sps:$4 sm:$0xff]   ;;  %v5170_v33 = vld [vmem:[%s7516_s3 + $0x208] ss:$16 sps:$4 sm:$0xff]  }
 0x525   :  { %v2063_v43 = vadd.f32 %v2061_v58, %v2019_v53  ;;  %v2065_v36 = vmul.f32 0.2, %v2021_v40  ;;  %3736 = vmatprep.subr.bf16.mxu0 %v5166_v28  ;;  %v5169_v53 = vld [vmem:[%s7516_s3 + $0x204] ss:$16 sps:$4 sm:$0xff]   ;;  %v5226_v28 = vld [vmem:[%s7516_s3 + $0x32c] ss:$16 sps:$4 sm:$0xff]  }
 0x526   :  { %v2066_v60 = vmul.f32 0.2, %v2062_v41  ;;  %v2068_v16 = vmax.f32 %v2020_v27, %v2064_v24  ;;  %3737 = vmatpush1.bf16.msra.mxu0 %v5164_v9  ;;  %v5167_v27 = vld [vmem:[%s7516_s3 + $0x200] ss:$16 sps:$4 sm:$0xff]   ;;  %v5178_v24 = vld [vmem:[%s7516_s3 + $0x22c] ss:$16 sps:$4 sm:$0xff]  }
 0x527   :  { %v2067_v31 = vmul.f32 0.2, %v2063_v43  ;;  %v2069_v17 = vmax.f32 %v2021_v40, %v2065_v36  ;;  %3747 = vmatprep.subr.bf16.mxu0 %v5172_v59  ;;  %v5176_v36 = vld [vmem:[%s7516_s3 + $0x228] ss:$16 sps:$4 sm:$0xff]   ;;  %v5232_v59 = vld [vmem:[%s7516_s3 + $0x34c] ss:$16 sps:$4 sm:$0xff]  }
 0x528   :  { %v2070_v18 = vmax.f32 %v2062_v41, %v2066_v60  ;;  %v5175_v41 = vld [vmem:[%s7516_s3 + $0x224] ss:$16 sps:$4 sm:$0xff]   ;;  %v5224_v9 = vld [vmem:[%s7516_s3 + $0x328] ss:$16 sps:$4 sm:$0xff]  }
 0x529   :  { %v2071_v48 = vmax.f32 %v2063_v43, %v2067_v31  ;;  %v5173_v43 = vld [vmem:[%s7516_s3 + $0x220] ss:$16 sps:$4 sm:$0xff]   ;;  %v5181_v60 = vld [vmem:[%s7516_s3 + $0x244] ss:$16 sps:$4 sm:$0xff]   ;;  %v5184_v31 = vld [vmem:[%s7516_s3 + $0x24c] ss:$16 sps:$4 sm:$0xff]  }
 0x52a   :  { %v2072_v29 = vpack.c.bf16 %v2070_v18, %v2068_v16 }
 0x52b   :  { %v2073_v32 = vpack.c.bf16 %v2071_v48, %v2069_v17  ;;  %v5179_v17 = vld [vmem:[%s7516_s3 + $0x240] ss:$16 sps:$4 sm:$0xff]   ;;  %v5182_v48 = vld [vmem:[%s7516_s3 + $0x248] ss:$16 sps:$4 sm:$0xff]  }
 0x52d   :  { %2078 = vmatprep.subr.bf16.mxu1 %v2073_v32 }
 0x52e   :  { %2079 = vmatpush1.bf16.msra.mxu1 %v2072_v29 }
 0x52f   :  { %2123 = vmatprep.subr.bf16.mxu1 %v2073_v32 }
 0x531   :  { %2111 = vmatmul.mubr.bf16.vlgmr.msra.gmra.mrb[68].mxu1 %v5490_v10 }
 0x532   :  { %2124 = vmatpush1.bf16.msra.mxu1 %v2072_v29  ;;  %2155 = vmatprep.mubr.bf16.mxu1 %v5490_v10 }
 0x533   :  { %2168 = vmatprep.subr.bf16.mxu1 %v2073_v32 }
 0x539   :  { %4327 = vmatmul.mubr.msk.bf16.vlgmr.msra.gmra.mrb[72].mxu1 %vm2074_vm3, %v2119_v14  ;;  %v5187_v14 = vld [vmem:[%s7516_s3 + $0x264] ss:$16 sps:$4 sm:$0xff]  }
 0x53a   :  { %2169 = vmatpush1.bf16.msra.mxu1 %v2072_v29  ;;  %2200 = vmatprep.mubr.bf16.mxu1 %v5490_v10 }
 0x53b   :  { %2213 = vmatprep.subr.bf16.mxu1 %v2073_v32 }
 0x541   :  { %4328 = vmatmul.mubr.msk.bf16.vlgmr.msra.gmra.mrb[76].mxu1 %vm2074_vm3, %v2164_v30  ;;  %v5190_v30 = vld [vmem:[%s7516_s3 + $0x26c] ss:$16 sps:$4 sm:$0xff]  }
 0x542   :  { %2214 = vmatpush1.bf16.msra.mxu1 %v2072_v29  ;;  %2245 = vmatprep.mubr.bf16.mxu1 %v5490_v10  ;;  %v5085_v10 = vld [vmem:[%s7516_s3 + $0x44] ss:$16 sps:$4 sm:$0xff]  }
 0x543   :  { %3542 = vmatprep.subr.bf16.mxu1 %v5073_v63 }
 0x549   :  { %4329 = vmatmul.mubr.msk.bf16.vlgmr.msra.gmra.mrb[80].mxu1 %vm2074_vm3, %v2209_v47  ;;  %v5185_v47 = vld [vmem:[%s7516_s3 + $0x260] ss:$16 sps:$4 sm:$0xff]  }
 0x54a   :  { %3543 = vmatpush1.bf16.msra.mxu1 %v5071_v57  ;;  %v5188_v57 = vld [vmem:[%s7516_s3 + $0x268] ss:$16 sps:$4 sm:$0xff]  }
 0x54b   :  { %3544 = vmatprep.subr.bf16.mxu1 %v5079_v46  ;;  %v5193_v46 = vld [vmem:[%s7516_s3 + $0x284] ss:$16 sps:$4 sm:$0xff]  }
 0x54e   :  { %3545 = vmatpush1.bf16.msra.mxu1 %v5077_v12  ;;  %v5196_v12 = vld [vmem:[%s7516_s3 + $0x28c] ss:$16 sps:$4 sm:$0xff]  }
 0x54f   :  { %3546 = vmatprep.subr.bf16.mxu1 %v5085_v10 }
 0x552   :  { %3547 = vmatpush1.bf16.msra.mxu1 %v5083_v22 }
 0x553   :  { %3548 = vmatprep.subr.bf16.mxu1 %v5091_v15  ;;  %v5191_v15 = vld [vmem:[%s7516_s3 + $0x280] ss:$16 sps:$4 sm:$0xff]  }
 0x556   :  { %3549 = vmatpush1.bf16.msra.mxu1 %v5089_v45  ;;  %v5194_v45 = vld [vmem:[%s7516_s3 + $0x288] ss:$16 sps:$4 sm:$0xff]  }
 0x557   :  { %3550 = vmatprep.subr.bf16.mxu1 %v5097_v6 }
 0x55a   :  { %3551 = vmatpush1.bf16.msra.mxu1 %v5095_v8  ;;  %v5199_v8 = vld [vmem:[%s7516_s3 + $0x2a4] ss:$16 sps:$4 sm:$0xff]  }
 0x55b   :  { %3552 = vmatprep.subr.bf16.mxu1 %v5103_v11  ;;  %v5202_v11 = vld [vmem:[%s7516_s3 + $0x2ac] ss:$16 sps:$4 sm:$0xff]  }
 0x55e   :  { %3553 = vmatpush1.bf16.msra.mxu1 %v5101_v19 }
 0x55f   :  { %3554 = vmatprep.subr.bf16.mxu1 %v5109_v38  ;;  %v5197_v38 = vld [vmem:[%s7516_s3 + $0x2a0] ss:$16 sps:$4 sm:$0xff]  }
 0x562   :  { %3555 = vmatpush1.bf16.msra.mxu1 %v5107_v4  ;;  %v5200_v4 = vld [vmem:[%s7516_s3 + $0x2a8] ss:$16 sps:$4 sm:$0xff]  }
 0x563   :  { %3556 = vmatprep.subr.bf16.mxu1 %v5115_v35  ;;  %v5205_v35 = vld [vmem:[%s7516_s3 + $0x2c4] ss:$16 sps:$4 sm:$0xff]  }
 0x566   :  { %3557 = vmatpush1.bf16.msra.mxu1 %v5113_v42  ;;  %v5208_v42 = vld [vmem:[%s7516_s3 + $0x2cc] ss:$16 sps:$4 sm:$0xff]  }
 0x567   :  { %3558 = vmatprep.subr.bf16.mxu1 %v5121_v44 }
 0x56a   :  { %3559 = vmatpush1.bf16.msra.mxu1 %v5119_v49 }
 0x56b   :  { %3560 = vmatprep.subr.bf16.mxu1 %v5127_v51  ;;  %v5203_v51 = vld [vmem:[%s7516_s3 + $0x2c0] ss:$16 sps:$4 sm:$0xff]  }
 0x56e   :  { %3561 = vmatpush1.bf16.msra.mxu1 %v5125_v13  ;;  %v5206_v13 = vld [vmem:[%s7516_s3 + $0x2c8] ss:$16 sps:$4 sm:$0xff]  }
 0x56f   :  { %3562 = vmatprep.subr.bf16.mxu1 %v5133_v23 }
 0x572   :  { %3563 = vmatpush1.bf16.msra.mxu1 %v5131_v20  ;;  %v5211_v20 = vld [vmem:[%s7516_s3 + $0x2e4] ss:$16 sps:$4 sm:$0xff]  }
 0x573   :  { %3564 = vmatprep.subr.bf16.mxu1 %v5139_v56  ;;  %v5214_v56 = vld [vmem:[%s7516_s3 + $0x2ec] ss:$16 sps:$4 sm:$0xff]  }
 0x576   :  { %3565 = vmatpush1.bf16.msra.mxu1 %v5137_v54 }
 0x577   :  { %3566 = vmatprep.subr.bf16.mxu1 %v5145_v37  ;;  %v5209_v37 = vld [vmem:[%s7516_s3 + $0x2e0] ss:$16 sps:$4 sm:$0xff]  }
 0x57a   :  { %3567 = vmatpush1.bf16.msra.mxu1 %v5143_v1  ;;  %v5212_v1 = vld [vmem:[%s7516_s3 + $0x2e8] ss:$16 sps:$4 sm:$0xff]  }
 0x57b   :  { %3568 = vmatprep.subr.bf16.mxu1 %v5151_v34  ;;  %v5217_v34 = vld [vmem:[%s7516_s3 + $0x304] ss:$16 sps:$4 sm:$0xff]  }
 0x57e   :  { %3569 = vmatpush1.bf16.msra.mxu1 %v5149_v39  ;;  %v5220_v39 = vld [vmem:[%s7516_s3 + $0x30c] ss:$16 sps:$4 sm:$0xff]  }
 0x57f   :  { %3570 = vmatprep.subr.bf16.mxu1 %v5157_v2  ;;  %v5215_v2 = vld [vmem:[%s7516_s3 + $0x300] ss:$16 sps:$4 sm:$0xff]  }
 0x582   :  { %3571 = vmatpush1.bf16.msra.mxu1 %v5155_v5  ;;  %v5218_v5 = vld [vmem:[%s7516_s3 + $0x308] ss:$16 sps:$4 sm:$0xff]  }
 0x583   :  { %3572 = vmatprep.subr.bf16.mxu1 %v5163_v25  ;;  %v5223_v25 = vld [vmem:[%s7516_s3 + $0x324] ss:$16 sps:$4 sm:$0xff]  }
 0x586   :  { %3573 = vmatpush1.bf16.msra.mxu1 %v5161_v7  ;;  %v5221_v7 = vld [vmem:[%s7516_s3 + $0x320] ss:$16 sps:$4 sm:$0xff]  }
 0x587   :  { %3583 = vmatprep.subr.bf16.mxu1 %v5169_v53  ;;  %v5229_v53 = vld [vmem:[%s7516_s3 + $0x344] ss:$16 sps:$4 sm:$0xff]  }
 0x604   :  { %v2112_v61 = vpop.f32.mrb[68].mxu1 }
 0x605   :  { %v2114_v0 = vpop.f32.mrb[69].mxu1  ;;  %v2254_v40 = vpack.c.bf16 %v2112_v61, %v2112_v61  ;;  %v5227_v61 = vld [vmem:[%s7516_s3 + $0x340] ss:$16 sps:$4 sm:$0xff]  }
 0x606   :  { %v2255_v62 = vpack.c.bf16 %v2114_v0, %v2114_v0  ;;  %v2116_v52 = vpop.f32.mrb[70].mxu1  ;;  %v5230_v0 = vld [vmem:[%s7516_s3 + $0x348] ss:$16 sps:$4 sm:$0xff]  }
 0x607   :  { %v2117_v58 = vpop.f32.mrb[71].mxu1  ;;  %v5238_v52 = vld [vmem:[%s7516_s3 + $0x36c] ss:$16 sps:$4 sm:$0xff]  }
 0x608   :  { %3574 = vmatprep.mubr.bf16.mxu1 %v2255_v62  ;;  %3738 = vmatprep.mubr.bf16.mxu0 %v2255_v62  ;;  %v5235_v62 = vld [vmem:[%s7516_s3 + $0x364] ss:$16 sps:$4 sm:$0xff]   ;;  %v5244_v58 = vld [vmem:[%s7516_s3 + $0x38c] ss:$16 sps:$4 sm:$0xff]  }
 0x609   :  { %3575 = vmatmul.mubr.bf16.vlgmr.msra.gmra.mrb[84].mxu1 %v2254_v40  ;;  %3739 = vmatmul.mubr.bf16.vlgmr.msra.gmra.mrb[32].mxu0 %v2254_v40  ;;  %v5241_v40 = vld [vmem:[%s7516_s3 + $0x384] ss:$16 sps:$4 sm:$0xff]  }
 0x60a   :  { %3584 = vmatpush1.bf16.msra.mxu1 %v5167_v27  ;;  %3748 = vmatpush1.bf16.msra.mxu0 %v5170_v33  ;;  %v5233_v27 = vld [vmem:[%s7516_s3 + $0x360] ss:$16 sps:$4 sm:$0xff]   ;;  %v5236_v33 = vld [vmem:[%s7516_s3 + $0x368] ss:$16 sps:$4 sm:$0xff]  }
 0x60b   :  { %3585 = vmatprep.subr.bf16.mxu1 %v5175_v41  ;;  %3749 = vmatprep.subr.bf16.mxu0 %v5178_v24  ;;  %v5239_v41 = vld [vmem:[%s7516_s3 + $0x380] ss:$16 sps:$4 sm:$0xff]   ;;  %v5242_v24 = vld [vmem:[%s7516_s3 + $0x388] ss:$16 sps:$4 sm:$0xff]  }
 0x60c   :  { %v6833_v16 = vpop.f32.mrb[72].mxu1 }
 0x60d   :  { %v2159_v18 = vpop.f32.mrb[73].mxu1 }
 0x60e   :  { %3586 = vmatpush1.bf16.msra.mxu1 %v5173_v43  ;;  %3750 = vmatpush1.bf16.msra.mxu0 %v5176_v36  ;;  %v2257_v29 = vpack.c.bf16 %v2159_v18, %v2159_v18  ;;  %v2161_v32 = vpop.f32.mrb[74].mxu1  ;;  %v5247_v43 = vld [vmem:[%s7516_s3 + $0x3a4] ss:$16 sps:$4 sm:$0xff]   ;;  %v5250_v36 = vld [vmem:[%s7516_s3 + $0x3ac] ss:$16 sps:$4 sm:$0xff]  }
 0x60f   :  { %3587 = vmatprep.subr.bf16.mxu1 %v5181_v60  ;;  %3751 = vmatprep.subr.bf16.mxu0 %v5184_v31  ;;  %v2162_v63 = vpop.f32.mrb[75].mxu1  ;;  %v5245_v60 = vld [vmem:[%s7516_s3 + $0x3a0] ss:$16 sps:$4 sm:$0xff]   ;;  %v5248_v31 = vld [vmem:[%s7516_s3 + $0x3a8] ss:$16 sps:$4 sm:$0xff]  }
 0x610   :  { %3615 = vmatprep.mubr.bf16.mxu1 %v2257_v29  ;;  %3779 = vmatprep.mubr.bf16.mxu0 %v2257_v29  ;;  %v5253_v18 = vld [vmem:[%s7516_s3 + $0x3c4] ss:$16 sps:$4 sm:$0xff]   ;;  %v5254_v29 = vld [vmem:[%s7516_s3 + $0x3c8] ss:$16 sps:$4 sm:$0xff]  }
 0x611   :  { %v5259_v32 = vld [vmem:[%s7516_s3 + $0x3e4] ss:$16 sps:$4 sm:$0xff]   ;;  %v5260_v63 = vld [vmem:[%s7516_s3 + $0x3e8] ss:$16 sps:$4 sm:$0xff]  }
 0x612   :  { %3588 = vmatpush1.bf16.msra.mxu1 %v5179_v17  ;;  %3752 = vmatpush1.bf16.msra.mxu0 %v5182_v48  ;;  %v5256_v17 = vld [vmem:[%s7516_s3 + $0x3cc] ss:$16 sps:$4 sm:$0xff]   ;;  %v5251_v48 = vld [vmem:[%s7516_s3 + $0x3c0] ss:$16 sps:$4 sm:$0xff]  }
 0x613   :  { %3589 = vmatprep.subr.bf16.mxu1 %v5187_v14  ;;  %3753 = vmatprep.subr.bf16.mxu0 %v5190_v30  ;;  %v5262_v14 = vld [vmem:[%s7516_s3 + $0x3ec] ss:$16 sps:$4 sm:$0xff]   ;;  %v5257_v30 = vld [vmem:[%s7516_s3 + $0x3e0] ss:$16 sps:$4 sm:$0xff]  }
 0x614   :  { %v6859_v10 = vpop.f32.mrb[76].mxu1 }
 0x615   :  { %v6861_v22 = vpop.f32.mrb[77].mxu1 }
 0x616   :  { %3590 = vmatpush1.bf16.msra.mxu1 %v5185_v47  ;;  %3754 = vmatpush1.bf16.msra.mxu0 %v5188_v57  ;;  %v2206_v6 = vpop.f32.mrb[78].mxu1  ;;  %v5265_v47 = vld [vmem:[%s7516_s3 + $0x404] ss:$16 sps:$4 sm:$0xff]   ;;  %v5268_v57 = vld [vmem:[%s7516_s3 + $0x40c] ss:$16 sps:$4 sm:$0xff]  }
 0x617   :  { %3591 = vmatprep.subr.bf16.mxu1 %v5193_v46  ;;  %3755 = vmatprep.subr.bf16.mxu0 %v5196_v12  ;;  %v2207_v19 = vpop.f32.mrb[79].mxu1  ;;  %v2256_v46 = vpack.c.bf16 %v6833_v16, %v6833_v16  ;;  %v5263_v12 = vld [vmem:[%s7516_s3 + $0x400] ss:$16 sps:$4 sm:$0xff]   ;;  %v5274_v16 = vld [vmem:[%s7516_s3 + $0x42c] ss:$16 sps:$4 sm:$0xff]   ;;  %v2259_v6 = vpack.c.bf16 %v6861_v22, %v6861_v22 }
 0x618   :  { %v5277_v19 = vld [vmem:[%s7516_s3 + $0x444] ss:$16 sps:$4 sm:$0xff]   ;;  %v5280_v22 = vld [vmem:[%s7516_s3 + $0x44c] ss:$16 sps:$4 sm:$0xff]  }
 0x61a   :  { %3592 = vmatpush1.bf16.msra.mxu1 %v5191_v15  ;;  %3756 = vmatpush1.bf16.msra.mxu0 %v5194_v45  ;;  %v5266_v15 = vld [vmem:[%s7516_s3 + $0x408] ss:$16 sps:$4 sm:$0xff]   ;;  %v5271_v45 = vld [vmem:[%s7516_s3 + $0x424] ss:$16 sps:$4 sm:$0xff]  }
 0x61b   :  { %3593 = vmatprep.subr.bf16.mxu1 %v5199_v8  ;;  %3757 = vmatprep.subr.bf16.mxu0 %v5202_v11  ;;  %v5269_v8 = vld [vmem:[%s7516_s3 + $0x420] ss:$16 sps:$4 sm:$0xff]   ;;  %v5272_v11 = vld [vmem:[%s7516_s3 + $0x428] ss:$16 sps:$4 sm:$0xff]  }
 0x61c   :  { %v6887_v44 = vpop.f32.mrb[80].mxu1 }
 0x61d   :  { %v6889_v49 = vpop.f32.mrb[81].mxu1 }
 0x61e   :  { %3594 = vmatpush1.bf16.msra.mxu1 %v5197_v38  ;;  %3758 = vmatpush1.bf16.msra.mxu0 %v5200_v4  ;;  %v2251_v23 = vpop.f32.mrb[82].mxu1  ;;  %v5275_v38 = vld [vmem:[%s7516_s3 + $0x440] ss:$16 sps:$4 sm:$0xff]   ;;  %v5278_v4 = vld [vmem:[%s7516_s3 + $0x448] ss:$16 sps:$4 sm:$0xff]  }
 0x61f   :  { %3595 = vmatprep.subr.bf16.mxu1 %v5205_v35  ;;  %3759 = vmatprep.subr.bf16.mxu0 %v5208_v42  ;;  %v2252_v54 = vpop.f32.mrb[83].mxu1  ;;  %v5283_v35 = vld [vmem:[%s7516_s3 + $0x464] ss:$16 sps:$4 sm:$0xff]   ;;  %v5286_v42 = vld [vmem:[%s7516_s3 + $0x46c] ss:$16 sps:$4 sm:$0xff]  }
 0x620   :  { %v5289_v23 = vld [vmem:[%s7516_s3 + $0x484] ss:$16 sps:$4 sm:$0xff]   ;;  %v5290_v54 = vld [vmem:[%s7516_s3 + $0x488] ss:$16 sps:$4 sm:$0xff]  }
 0x622   :  { %3596 = vmatpush1.bf16.msra.mxu1 %v5203_v51  ;;  %3760 = vmatpush1.bf16.msra.mxu0 %v5206_v13  ;;  %v5281_v51 = vld [vmem:[%s7516_s3 + $0x460] ss:$16 sps:$4 sm:$0xff]   ;;  %v5284_v13 = vld [vmem:[%s7516_s3 + $0x468] ss:$16 sps:$4 sm:$0xff]  }
 0x623   :  { %3597 = vmatprep.subr.bf16.mxu1 %v5211_v20  ;;  %3761 = vmatprep.subr.bf16.mxu0 %v5214_v56  ;;  %v5292_v20 = vld [vmem:[%s7516_s3 + $0x48c] ss:$16 sps:$4 sm:$0xff]   ;;  %v5287_v56 = vld [vmem:[%s7516_s3 + $0x480] ss:$16 sps:$4 sm:$0xff]  }
 0x626   :  { %3598 = vmatpush1.bf16.msra.mxu1 %v5209_v37  ;;  %3762 = vmatpush1.bf16.msra.mxu0 %v5212_v1  ;;  %v5295_v37 = vld [vmem:[%s7516_s3 + $0x4a4] ss:$16 sps:$4 sm:$0xff]   ;;  %v5298_v1 = vld [vmem:[%s7516_s3 + $0x4ac] ss:$16 sps:$4 sm:$0xff]  }
 0x627   :  { %3599 = vmatprep.subr.bf16.mxu1 %v5217_v34  ;;  %3763 = vmatprep.subr.bf16.mxu0 %v5220_v39  ;;  %v5293_v34 = vld [vmem:[%s7516_s3 + $0x4a0] ss:$16 sps:$4 sm:$0xff]   ;;  %v5296_v39 = vld [vmem:[%s7516_s3 + $0x4a8] ss:$16 sps:$4 sm:$0xff]  }
 0x62a   :  { %3600 = vmatpush1.bf16.msra.mxu1 %v5215_v2  ;;  %3764 = vmatpush1.bf16.msra.mxu0 %v5218_v5  ;;  %v5301_v2 = vld [vmem:[%s7516_s3 + $0x4c4] ss:$16 sps:$4 sm:$0xff]   ;;  %v5304_v5 = vld [vmem:[%s7516_s3 + $0x4cc] ss:$16 sps:$4 sm:$0xff]  }
 0x62b   :  { %3601 = vmatprep.subr.bf16.mxu1 %v5223_v25  ;;  %3765 = vmatprep.subr.bf16.mxu0 %v5226_v28  ;;  %v5299_v25 = vld [vmem:[%s7516_s3 + $0x4c0] ss:$16 sps:$4 sm:$0xff]   ;;  %v5302_v28 = vld [vmem:[%s7516_s3 + $0x4c8] ss:$16 sps:$4 sm:$0xff]  }
 0x62e   :  { %3602 = vmatpush1.bf16.msra.mxu1 %v5221_v7  ;;  %3766 = vmatpush1.bf16.msra.mxu0 %v5224_v9  ;;  %v5307_v7 = vld [vmem:[%s7516_s3 + $0x4e4] ss:$16 sps:$4 sm:$0xff]   ;;  %v5310_v9 = vld [vmem:[%s7516_s3 + $0x4ec] ss:$16 sps:$4 sm:$0xff]  }
 0x62f   :  { %3603 = vmatprep.subr.bf16.mxu1 %v5229_v53  ;;  %3767 = vmatprep.subr.bf16.mxu0 %v5232_v59  ;;  %v5305_v53 = vld [vmem:[%s7516_s3 + $0x4e0] ss:$16 sps:$4 sm:$0xff]   ;;  %v5308_v59 = vld [vmem:[%s7516_s3 + $0x4e8] ss:$16 sps:$4 sm:$0xff]  }
 0x632   :  { %3604 = vmatpush1.bf16.msra.mxu1 %v5227_v61  ;;  %3768 = vmatpush1.bf16.msra.mxu0 %v5230_v0  ;;  %v5313_v61 = vld [vmem:[%s7516_s3 + $0x504] ss:$16 sps:$4 sm:$0xff]   ;;  %v5316_v0 = vld [vmem:[%s7516_s3 + $0x50c] ss:$16 sps:$4 sm:$0xff]  }
 0x633   :  { %3605 = vmatprep.subr.bf16.mxu1 %v5235_v62  ;;  %3769 = vmatprep.subr.bf16.mxu0 %v5238_v52  ;;  %v5311_v62 = vld [vmem:[%s7516_s3 + $0x500] ss:$16 sps:$4 sm:$0xff]   ;;  %v5314_v52 = vld [vmem:[%s7516_s3 + $0x508] ss:$16 sps:$4 sm:$0xff]  }
 0x636   :  { %3606 = vmatpush1.bf16.msra.mxu1 %v5233_v27  ;;  %3770 = vmatpush1.bf16.msra.mxu0 %v5236_v33  ;;  %v5319_v27 = vld [vmem:[%s7516_s3 + $0x524] ss:$16 sps:$4 sm:$0xff]   ;;  %v5322_v33 = vld [vmem:[%s7516_s3 + $0x52c] ss:$16 sps:$4 sm:$0xff]  }
 0x637   :  { %3607 = vmatprep.subr.bf16.mxu1 %v5241_v40  ;;  %3771 = vmatprep.subr.bf16.mxu0 %v5244_v58  ;;  %v5317_v40 = vld [vmem:[%s7516_s3 + $0x520] ss:$16 sps:$4 sm:$0xff]   ;;  %v5320_v58 = vld [vmem:[%s7516_s3 + $0x528] ss:$16 sps:$4 sm:$0xff]  }
 0x63a   :  { %3608 = vmatpush1.bf16.msra.mxu1 %v5239_v41  ;;  %3772 = vmatpush1.bf16.msra.mxu0 %v5242_v24  ;;  %v5325_v41 = vld [vmem:[%s7516_s3 + $0x544] ss:$16 sps:$4 sm:$0xff]   ;;  %v5328_v24 = vld [vmem:[%s7516_s3 + $0x54c] ss:$16 sps:$4 sm:$0xff]  }
 0x63b   :  { %3609 = vmatprep.subr.bf16.mxu1 %v5247_v43  ;;  %3773 = vmatprep.subr.bf16.mxu0 %v5250_v36  ;;  %v5323_v43 = vld [vmem:[%s7516_s3 + $0x540] ss:$16 sps:$4 sm:$0xff]   ;;  %v5326_v36 = vld [vmem:[%s7516_s3 + $0x548] ss:$16 sps:$4 sm:$0xff]  }
 0x63e   :  { %3610 = vmatpush1.bf16.msra.mxu1 %v5245_v60  ;;  %3774 = vmatpush1.bf16.msra.mxu0 %v5248_v31  ;;  %v5331_v60 = vld [vmem:[%s7516_s3 + $0x564] ss:$16 sps:$4 sm:$0xff]   ;;  %v5334_v31 = vld [vmem:[%s7516_s3 + $0x56c] ss:$16 sps:$4 sm:$0xff]  }
 0x63f   :  { %3611 = vmatprep.subr.bf16.mxu1 %v5253_v18  ;;  %3775 = vmatprep.subr.bf16.mxu0 %v5256_v17  ;;  %v5329_v18 = vld [vmem:[%s7516_s3 + $0x560] ss:$16 sps:$4 sm:$0xff]   ;;  %v5332_v17 = vld [vmem:[%s7516_s3 + $0x568] ss:$16 sps:$4 sm:$0xff]  }
 0x642   :  { %3612 = vmatpush1.bf16.msra.mxu1 %v5251_v48  ;;  %3776 = vmatpush1.bf16.msra.mxu0 %v5254_v29  ;;  %v5337_v48 = vld [vmem:[%s7516_s3 + $0x584] ss:$16 sps:$4 sm:$0xff]   ;;  %v5340_v29 = vld [vmem:[%s7516_s3 + $0x58c] ss:$16 sps:$4 sm:$0xff]  }
 0x643   :  { %3613 = vmatprep.subr.bf16.mxu1 %v5259_v32  ;;  %3777 = vmatprep.subr.bf16.mxu0 %v5262_v14  ;;  %v5335_v32 = vld [vmem:[%s7516_s3 + $0x580] ss:$16 sps:$4 sm:$0xff]   ;;  %v5338_v14 = vld [vmem:[%s7516_s3 + $0x588] ss:$16 sps:$4 sm:$0xff]  }
 0x646   :  { %3614 = vmatpush1.bf16.msra.mxu1 %v5257_v30  ;;  %3778 = vmatpush1.bf16.msra.mxu0 %v5260_v63  ;;  %v5343_v30 = vld [vmem:[%s7516_s3 + $0x5a4] ss:$16 sps:$4 sm:$0xff]   ;;  %v5346_v63 = vld [vmem:[%s7516_s3 + $0x5ac] ss:$16 sps:$4 sm:$0xff]  }
 0x647   :  { %3624 = vmatprep.subr.bf16.mxu1 %v5265_v47  ;;  %3788 = vmatprep.subr.bf16.mxu0 %v5268_v57  ;;  %v5341_v47 = vld [vmem:[%s7516_s3 + $0x5a0] ss:$16 sps:$4 sm:$0xff]   ;;  %v5344_v57 = vld [vmem:[%s7516_s3 + $0x5a8] ss:$16 sps:$4 sm:$0xff]  }
 0x649   :  { %3616 = vmatmul.mubr.bf16.vlgmr.msra.gmra.mrb[84].mxu1 %v2256_v46  ;;  %3780 = vmatmul.mubr.bf16.vlgmr.msra.gmra.mrb[32].mxu0 %v2256_v46  ;;  %v5349_v46 = vld [vmem:[%s7516_s3 + $0x5c4] ss:$16 sps:$4 sm:$0xff]  }
 0x64a   :  { %3625 = vmatpush1.bf16.msra.mxu1 %v5263_v12  ;;  %3789 = vmatpush1.bf16.msra.mxu0 %v5266_v15  ;;  %v5352_v12 = vld [vmem:[%s7516_s3 + $0x5cc] ss:$16 sps:$4 sm:$0xff]   ;;  %v5347_v15 = vld [vmem:[%s7516_s3 + $0x5c0] ss:$16 sps:$4 sm:$0xff]  }
 0x64b   :  { %3626 = vmatprep.subr.bf16.mxu1 %v5271_v45  ;;  %3790 = vmatprep.subr.bf16.mxu0 %v5274_v16  ;;  %v5350_v45 = vld [vmem:[%s7516_s3 + $0x5c8] ss:$16 sps:$4 sm:$0xff]   ;;  %v5355_v16 = vld [vmem:[%s7516_s3 + $0x5e4] ss:$16 sps:$4 sm:$0xff]  }
 0x64c   :  { %3656 = vmatprep.mubr.bf16.mxu1 %v2259_v6  ;;  %3820 = vmatprep.mubr.bf16.mxu0 %v2259_v6  ;;  %v5358_v6 = vld [vmem:[%s7516_s3 + $0x5ec] ss:$16 sps:$4 sm:$0xff]  }
 0x64e   :  { %3627 = vmatpush1.bf16.msra.mxu1 %v5269_v8  ;;  %3791 = vmatpush1.bf16.msra.mxu0 %v5272_v11  ;;  %v5353_v8 = vld [vmem:[%s7516_s3 + $0x5e0] ss:$16 sps:$4 sm:$0xff]   ;;  %v5356_v11 = vld [vmem:[%s7516_s3 + $0x5e8] ss:$16 sps:$4 sm:$0xff]  }
 0x64f   :  { %3628 = vmatprep.subr.bf16.mxu1 %v5277_v19  ;;  %3792 = vmatprep.subr.bf16.mxu0 %v5280_v22  ;;  %v5361_v19 = vld [vmem:[%s7516_s3 + $0x604] ss:$16 sps:$4 sm:$0xff]   ;;  %v5364_v22 = vld [vmem:[%s7516_s3 + $0x60c] ss:$16 sps:$4 sm:$0xff]  }
 0x652   :  { %3629 = vmatpush1.bf16.msra.mxu1 %v5275_v38  ;;  %3793 = vmatpush1.bf16.msra.mxu0 %v5278_v4  ;;  %v2258_v38 = vpack.c.bf16 %v6859_v10, %v6859_v10  ;;  %v5359_v4 = vld [vmem:[%s7516_s3 + $0x600] ss:$16 sps:$4 sm:$0xff]   ;;  %v5370_v10 = vld [vmem:[%s7516_s3 + $0x62c] ss:$16 sps:$4 sm:$0xff]  }
 0x653   :  { %3630 = vmatprep.subr.bf16.mxu1 %v5283_v35  ;;  %3794 = vmatprep.subr.bf16.mxu0 %v5286_v42  ;;  %v5362_v35 = vld [vmem:[%s7516_s3 + $0x608] ss:$16 sps:$4 sm:$0xff]   ;;  %v5367_v42 = vld [vmem:[%s7516_s3 + $0x624] ss:$16 sps:$4 sm:$0xff]  }
 0x656   :  { %3631 = vmatpush1.bf16.msra.mxu1 %v5281_v51  ;;  %3795 = vmatpush1.bf16.msra.mxu0 %v5284_v13  ;;  %v2261_v51 = vpack.c.bf16 %v6889_v49, %v6889_v49  ;;  %v5365_v13 = vld [vmem:[%s7516_s3 + $0x620] ss:$16 sps:$4 sm:$0xff]   ;;  %v5376_v49 = vld [vmem:[%s7516_s3 + $0x64c] ss:$16 sps:$4 sm:$0xff]  }
 0x657   :  { %3632 = vmatprep.subr.bf16.mxu1 %v5289_v23  ;;  %3796 = vmatprep.subr.bf16.mxu0 %v5292_v20  ;;  %v5368_v23 = vld [vmem:[%s7516_s3 + $0x628] ss:$16 sps:$4 sm:$0xff]   ;;  %v5373_v20 = vld [vmem:[%s7516_s3 + $0x644] ss:$16 sps:$4 sm:$0xff]  }
 0x65a   :  { %3633 = vmatpush1.bf16.msra.mxu1 %v5287_v56  ;;  %3797 = vmatpush1.bf16.msra.mxu0 %v5290_v54  ;;  %v5371_v56 = vld [vmem:[%s7516_s3 + $0x640] ss:$16 sps:$4 sm:$0xff]   ;;  %v5374_v54 = vld [vmem:[%s7516_s3 + $0x648] ss:$16 sps:$4 sm:$0xff]  }
 0x65b   :  { %3634 = vmatprep.subr.bf16.mxu1 %v5295_v37  ;;  %3798 = vmatprep.subr.bf16.mxu0 %v5298_v1  ;;  %v5379_v37 = vld [vmem:[%s7516_s3 + $0x664] ss:$16 sps:$4 sm:$0xff]   ;;  %v5382_v1 = vld [vmem:[%s7516_s3 + $0x66c] ss:$16 sps:$4 sm:$0xff]  }
 0x65e   :  { %3635 = vmatpush1.bf16.msra.mxu1 %v5293_v34  ;;  %3799 = vmatpush1.bf16.msra.mxu0 %v5296_v39  ;;  %v5377_v34 = vld [vmem:[%s7516_s3 + $0x660] ss:$16 sps:$4 sm:$0xff]   ;;  %v5380_v39 = vld [vmem:[%s7516_s3 + $0x668] ss:$16 sps:$4 sm:$0xff]  }
 0x65f   :  { %3636 = vmatprep.subr.bf16.mxu1 %v5301_v2  ;;  %3800 = vmatprep.subr.bf16.mxu0 %v5304_v5  ;;  %v5385_v2 = vld [vmem:[%s7516_s3 + $0x684] ss:$16 sps:$4 sm:$0xff]   ;;  %v5388_v5 = vld [vmem:[%s7516_s3 + $0x68c] ss:$16 sps:$4 sm:$0xff]  }
 0x662   :  { %3637 = vmatpush1.bf16.msra.mxu1 %v5299_v25  ;;  %3801 = vmatpush1.bf16.msra.mxu0 %v5302_v28  ;;  %v5383_v25 = vld [vmem:[%s7516_s3 + $0x680] ss:$16 sps:$4 sm:$0xff]   ;;  %v5386_v28 = vld [vmem:[%s7516_s3 + $0x688] ss:$16 sps:$4 sm:$0xff]  }
 0x663   :  { %3638 = vmatprep.subr.bf16.mxu1 %v5307_v7  ;;  %3802 = vmatprep.subr.bf16.mxu0 %v5310_v9  ;;  %v5391_v7 = vld [vmem:[%s7516_s3 + $0x6a4] ss:$16 sps:$4 sm:$0xff]   ;;  %v5394_v9 = vld [vmem:[%s7516_s3 + $0x6ac] ss:$16 sps:$4 sm:$0xff]  }
 0x666   :  { %3639 = vmatpush1.bf16.msra.mxu1 %v5305_v53  ;;  %3803 = vmatpush1.bf16.msra.mxu0 %v5308_v59  ;;  %v5389_v53 = vld [vmem:[%s7516_s3 + $0x6a0] ss:$16 sps:$4 sm:$0xff]   ;;  %v5392_v59 = vld [vmem:[%s7516_s3 + $0x6a8] ss:$16 sps:$4 sm:$0xff]  }
 0x667   :  { %3640 = vmatprep.subr.bf16.mxu1 %v5313_v61  ;;  %3804 = vmatprep.subr.bf16.mxu0 %v5316_v0  ;;  %v5397_v61 = vld [vmem:[%s7516_s3 + $0x6c4] ss:$16 sps:$4 sm:$0xff]   ;;  %v5400_v0 = vld [vmem:[%s7516_s3 + $0x6cc] ss:$16 sps:$4 sm:$0xff]  }
 0x66a   :  { %3641 = vmatpush1.bf16.msra.mxu1 %v5311_v62  ;;  %3805 = vmatpush1.bf16.msra.mxu0 %v5314_v52  ;;  %v5395_v62 = vld [vmem:[%s7516_s3 + $0x6c0] ss:$16 sps:$4 sm:$0xff]   ;;  %v5398_v52 = vld [vmem:[%s7516_s3 + $0x6c8] ss:$16 sps:$4 sm:$0xff]  }
 0x66b   :  { %3642 = vmatprep.subr.bf16.mxu1 %v5319_v27  ;;  %3806 = vmatprep.subr.bf16.mxu0 %v5322_v33  ;;  %v5403_v27 = vld [vmem:[%s7516_s3 + $0x6e4] ss:$16 sps:$4 sm:$0xff]   ;;  %v5406_v33 = vld [vmem:[%s7516_s3 + $0x6ec] ss:$16 sps:$4 sm:$0xff]  }
 0x66e   :  { %3643 = vmatpush1.bf16.msra.mxu1 %v5317_v40  ;;  %3807 = vmatpush1.bf16.msra.mxu0 %v5320_v58  ;;  %v5401_v40 = vld [vmem:[%s7516_s3 + $0x6e0] ss:$16 sps:$4 sm:$0xff]   ;;  %v5404_v58 = vld [vmem:[%s7516_s3 + $0x6e8] ss:$16 sps:$4 sm:$0xff]  }
 0x66f   :  { %3644 = vmatprep.subr.bf16.mxu1 %v5325_v41  ;;  %3808 = vmatprep.subr.bf16.mxu0 %v5328_v24  ;;  %v5409_v41 = vld [vmem:[%s7516_s3 + $0x704] ss:$16 sps:$4 sm:$0xff]   ;;  %v5412_v24 = vld [vmem:[%s7516_s3 + $0x70c] ss:$16 sps:$4 sm:$0xff]  }
 0x672   :  { %3645 = vmatpush1.bf16.msra.mxu1 %v5323_v43  ;;  %3809 = vmatpush1.bf16.msra.mxu0 %v5326_v36  ;;  %v5407_v43 = vld [vmem:[%s7516_s3 + $0x700] ss:$16 sps:$4 sm:$0xff]   ;;  %v5410_v36 = vld [vmem:[%s7516_s3 + $0x708] ss:$16 sps:$4 sm:$0xff]  }
 0x673   :  { %3646 = vmatprep.subr.bf16.mxu1 %v5331_v60  ;;  %3810 = vmatprep.subr.bf16.mxu0 %v5334_v31  ;;  %v5415_v60 = vld [vmem:[%s7516_s3 + $0x724] ss:$16 sps:$4 sm:$0xff]   ;;  %v5418_v31 = vld [vmem:[%s7516_s3 + $0x72c] ss:$16 sps:$4 sm:$0xff]  }
 0x676   :  { %3647 = vmatpush1.bf16.msra.mxu1 %v5329_v18  ;;  %3811 = vmatpush1.bf16.msra.mxu0 %v5332_v17  ;;  %v5413_v18 = vld [vmem:[%s7516_s3 + $0x720] ss:$16 sps:$4 sm:$0xff]   ;;  %v5416_v17 = vld [vmem:[%s7516_s3 + $0x728] ss:$16 sps:$4 sm:$0xff]  }
 0x677   :  { %3648 = vmatprep.subr.bf16.mxu1 %v5337_v48  ;;  %3812 = vmatprep.subr.bf16.mxu0 %v5340_v29  ;;  %v5421_v48 = vld [vmem:[%s7516_s3 + $0x744] ss:$16 sps:$4 sm:$0xff]   ;;  %v5424_v29 = vld [vmem:[%s7516_s3 + $0x74c] ss:$16 sps:$4 sm:$0xff]  }
 0x67a   :  { %3649 = vmatpush1.bf16.msra.mxu1 %v5335_v32  ;;  %3813 = vmatpush1.bf16.msra.mxu0 %v5338_v14  ;;  %v5419_v32 = vld [vmem:[%s7516_s3 + $0x740] ss:$16 sps:$4 sm:$0xff]   ;;  %v5422_v14 = vld [vmem:[%s7516_s3 + $0x748] ss:$16 sps:$4 sm:$0xff]  }
 0x67b   :  { %3650 = vmatprep.subr.bf16.mxu1 %v5343_v30  ;;  %3814 = vmatprep.subr.bf16.mxu0 %v5346_v63  ;;  %v5427_v30 = vld [vmem:[%s7516_s3 + $0x764] ss:$16 sps:$4 sm:$0xff]   ;;  %v5430_v63 = vld [vmem:[%s7516_s3 + $0x76c] ss:$16 sps:$4 sm:$0xff]  }
 0x67e   :  { %3651 = vmatpush1.bf16.msra.mxu1 %v5341_v47  ;;  %3815 = vmatpush1.bf16.msra.mxu0 %v5344_v57  ;;  %v5425_v47 = vld [vmem:[%s7516_s3 + $0x760] ss:$16 sps:$4 sm:$0xff]   ;;  %v5428_v57 = vld [vmem:[%s7516_s3 + $0x768] ss:$16 sps:$4 sm:$0xff]  }
 0x67f   :  { %3652 = vmatprep.subr.bf16.mxu1 %v5349_v46  ;;  %3816 = vmatprep.subr.bf16.mxu0 %v5352_v12  ;;  %v5433_v46 = vld [vmem:[%s7516_s3 + $0x784] ss:$16 sps:$4 sm:$0xff]   ;;  %v5436_v12 = vld [vmem:[%s7516_s3 + $0x78c] ss:$16 sps:$4 sm:$0xff]  }
 0x682   :  { %3653 = vmatpush1.bf16.msra.mxu1 %v5347_v15  ;;  %3817 = vmatpush1.bf16.msra.mxu0 %v5350_v45  ;;  %v5431_v15 = vld [vmem:[%s7516_s3 + $0x780] ss:$16 sps:$4 sm:$0xff]   ;;  %v5434_v45 = vld [vmem:[%s7516_s3 + $0x788] ss:$16 sps:$4 sm:$0xff]  }
 0x683   :  { %3654 = vmatprep.subr.bf16.mxu1 %v5355_v16  ;;  %3818 = vmatprep.subr.bf16.mxu0 %v5358_v6  ;;  %v5439_v16 = vld [vmem:[%s7516_s3 + $0x7a4] ss:$16 sps:$4 sm:$0xff]   ;;  %v5442_v6 = vld [vmem:[%s7516_s3 + $0x7ac] ss:$16 sps:$4 sm:$0xff]  }
 0x686   :  { %3655 = vmatpush1.bf16.msra.mxu1 %v5353_v8  ;;  %3819 = vmatpush1.bf16.msra.mxu0 %v5356_v11  ;;  %v5437_v8 = vld [vmem:[%s7516_s3 + $0x7a0] ss:$16 sps:$4 sm:$0xff]   ;;  %v5440_v11 = vld [vmem:[%s7516_s3 + $0x7a8] ss:$16 sps:$4 sm:$0xff]  }
 0x687   :  { %3665 = vmatprep.subr.bf16.mxu1 %v5361_v19  ;;  %3829 = vmatprep.subr.bf16.mxu0 %v5364_v22  ;;  %v5445_v19 = vld [vmem:[%s7516_s3 + $0x7c4] ss:$16 sps:$4 sm:$0xff]   ;;  %v5448_v22 = vld [vmem:[%s7516_s3 + $0x7cc] ss:$16 sps:$4 sm:$0xff]  }
 0x689   :  { %3657 = vmatmul.mubr.bf16.vlgmr.msra.gmra.mrb[84].mxu1 %v2258_v38  ;;  %3821 = vmatmul.mubr.bf16.vlgmr.msra.gmra.mrb[32].mxu0 %v2258_v38  ;;  %v5443_v38 = vld [vmem:[%s7516_s3 + $0x7c0] ss:$16 sps:$4 sm:$0xff]  }
 0x68a   :  { %3666 = vmatpush1.bf16.msra.mxu1 %v5359_v4  ;;  %3830 = vmatpush1.bf16.msra.mxu0 %v5362_v35  ;;  %v5446_v4 = vld [vmem:[%s7516_s3 + $0x7c8] ss:$16 sps:$4 sm:$0xff]   ;;  %v5451_v35 = vld [vmem:[%s7516_s3 + $0x7e4] ss:$16 sps:$4 sm:$0xff]  }
 0x68b   :  { %3667 = vmatprep.subr.bf16.mxu1 %v5367_v42  ;;  %3831 = vmatprep.subr.bf16.mxu0 %v5370_v10  ;;  %v5454_v42 = vld [vmem:[%s7516_s3 + $0x7ec] ss:$16 sps:$4 sm:$0xff]   ;;  %v5449_v10 = vld [vmem:[%s7516_s3 + $0x7e0] ss:$16 sps:$4 sm:$0xff]  }
 0x68c   :  { %3697 = vmatprep.mubr.bf16.mxu1 %v2261_v51  ;;  %3861 = vmatprep.mubr.bf16.mxu0 %v2261_v51  ;;  %v5452_v51 = vld [vmem:[%s7516_s3 + $0x7e8] ss:$16 sps:$4 sm:$0xff]  }
 0x68e   :  { %3668 = vmatpush1.bf16.msra.mxu1 %v5365_v13  ;;  %3832 = vmatpush1.bf16.msra.mxu0 %v5368_v23  ;;  %v2260_v13 = vpack.c.bf16 %v6887_v44, %v6887_v44 }
 0x68f   :  { %3669 = vmatprep.subr.bf16.mxu1 %v5373_v20  ;;  %3833 = vmatprep.subr.bf16.mxu0 %v5376_v49 }
 0x692   :  { %3670 = vmatpush1.bf16.msra.mxu1 %v5371_v56  ;;  %3834 = vmatpush1.bf16.msra.mxu0 %v5374_v54 }
 0x693   :  { %3671 = vmatprep.subr.bf16.mxu1 %v5379_v37  ;;  %3835 = vmatprep.subr.bf16.mxu0 %v5382_v1 }
 0x696   :  { %3672 = vmatpush1.bf16.msra.mxu1 %v5377_v34  ;;  %3836 = vmatpush1.bf16.msra.mxu0 %v5380_v39 }
 0x697   :  { %3673 = vmatprep.subr.bf16.mxu1 %v5385_v2  ;;  %3837 = vmatprep.subr.bf16.mxu0 %v5388_v5 }
 0x69a   :  { %3674 = vmatpush1.bf16.msra.mxu1 %v5383_v25  ;;  %3838 = vmatpush1.bf16.msra.mxu0 %v5386_v28 }
 0x69b   :  { %3675 = vmatprep.subr.bf16.mxu1 %v5391_v7  ;;  %3839 = vmatprep.subr.bf16.mxu0 %v5394_v9 }
 0x69e   :  { %3676 = vmatpush1.bf16.msra.mxu1 %v5389_v53  ;;  %3840 = vmatpush1.bf16.msra.mxu0 %v5392_v59 }
 0x69f   :  { %3677 = vmatprep.subr.bf16.mxu1 %v5397_v61  ;;  %3841 = vmatprep.subr.bf16.mxu0 %v5400_v0 }
 0x6a2   :  { %3678 = vmatpush1.bf16.msra.mxu1 %v5395_v62  ;;  %3842 = vmatpush1.bf16.msra.mxu0 %v5398_v52 }
 0x6a3   :  { %3679 = vmatprep.subr.bf16.mxu1 %v5403_v27  ;;  %3843 = vmatprep.subr.bf16.mxu0 %v5406_v33 }
 0x6a6   :  { %3680 = vmatpush1.bf16.msra.mxu1 %v5401_v40  ;;  %3844 = vmatpush1.bf16.msra.mxu0 %v5404_v58 }
 0x6a7   :  { %3681 = vmatprep.subr.bf16.mxu1 %v5409_v41  ;;  %3845 = vmatprep.subr.bf16.mxu0 %v5412_v24 }
 0x6aa   :  { %3682 = vmatpush1.bf16.msra.mxu1 %v5407_v43  ;;  %3846 = vmatpush1.bf16.msra.mxu0 %v5410_v36 }
 0x6ab   :  { %3683 = vmatprep.subr.bf16.mxu1 %v5415_v60  ;;  %3847 = vmatprep.subr.bf16.mxu0 %v5418_v31 }
 0x6ae   :  { %3684 = vmatpush1.bf16.msra.mxu1 %v5413_v18  ;;  %3848 = vmatpush1.bf16.msra.mxu0 %v5416_v17 }
 0x6af   :  { %3685 = vmatprep.subr.bf16.mxu1 %v5421_v48  ;;  %3849 = vmatprep.subr.bf16.mxu0 %v5424_v29 }
 0x6b2   :  { %3686 = vmatpush1.bf16.msra.mxu1 %v5419_v32  ;;  %3850 = vmatpush1.bf16.msra.mxu0 %v5422_v14 }
 0x6b3   :  { %3687 = vmatprep.subr.bf16.mxu1 %v5427_v30  ;;  %3851 = vmatprep.subr.bf16.mxu0 %v5430_v63 }
 0x6b6   :  { %3688 = vmatpush1.bf16.msra.mxu1 %v5425_v47  ;;  %3852 = vmatpush1.bf16.msra.mxu0 %v5428_v57 }
 0x6b7   :  { %3689 = vmatprep.subr.bf16.mxu1 %v5433_v46  ;;  %3853 = vmatprep.subr.bf16.mxu0 %v5436_v12 }
 0x6ba   :  { %3690 = vmatpush1.bf16.msra.mxu1 %v5431_v15  ;;  %3854 = vmatpush1.bf16.msra.mxu0 %v5434_v45 }
 0x6bb   :  { %3691 = vmatprep.subr.bf16.mxu1 %v5439_v16  ;;  %3855 = vmatprep.subr.bf16.mxu0 %v5442_v6 }
 0x6be   :  { %3692 = vmatpush1.bf16.msra.mxu1 %v5437_v8  ;;  %3856 = vmatpush1.bf16.msra.mxu0 %v5440_v11 }
 0x6bf   :  { %3693 = vmatprep.subr.bf16.mxu1 %v5445_v19  ;;  %3857 = vmatprep.subr.bf16.mxu0 %v5448_v22 }
 0x6c2   :  { %3694 = vmatpush1.bf16.msra.mxu1 %v5443_v38  ;;  %3858 = vmatpush1.bf16.msra.mxu0 %v5446_v4 }
 0x6c3   :  { %3695 = vmatprep.subr.bf16.mxu1 %v5451_v35  ;;  %3859 = vmatprep.subr.bf16.mxu0 %v5454_v42 }
 0x6c6   :  { %3696 = vmatpush1.bf16.msra.mxu1 %v5449_v10  ;;  %3860 = vmatpush1.bf16.msra.mxu0 %v5452_v51 }
 0x6c9   :  { %3698 = vmatmul.mubr.bf16.vlgmr.msra.gmra.mrb[84].mxu1 %v2260_v13  ;;  %3862 = vmatmul.mubr.bf16.vlgmr.msra.gmra.mrb[32].mxu0 %v2260_v13 }
 0x79c   :  { %v7399_v23 = vpop.f32.mrb[84].mxu1  ;;  %v7401_v20 = vpop.f32.mrb[32].mxu0 }
 0x79d   :  { %v3871_v49 = vsel %vm3870_vm4, %v7399_v23, 0.0  ;;  %v4000_v56 = vrot.slane %v7399_v23, 2  ;;  %v3885_v54 = vsel %vm3870_vm4, %v7401_v20, 0.0  ;;  %v4002_v37 = vrot.slane %v7401_v20, 2  ;;  %v7409_v1 = vpop.f32.mrb[85].mxu1  ;;  %v7411_v44 = vpop.f32.mrb[33].mxu0 }
 0x79e   :  { %v3872_v34 = vrot.slane %v3871_v49, 4  ;;  %v3886_v39 = vrot.slane %v3885_v54, 4  ;;  %v3878_v2 = vsel %vm3870_vm4, %v7409_v1, 0.0  ;;  %v4001_v5 = vrot.slane %v7409_v1, 2  ;;  %v3703_v25 = vpop.f32.mrb[86].mxu1  ;;  %v3867_v28 = vpop.f32.mrb[34].mxu0 }
 0x79f   :  { %v4008_v7 = vsel %vm3870_vm4, %v4000_v56, 0.0  ;;  %v4022_v9 = vsel %vm3870_vm4, %v4002_v37, 0.0  ;;  %v3879_v53 = vrot.slane %v3878_v2, 4  ;;  %v3892_v59 = vsel %vm3870_vm4, %v7411_v44, 0.0  ;;  %v3704_v61 = vpop.f32.mrb[87].mxu1  ;;  %v3868_v0 = vpop.f32.mrb[35].mxu0 }
 0x7a0   :  { %v3873_v62 = vadd.f32 %v3872_v34, %v3871_v49  ;;  %v4009_v52 = vrot.slane %v4008_v7, 4  ;;  %v3887_v27 = vadd.f32 %v3886_v39, %v3885_v54  ;;  %v4023_v33 = vrot.slane %v4022_v9, 4 }
 0x7a1   :  { %v3880_v40 = vadd.f32 %v3879_v53, %v3878_v2  ;;  %v4015_v58 = vsel %vm3870_vm4, %v4001_v5, 0.0  ;;  %v3893_v41 = vrot.slane %v3892_v59, 4  ;;  %v4003_v24 = vrot.slane %v7411_v44, 2 }
 0x7a2   :  { %v3874_v43 = vrot.slane %v3873_v62, 2  ;;  %v4010_v36 = vadd.f32 %v4009_v52, %v4008_v7  ;;  %v3888_v60 = vrot.slane %v3887_v27, 2  ;;  %v4024_v31 = vadd.f32 %v4023_v33, %v4022_v9 }
 0x7a3   :  { %v3881_v18 = vrot.slane %v3880_v40, 2  ;;  %v4016_v17 = vrot.slane %v4015_v58, 4  ;;  %v3894_v48 = vadd.f32 %v3893_v41, %v3892_v59  ;;  %v4029_v29 = vsel %vm3870_vm4, %v4003_v24, 0.0 }
 0x7a4   :  { %v3875_v32 = vadd.f32 %v3874_v43, %v3873_v62  ;;  %v4011_v14 = vrot.slane %v4010_v36, 2  ;;  %v3889_v30 = vadd.f32 %v3888_v60, %v3887_v27  ;;  %v4025_v63 = vrot.slane %v4024_v31, 2 }
 0x7a5   :  { %v3882_v47 = vadd.f32 %v3881_v18, %v3880_v40  ;;  %v4017_v57 = vadd.f32 %v4016_v17, %v4015_v58  ;;  %v3895_v46 = vrot.slane %v3894_v48, 2  ;;  %v4030_v12 = vrot.slane %v4029_v29, 4 }
 0x7a6   :  { %v3876_v15 = vrot.slane %v3875_v32, 1  ;;  %v4012_v45 = vadd.f32 %v4011_v14, %v4010_v36  ;;  %v3890_v16 = vrot.slane %v3889_v30, 1  ;;  %v4026_v6 = vadd.f32 %v4025_v63, %v4024_v31 }
 0x7a7   :  { %v3883_v8 = vrot.slane %v3882_v47, 1  ;;  %v4018_v11 = vrot.slane %v4017_v57, 2  ;;  %v3896_v19 = vadd.f32 %v3895_v46, %v3894_v48  ;;  %v4031_v22 = vadd.f32 %v4030_v12, %v4029_v29 }
 0x7a8   :  { %v3877_v38 = vadd.f32 %v3876_v15, %v3875_v32  ;;  %v4013_v4 = vrot.slane %v4012_v45, 1  ;;  %v3891_v35 = vadd.f32 %v3890_v16, %v3889_v30  ;;  %v4027_v42 = vrot.slane %v4026_v6, 1 }
 0x7a9   :  { %v3884_v10 = vadd.f32 %v3883_v8, %v3882_v47  ;;  %v4019_v51 = vadd.f32 %v4018_v11, %v4017_v57  ;;  %v3897_v13 = vrot.slane %v3896_v19, 1  ;;  %v4032_v49 = vrot.slane %v4031_v22, 2 }
 0x7aa   :  { %v3900_v56 = vmul.f32 0.5, %v3877_v38  ;;  %v4014_v54 = vadd.f32 %v4013_v4, %v4012_v45  ;;  %v3902_v37 = vmul.f32 0.5, %v3891_v35  ;;  %v4028_v34 = vadd.f32 %v4027_v42, %v4026_v6 }
 0x7ab   :  { %v3901_v39 = vmul.f32 0.5, %v3884_v10  ;;  %v4020_v2 = vrot.slane %v4019_v51, 1  ;;  %v3898_v5 = vadd.f32 %v3897_v13, %v3896_v19  ;;  %v4033_v25 = vadd.f32 %v4032_v49, %v4031_v22 }
 0x7ac   :  { %v7424_v28 = vsub.f32 %v7399_v23, %v3900_v56  ;;  %v4036_v7 = vmul.f32 0.5, %v4014_v54  ;;  %v7427_v9 = vsub.f32 %v7401_v20, %v3902_v37  ;;  %v4038_v53 = vmul.f32 0.5, %v4028_v34 }
 0x7ad   :  { %v7430_v59 = vsub.f32 %v7409_v1, %v3901_v39  ;;  %v4021_v61 = vadd.f32 %v4020_v2, %v4019_v51  ;;  %v3903_v0 = vmul.f32 0.5, %v3898_v5  ;;  %v4034_v62 = vrot.slane %v4033_v25, 1 }
 0x7ae   :  { %v3908_v52 = vmul.f32 %v7424_v28, %v7424_v28  ;;  %v7435_v27 = vsub.f32 %v7399_v23, %v4036_v7  ;;  %v3910_v33 = vmul.f32 %v7427_v9, %v7427_v9  ;;  %v7440_v40 = vsub.f32 %v7401_v20, %v4038_v53 }
 0x7af   :  { %v3909_v58 = vmul.f32 %v7430_v59, %v7430_v59  ;;  %v4037_v41 = vmul.f32 0.5, %v4021_v61  ;;  %v7445_v24 = vsub.f32 %v7411_v44, %v3903_v0  ;;  %v4035_v43 = vadd.f32 %v4034_v62, %v4033_v25 }
 0x7b0   :  { %v3912_v36 = vsel %vm3870_vm4, %v3908_v52, 0.0  ;;  %v4044_v23 = vmul.f32 %v7435_v27, %v7435_v27  ;;  %v3926_v60 = vsel %vm3870_vm4, %v3910_v33, 0.0  ;;  %v4046_v31 = vmul.f32 %v7440_v40, %v7440_v40 }
 0x7b1   :  { %v3913_v20 = vrot.slane %v3912_v36, 4  ;;  %v3927_v18 = vrot.slane %v3926_v60, 4  ;;  %v3919_v17 = vsel %vm3870_vm4, %v3909_v58, 0.0  ;;  %v7455_v48 = vsub.f32 %v7409_v1, %v4037_v41 }
 0x7b2   :  { %v4052_v29 = vrot.slane %v4044_v23, 2  ;;  %v4054_v32 = vrot.slane %v4046_v31, 2  ;;  %v3920_v14 = vrot.slane %v3919_v17, 4  ;;  %v3911_v30 = vmul.f32 %v7445_v24, %v7445_v24 }
 0x7b3   :  { %v3914_v63 = vadd.f32 %v3913_v20, %v3912_v36  ;;  %v3928_v47 = vadd.f32 %v3927_v18, %v3926_v60  ;;  %v4045_v57 = vmul.f32 %v7455_v48, %v7455_v48  ;;  %v4039_v46 = vmul.f32 0.5, %v4035_v43 }
 0x7b4   :  { %v4060_v12 = vsel %vm3870_vm4, %v4052_v29, 0.0  ;;  %v4074_v15 = vsel %vm3870_vm4, %v4054_v32, 0.0  ;;  %v3921_v45 = vadd.f32 %v3920_v14, %v3919_v17  ;;  %v3933_v1 = vsel %vm3870_vm4, %v3911_v30, 0.0 }
 0x7b5   :  { %v3915_v16 = vrot.slane %v3914_v63, 2  ;;  %v4061_v6 = vrot.slane %v4060_v12, 4  ;;  %v3929_v8 = vrot.slane %v3928_v47, 2  ;;  %v4075_v11 = vrot.slane %v4074_v15, 4 }
 0x7b6   :  { %v3922_v19 = vrot.slane %v3921_v45, 2  ;;  %v4053_v22 = vrot.slane %v4045_v57, 2  ;;  %v3934_v38 = vrot.slane %v3933_v1, 4  ;;  %v7465_v4 = vsub.f32 %v7411_v44, %v4039_v46 }
 0x7b7   :  { %v3916_v35 = vadd.f32 %v3915_v16, %v3914_v63  ;;  %v4062_v42 = vadd.f32 %v4061_v6, %v4060_v12  ;;  %v3930_v10 = vadd.f32 %v3929_v8, %v3928_v47  ;;  %v4076_v51 = vadd.f32 %v4075_v11, %v4074_v15 }
 0x7b8   :  { %v3923_v13 = vadd.f32 %v3922_v19, %v3921_v45  ;;  %v4067_v49 = vsel %vm3870_vm4, %v4053_v22, 0.0  ;;  %v3935_v56 = vadd.f32 %v3934_v38, %v3933_v1  ;;  %v4047_v54 = vmul.f32 %v7465_v4, %v7465_v4 }
 0x7b9   :  { %v3917_v37 = vrot.slane %v3916_v35, 1  ;;  %v4063_v34 = vrot.slane %v4062_v42, 2  ;;  %v3931_v39 = vrot.slane %v3930_v10, 1  ;;  %v4077_v2 = vrot.slane %v4076_v51, 2 }
 0x7ba   :  { %v3924_v5 = vrot.slane %v3923_v13, 1  ;;  %v4068_v25 = vrot.slane %v4067_v49, 4  ;;  %v3936_v7 = vrot.slane %v3935_v56, 2  ;;  %v4055_v44 = vrot.slane %v4047_v54, 2 }
 0x7bb   :  { %v3918_v53 = vadd.f32 %v3917_v37, %v3916_v35  ;;  %v4064_v61 = vadd.f32 %v4063_v34, %v4062_v42  ;;  %v3932_v0 = vadd.f32 %v3931_v39, %v3930_v10  ;;  %v4078_v62 = vadd.f32 %v4077_v2, %v4076_v51  ;;  %v5484_v39 = vld [vmem:[%s7515_s5] sm:$0x3f] }
 0x7bc   :  { %v3925_v52 = vadd.f32 %v3924_v5, %v3923_v13  ;;  %v4069_v33 = vadd.f32 %v4068_v25, %v4067_v49  ;;  %v3937_v58 = vadd.f32 %v3936_v7, %v3935_v56  ;;  %v4081_v41 = vsel %vm3870_vm4, %v4055_v44, 0.0  ;;  %v411_v13 = vld [vmem:[%s7515_s5 + $0x10] sm:$0x3f] }
 0x7bd   :  { %v3940_v43 = vmul.f32 0.5, %v3918_v53  ;;  %v4065_v36 = vrot.slane %v4064_v61, 1  ;;  %v3942_v23 = vmul.f32 0.5, %v3932_v0  ;;  %v4079_v60 = vrot.slane %v4078_v62, 1 }
 0x7be   :  { %v3941_v31 = vmul.f32 0.5, %v3925_v52  ;;  %v4070_v20 = vrot.slane %v4069_v33, 2  ;;  %v3938_v18 = vrot.slane %v3937_v58, 1  ;;  %v4082_v17 = vrot.slane %v4081_v41, 4 }
 0x7bf   :  { %v3944_v29 = vadd.f32 1e-05, %v3940_v43  ;;  %v4066_v32 = vadd.f32 %v4065_v36, %v4064_v61  ;;  %v3946_v14 = vadd.f32 1e-05, %v3942_v23  ;;  %v4080_v30 = vadd.f32 %v4079_v60, %v4078_v62 }
 0x7c0   :  { %v3945_v63 = vadd.f32 1e-05, %v3941_v31  ;;  %v4071_v47 = vadd.f32 %v4070_v20, %v4069_v33  ;;  %v3939_v57 = vadd.f32 %v3938_v18, %v3937_v58  ;;  %v4083_v46 = vadd.f32 %v4082_v17, %v4081_v41 }
 0x7c1   :  { %5467 = vrsqrt.f32 %v3944_v29  ;;  %v4088_v12 = vmul.f32 0.5, %v4066_v32  ;;  %v4090_v15 = vmul.f32 0.5, %v4080_v30  ;;  %v3958_v42 = vsub.s32 4, %v5536_v3  ;;  %v408_v32 = vld [vmem:[%s7517_s4] sm:$0xf] }
 0x7c2   :  { %5469 = vrsqrt.f32 %v3946_v14  ;;  %v4072_v45 = vrot.slane %v4071_v47, 1  ;;  %v3943_v1 = vmul.f32 0.5, %v3939_v57  ;;  %v4084_v16 = vrot.slane %v4083_v46, 2 }
 0x7c3   :  { %v4092_v6 = vadd.f32 1e-05, %v4088_v12  ;;  %v4094_v8 = vadd.f32 1e-05, %v4090_v15  ;;  %5471 = vrsqrt.f32 %v3945_v63  ;;  %v3978_v54 = vsub.s32 5, %v5536_v3 }
 0x7c4   :  { %v4073_v11 = vadd.f32 %v4072_v45, %v4071_v47  ;;  %v3947_v19 = vadd.f32 1e-05, %v3943_v1  ;;  %v4085_v22 = vadd.f32 %v4084_v16, %v4083_v46  ;;  %v3959_v2 = vrot.slane %v5484_v39, %v3958_v42 }
 0x7c5   :  { %5473 = vrsqrt.f32 %v4092_v6  ;;  %v3967_v44 = vrot.slane %v411_v13, %v3958_v42  ;;  %v3979_v61 = vrot.slane %v5484_v39, %v3978_v54  ;;  %v3987_v43 = vrot.slane %v411_v13, %v3978_v54 }
 0x7c6   :  { %5475 = vrsqrt.f32 %v4094_v8  ;;  %v4089_v38 = vmul.f32 0.5, %v4073_v11  ;;  %v4086_v35 = vrot.slane %v4085_v22, 1  ;;  %v4136_v45 = vrot.slane %v408_v32, %v6676_v55 }
 0x7c7   :  { %5477 = vrsqrt.f32 %v3947_v19  ;;  %v4132_v55 = vrot.slane %v408_v32, %v1300_v50 }
 0x7c8   :  { %v4093_v10 = vadd.f32 1e-05, %v4089_v38  ;;  %v4087_v51 = vadd.f32 %v4086_v35, %v4085_v22 }
 0x7ca   :  { %5479 = vrsqrt.f32 %v4093_v10  ;;  %v4091_v49 = vmul.f32 0.5, %v4087_v51 }
 0x7cb   :  { %v5468_v56 = vpop.eup %5467 }
 0x7cc   :  { %v5470_v37 = vpop.eup %5469  ;;  %v3952_v34 = vmul.f32 %v5468_v56, %v7424_v28  ;;  %v4095_v5 = vadd.f32 1e-05, %v4091_v49  ;;  %v5485_v28 = vld [vmem:[%s7515_s5 + $0x8] sm:$0x3f] }
 0x7cd   :  { %v5472_v25 = vpop.eup %5471  ;;  %v3954_v7 = vmul.f32 %v5470_v37, %v7427_v9  ;;  %v3963_v58 = vrot.slane %v5485_v28, %v3958_v42  ;;  %v412_v9 = vld [vmem:[%s7515_s5 + $0x18] sm:$0x3f]  ;;  %v3983_v20 = vrot.slane %v5485_v28, %v3978_v54 }
 0x7ce   :  { %5481 = vrsqrt.f32 %v4095_v5  ;;  %v3972_v62 = vmul.f32 %v3959_v2, %v3952_v34  ;;  %v3953_v33 = vmul.f32 %v5472_v25, %v7430_v59  ;;  %v3971_v29 = vrot.slane %v412_v9, %v3958_v42 }
 0x7cf   :  { %v5474_v53 = vpop.eup %5473  ;;  %v3974_v41 = vmul.f32 %v3967_v44, %v3954_v7  ;;  %v3991_v16 = vrot.slane %v412_v9, %v3978_v54 }
 0x7d0   :  { %v5476_v0 = vpop.eup %5475  ;;  %v4100_v52 = vmul.f32 %v5474_v53, %v7435_v27  ;;  %v3992_v18 = vadd.f32 %v3979_v61, %v3972_v62  ;;  %v3973_v17 = vmul.f32 %v3963_v58, %v3953_v33 }
 0x7d1   :  { %v4102_v36 = vmul.f32 %v5476_v0, %v7440_v40  ;;  %v5478_v23 = vpop.eup %5477  ;;  %v3994_v14 = vadd.f32 %v3987_v43, %v3974_v41 }
 0x7d2   :  { %v4104_v60 = vmul.f32 %v4100_v52, %v3959_v2  ;;  %v3955_v63 = vmul.f32 %v5478_v23, %v7445_v24  ;;  %v3993_v6 = vadd.f32 %v3983_v20, %v3973_v17  ;;  %v4128_v24 = vrot.slane %v408_v32, %v1292_v26 }
 0x7d3   :  { %v4106_v31 = vmul.f32 %v4102_v36, %v3967_v44 }
 0x7d4   :  { %v5480_v27 = vpop.eup %5479  ;;  %v4108_v59 = vadd.f32 %v4104_v60, %v3979_v61  ;;  %v3975_v11 = vmul.f32 %v3971_v29, %v3955_v63 }
 0x7d5   :  { %v4110_v30 = vadd.f32 %v4106_v31, %v3987_v43  ;;  %v4101_v40 = vmul.f32 %v5480_v27, %v7455_v48 }
 0x7d6   :  { %v4112_v47 = vsel %vm3870_vm4, %v3992_v18, %v4108_v59  ;;  %v3995_v51 = vadd.f32 %v3991_v16, %v3975_v11 }
 0x7d7   :  { %v4116_v57 = vmul.f32 0.2, %v4112_v47  ;;  %v4114_v46 = vsel %vm3870_vm4, %v3994_v14, %v4110_v30  ;;  %v4105_v12 = vmul.f32 %v4101_v40, %v3963_v58 }
 0x7d8   :  { %v5482_v15 = vpop.eup %5481  ;;  %v4118_v1 = vmul.f32 0.2, %v4114_v46 }
 0x7d9   :  { %v4109_v8 = vadd.f32 %v4105_v12, %v3983_v20  ;;  %v4103_v19 = vmul.f32 %v5482_v15, %v7465_v4  ;;  %v4120_v22 = vmax.f32 %v4112_v47, %v4116_v57  ;;  %v4140_v4 = vrot.slane %v408_v32, %v6682_v21 }
 0x7da   :  { %v4122_v48 = vmax.f32 %v4114_v46, %v4118_v1 }
 0x7db   :  { %v4113_v38 = vsel %vm3870_vm4, %v3993_v6, %v4109_v8  ;;  %v4107_v35 = vmul.f32 %v4103_v19, %v3971_v29  ;;  %v4145_v49 = vmul.f32 %v4128_v24, %v4120_v22 }
 0x7dc   :  { %v4147_v42 = vmul.f32 %v4136_v45, %v4122_v48  ;;  %v4117_v10 = vmul.f32 0.2, %v4113_v38 }
 0x7dd   :  { %v4111_v13 = vadd.f32 %v4107_v35, %v3991_v16 }
 0x7de   :  { %v4121_v56 = vmax.f32 %v4113_v38, %v4117_v10 }
 0x7df   :  { %v4115_v54 = vsel %vm3870_vm4, %v3995_v51, %v4111_v13 }
 0x7e0   :  { %v4146_v37 = vmul.f32 %v4132_v55, %v4121_v56  ;;  %v4119_v34 = vmul.f32 0.2, %v4115_v54 }
 0x7e2   :  { %v4153_v26 = vcombine.low %v4145_v49, %v4146_v37  ;;  %v4123_v39 = vmax.f32 %v4115_v54, %v4119_v34 }
 0x7e4   :  { %4157 = vst [vmem:[%s7518_s6] sm:$0xff] %v4153_v26  ;;  %v4148_v2 = vmul.f32 %v4140_v4, %v4123_v39 }
 0x7e6   :  { %v4154_v5 = vcombine.low %v4147_v42, %v4148_v2 }
 0x7e8   :  { %4158 = vst [vmem:[%s7518_s6 + $0x8] sm:$0xff] %v4154_v5 }

</bundles_post_ra>
